<compile_context>
chip_gen: v7x
topology: tpu7x:2x2x1
jax: 0.10.0
libtpu: 0.0.40
codegen_flags: <defaults>
</compile_context>

<pallas_src>
import functools
import math

import jax
import jax.numpy as jnp
from jax import lax
from jax.experimental import pallas as pl
from jax.experimental.pallas import tpu as pltpu

EPS = 1e-5  # layer_norm_eps


# ----------------------------- in-kernel helpers -----------------------------

def _layernorm(x, g, b):
    mu = jnp.mean(x, axis=-1, keepdims=True)
    var = jnp.mean(jnp.square(x - mu), axis=-1, keepdims=True)
    return (x - mu) * lax.rsqrt(var + EPS) * g + b


# ------------------------------- fused kernel --------------------------------

def fused_anti_encoder_kernel(
        x_ref, mask_ref,
        emb_w_ref, emb_b_ref, pos_ref,
        wqkv_ref, bqkv_ref, wo_ref, bo_ref, g1_ref, be1_ref,
        w1_ref, b1_ref, w2_ref, b2_ref, g2_ref, be2_ref,
        hg_ref, hbe_ref, hw_ref, hb_ref,
        o_ref, *, nhead, num_layers, bb, P):
    """patch-embed -> num_layers x TransformerEncoderLayer (post-norm, relu) -> mlp-head.

    Tokens from all bb batch elements are folded into one (bb*P, D) slab for every
    row-wise op and every matmul; attention is head-batched over that whole slab with
    an additive block-diagonal mask keeping each batch element self-contained.
    """
    D = emb_w_ref.shape[1]
    Dh = D // nhead
    PD = x_ref.shape[2]
    R = bb * P

    # ---- patch embedding + positional encoding (leading-axis reshapes only) ----
    xp = x_ref[...].reshape(R, PD)                                          # free: P % 8 == 0
    x2 = jnp.dot(xp, emb_w_ref[...], preferred_element_type=jnp.float32) + emb_b_ref[...]
    x2 = (x2.reshape(bb, P, D) + pos_ref[...]).reshape(R, D)                # pos broadcast
    # nn.Dropout is identity at inference.

    neg = mask_ref[...] if bb > 1 else None   # (R, R) additive batch-block mask

    dn_qk = (((2,), (2,)), ((0,), (0,)))      # (h,R,Dh) x (h,R,Dh)^T -> (h,R,R)
    dn_av = (((2,), (1,)), ((0,), (0,)))      # (h,R,R)  x (h,R,Dh)   -> (h,R,Dh)

    for l in range(num_layers):               # static unroll; stacked weights stay resident
        # ---- fused QKV: one (R,D)@(D,3D) matmul (attention scale folded into Q third) ----
        qkv = jnp.dot(x2, wqkv_ref[l], preferred_element_type=jnp.float32) + bqkv_ref[l]
        q3 = jnp.stack([qkv[:, h * Dh:(h + 1) * Dh] for h in range(nhead)])              # (h,R,Dh)
        k3 = jnp.stack([qkv[:, D + h * Dh:D + (h + 1) * Dh] for h in range(nhead)])
        v3 = jnp.stack([qkv[:, 2 * D + h * Dh:2 * D + (h + 1) * Dh] for h in range(nhead)])

        # ---- head-batched attention over all bb*P rows (no per-batch Python loop) ----
        sc = lax.dot_general(q3, k3, dn_qk, preferred_element_type=jnp.float32)          # (h,R,R)
        if neg is not None:
            sc = sc + neg                                   # block cross-batch attention
        sc = sc - jnp.max(sc, axis=-1, keepdims=True)
        e = jnp.exp(sc)
        attn = e * pl.reciprocal(jnp.sum(e, axis=-1, keepdims=True), approx=True)
        ctx = lax.dot_general(attn, v3, dn_av, preferred_element_type=jnp.float32)       # (h,R,Dh)

        # ---- dense output projection: heads packed along lanes, one (R,D)@(D,D) matmul ----
        ctx2 = jnp.concatenate([ctx[h] for h in range(nhead)], axis=1)                   # (R,D)
        attn_out = jnp.dot(ctx2, wo_ref[l], preferred_element_type=jnp.float32) + bo_ref[l]

        x2 = _layernorm(x2 + attn_out, g1_ref[l], be1_ref[l])

        # ---- feed-forward (dff zero-padded to a multiple of 128; exact: relu(0)=0) ----
        h1 = jnp.dot(x2, w1_ref[l], preferred_element_type=jnp.float32) + b1_ref[l]
        h1 = jnp.maximum(h1, 0.0)                                          # relu
        ff = jnp.dot(h1, w2_ref[l], preferred_element_type=jnp.float32) + b2_ref[l]
        x2 = _layernorm(x2 + ff, g2_ref[l], be2_ref[l])

    # ---- mlp head: LayerNorm -> Linear(d_model, patch_dim); single bulk store ----
    y = _layernorm(x2, hg_ref[...], hbe_ref[...])
    y = jnp.dot(y, hw_ref[...], preferred_element_type=jnp.float32) + hb_ref[...]
    o_ref[...] = y.reshape(bb, P, PD)


# ------------------------------ pallas wrapper --------------------------------

def _const_spec(shape):
    zeros = (0,) * len(shape)
    return pl.BlockSpec(shape, lambda b, _z=zeros: _z)


def _pick_grid_b(batch, P):
    """Split the batch across the two TensorCores only on 2-TC chips (v7x) AND only
    when each core gets >= 128 rows; otherwise the duplicated weight DMA and
    per-program overhead outweigh any MXU benefit (M=16 fills the MXU as poorly
    as M=32)."""
    try:
        kind = jax.devices()[0].device_kind.lower()
    except Exception:
        kind = ""
    two_tc = ("v7" in kind) or ("7x" in kind)
    if two_tc and batch >= 2 and batch % 2 == 0 and (batch // 2) * P >= 128:
        return 2
    return 1


def fused_anti_encoder(patches, p, *, nhead, grid_b):
    B, P, PD = patches.shape
    num_layers = p["w1"].shape[0]
    bb = B // grid_b
    R = bb * P

    # additive block-diagonal mask: 0 inside a batch element, -1e30 across elements.
    row = jnp.arange(R, dtype=jnp.int32) // P
    batch_mask = jnp.where(row[:, None] == row[None, :], 0.0, -1e30).astype(jnp.float32)

    kern = functools.partial(fused_anti_encoder_kernel,
                             nhead=nhead, num_layers=num_layers, bb=bb, P=P)
    weight_args = (p["emb_w"], p["emb_b"], p["pos"],
                   p["wqkv"], p["bqkv"], p["wo"], p["bo"], p["g1"], p["be1"],
                   p["w1"], p["b1"], p["w2"], p["b2"], p["g2"], p["be2"],
                   p["head_g"], p["head_be"], p["head_w"], p["head_b"])

    in_specs = [pl.BlockSpec((bb, P, PD), lambda b: (b, 0, 0)),
                _const_spec(batch_mask.shape)]
    in_specs += [_const_spec(a.shape) for a in weight_args]

    # explicit VMEM budget: actual (double-buffered) weight + block footprint + headroom.
    arg_bytes = sum(int(a.size) * a.dtype.itemsize for a in weight_args)
    arg_bytes += int(batch_mask.size) * 4 + 2 * bb * P * PD * 4
    vmem_limit = int(min(100 << 20, max(16 << 20, 4 * arg_bytes + (8 << 20))))

    return pl.pallas_call(
        kern,
        out_shape=jax.ShapeDtypeStruct((B, P, PD), jnp.float32),
        grid=(grid_b,),
        in_specs=in_specs,
        out_specs=pl.BlockSpec((bb, P, PD), lambda b: (b, 0, 0)),
        compiler_params=pltpu.CompilerParams(
            dimension_semantics=("parallel",),
            vmem_limit_bytes=vmem_limit),
    )(patches, batch_mask, *weight_args)


# --------------------------------- glue (JAX) ---------------------------------

def mkt_indexes(nu, N, case):
    # TODO(synk): exact Kaleidoscope.MKTkaleidoscopeIndexes source was not provided;
    # using a deterministic modular kaleidoscope-style shuffle (i -> nu*i mod N).
    del case
    return (nu * jnp.arange(N)) % N


def pseudo_inv_mkt(x, idx):
    # Kaleidoscope.pseudoInvMKTransform approximated as a row/column index gather.
    return x[:, :, idx, :][:, :, :, idx]


def to_patches(x, nu, shift, numCh):
    # 'b c (h p1) (w p2) -> b (h w) (p1 p2 c)'
    B = x.shape[0]
    x = x.reshape(B, numCh, nu, shift, nu, shift)
    x = jnp.transpose(x, (0, 2, 4, 3, 5, 1))       # b h w p1 p2 c
    return x.reshape(B, nu * nu, shift * shift * numCh)


def from_patches(x, nu, shift, numCh):
    # 'b (h w) (p1 p2 c) -> b c (h p1) (w p2)'
    B = x.shape[0]
    x = x.reshape(B, nu, nu, shift, shift, numCh)
    x = jnp.transpose(x, (0, 5, 1, 3, 2, 4))       # b c h p1 w p2
    return x.reshape(B, numCh, nu * shift, nu * shift)


def anti_encoder_forward(x, params, cfg):
    nu, shift, numCh, case = cfg["nu"], cfg["shift"], cfg["numCh"], cfg["case"]

    x = pseudo_inv_mkt(x, cfg["idx"])
    if case == 1:
        x = x[:, :, :-1, :-1]
    else:
        x = jnp.concatenate([x, x[:, :, -1:, :]], axis=2)
        x = jnp.concatenate([x, x[:, :, :, -1:]], axis=3)

    patches = to_patches(x, nu, shift, numCh)
    dec = fused_anti_encoder(patches, params, nhead=cfg["nhead"], grid_b=cfg["grid_b"])
    img = from_patches(dec, nu, shift, numCh)
    if case == 1:
        img = jnp.pad(img, ((0, 0), (0, 0), (0, 1), (0, 1)))   # zero row + zero column
    else:
        img = img[:, :, :-1, :-1]
    return img


def anti_vit_forward(x, all_params, cfg):
    im = x
    for p in all_params:
        im = anti_encoder_forward(im, p, cfg)
    return im


# ------------------------------ parameter init --------------------------------

def init_anti_encoder_params(key, *, d_model, num_layers, dff, patch_dim,
                             num_patches, nhead):
    dff_pad = -(-dff // 128) * 128            # zero-pad dff to a lane-aligned width
    Dh = d_model // nhead
    scale = 1.0 / math.sqrt(Dh)
    ks = jax.random.split(key, 3 + num_layers)

    wqkv, bqkv, wo, bo = [], [], [], []
    g1, be1, w1, b1, w2, b2, g2, be2 = [], [], [], [], [], [], [], []
    for i in range(num_layers):
        lk = jax.random.split(ks[3 + i], 4)
        # fused in_proj_weight.T with q|k|v along the output axis (as nn.MultiheadAttention);
        # the attention scale 1/sqrt(Dh) is folded into the Q third (weights and bias).
        w_qkv = 0.02 * jax.random.normal(lk[0], (d_model, 3 * d_model), jnp.float32)
        w_qkv = jnp.concatenate([w_qkv[:, :d_model] * scale, w_qkv[:, d_model:]], axis=1)
        b_qkv = jnp.zeros((1, 3 * d_model), jnp.float32)      # zero bias (scaled Q third trivial)
        wqkv.append(w_qkv)
        bqkv.append(b_qkv)
        wo.append(0.02 * jax.random.normal(lk[1], (d_model, d_model), jnp.float32))  # out_proj.weight.T
        bo.append(jnp.zeros((1, d_model), jnp.float32))
        g1.append(jnp.ones((1, d_model), jnp.float32))
        be1.append(jnp.zeros((1, d_model), jnp.float32))
        w1f = 0.02 * jax.random.normal(lk[2], (d_model, dff), jnp.float32)
        w2f = 0.02 * jax.random.normal(lk[3], (dff, d_model), jnp.float32)
        # exact zero-padding of the FFN: relu(0)=0 and padded w2 rows are 0.
        w1.append(jnp.pad(w1f, ((0, 0), (0, dff_pad - dff))))
        b1.append(jnp.zeros((1, dff_pad), jnp.float32))
        w2.append(jnp.pad(w2f, ((0, dff_pad - dff), (0, 0))))
        b2.append(jnp.zeros((1, d_model), jnp.float32))
        g2.append(jnp.ones((1, d_model), jnp.float32))
        be2.append(jnp.zeros((1, d_model), jnp.float32))

    stk = lambda xs: jnp.stack(xs, axis=0)
    return dict(
        emb_w=0.02 * jax.random.normal(ks[0], (patch_dim, d_model), jnp.float32),
        emb_b=jnp.zeros((1, d_model), jnp.float32),
        pos=jax.random.normal(ks[1], (num_patches, d_model), jnp.float32),
        head_g=jnp.ones((1, d_model), jnp.float32),
        head_be=jnp.zeros((1, d_model), jnp.float32),
        head_w=0.02 * jax.random.normal(ks[2], (d_model, patch_dim), jnp.float32),
        head_b=jnp.zeros((1, patch_dim), jnp.float32),
        wqkv=stk(wqkv), bqkv=stk(bqkv), wo=stk(wo), bo=stk(bo),
        g1=stk(g1), be1=stk(be1), w1=stk(w1), b1=stk(b1),
        w2=stk(w2), b2=stk(b2), g2=stk(g2), be2=stk(be2),
    )


# ------------------------------------ main -------------------------------------

if __name__ == "__main__":
    # Small config consistent with AntiVIT defaults where possible.
    B, numCh, N = 2, 2, 17
    nu, sigma = 4, 1
    layerNo = 2
    nhead = 8
    num_encoder_layers = 2

    if (N - sigma) % nu == 0:
        case, shift = 1, (N - sigma) // nu          # case 1, shift = 4
    else:
        case, shift = 2, (N + sigma) // nu

    d_model = shift * shift * numCh                 # 32
    dff = int(d_model ** 1.5)                       # 181 (padded to 256 inside init)
    patch_dim = shift * shift * numCh               # 32
    num_patches = nu * nu                           # 16

    key = jax.random.PRNGKey(0)
    kx, kp = jax.random.split(key)
    x = jax.random.normal(kx, (B, numCh, N, N), jnp.float32)

    cfg = dict(nu=nu, N=N, shift=shift, numCh=numCh, case=case, nhead=nhead,
               idx=mkt_indexes(nu, N, case), grid_b=_pick_grid_b(B, num_patches))

    enc_keys = jax.random.split(kp, layerNo)
    all_params = [
        init_anti_encoder_params(k, d_model=d_model, num_layers=num_encoder_layers,
                                 dff=dff, patch_dim=patch_dim,
                                 num_patches=num_patches, nhead=nhead)
        for k in enc_keys
    ]

    fwd = jax.jit(lambda xx, pp: anti_vit_forward(xx, pp, cfg))
    out = fwd(x, all_params)
    out = jax.block_until_ready(out)
    assert out.shape == (B, numCh, N, N) and out.dtype == jnp.float32
    print("KERNEL_OK")
</pallas_src>

<mosaic_0001>
module attributes {stable_mosaic.version = 11 : i64} {
  func.func @fused_anti_encoder_kernel(%arg0: i32, %arg1: memref<2x16x32xf32, #tpu.memory_space<vmem>>, %arg2: memref<32x32xf32, #tpu.memory_space<vmem>>, %arg3: memref<32x32xf32, #tpu.memory_space<vmem>>, %arg4: memref<1x32xf32, #tpu.memory_space<vmem>>, %arg5: memref<16x32xf32, #tpu.memory_space<vmem>>, %arg6: memref<2x32x96xf32, #tpu.memory_space<vmem>>, %arg7: memref<2x1x96xf32, #tpu.memory_space<vmem>>, %arg8: memref<2x32x32xf32, #tpu.memory_space<vmem>>, %arg9: memref<2x1x32xf32, #tpu.memory_space<vmem>>, %arg10: memref<2x1x32xf32, #tpu.memory_space<vmem>>, %arg11: memref<2x1x32xf32, #tpu.memory_space<vmem>>, %arg12: memref<2x32x256xf32, #tpu.memory_space<vmem>>, %arg13: memref<2x1x256xf32, #tpu.memory_space<vmem>>, %arg14: memref<2x256x32xf32, #tpu.memory_space<vmem>>, %arg15: memref<2x1x32xf32, #tpu.memory_space<vmem>>, %arg16: memref<2x1x32xf32, #tpu.memory_space<vmem>>, %arg17: memref<2x1x32xf32, #tpu.memory_space<vmem>>, %arg18: memref<1x32xf32, #tpu.memory_space<vmem>>, %arg19: memref<1x32xf32, #tpu.memory_space<vmem>>, %arg20: memref<32x32xf32, #tpu.memory_space<vmem>>, %arg21: memref<1x32xf32, #tpu.memory_space<vmem>>, %arg22: memref<2x16x32xf32, #tpu.memory_space<vmem>>) attributes {dimension_semantics = [#tpu.dimension_semantics<parallel>], iteration_bounds = array<i64: 1>, scalar_prefetch = 0 : i64, scratch_operands = 0 : i64, tpu.core_type = #tpu.core_type<tc>, window_params = [{transform_indices = @transform_0, window_bounds = array<i64: 2, 16, 32>}, {pipeline_mode = #tpu.pipeline_mode<synchronous>, transform_indices = @transform_1, window_bounds = array<i64: 32, 32>}, {pipeline_mode = #tpu.pipeline_mode<synchronous>, transform_indices = @transform_2, window_bounds = array<i64: 32, 32>}, {pipeline_mode = #tpu.pipeline_mode<synchronous>, transform_indices = @transform_3, window_bounds = array<i64: 1, 32>}, {pipeline_mode = #tpu.pipeline_mode<synchronous>, transform_indices = @transform_4, window_bounds = array<i64: 16, 32>}, {pipeline_mode = #tpu.pipeline_mode<synchronous>, transform_indices = @transform_5, window_bounds = array<i64: 2, 32, 96>}, {pipeline_mode = #tpu.pipeline_mode<synchronous>, transform_indices = @transform_6, window_bounds = array<i64: 2, 1, 96>}, {pipeline_mode = #tpu.pipeline_mode<synchronous>, transform_indices = @transform_7, window_bounds = array<i64: 2, 32, 32>}, {pipeline_mode = #tpu.pipeline_mode<synchronous>, transform_indices = @transform_8, window_bounds = array<i64: 2, 1, 32>}, {pipeline_mode = #tpu.pipeline_mode<synchronous>, transform_indices = @transform_9, window_bounds = array<i64: 2, 1, 32>}, {pipeline_mode = #tpu.pipeline_mode<synchronous>, transform_indices = @transform_10, window_bounds = array<i64: 2, 1, 32>}, {pipeline_mode = #tpu.pipeline_mode<synchronous>, transform_indices = @transform_11, window_bounds = array<i64: 2, 32, 256>}, {pipeline_mode = #tpu.pipeline_mode<synchronous>, transform_indices = @transform_12, window_bounds = array<i64: 2, 1, 256>}, {pipeline_mode = #tpu.pipeline_mode<synchronous>, transform_indices = @transform_13, window_bounds = array<i64: 2, 256, 32>}, {pipeline_mode = #tpu.pipeline_mode<synchronous>, transform_indices = @transform_14, window_bounds = array<i64: 2, 1, 32>}, {pipeline_mode = #tpu.pipeline_mode<synchronous>, transform_indices = @transform_15, window_bounds = array<i64: 2, 1, 32>}, {pipeline_mode = #tpu.pipeline_mode<synchronous>, transform_indices = @transform_16, window_bounds = array<i64: 2, 1, 32>}, {pipeline_mode = #tpu.pipeline_mode<synchronous>, transform_indices = @transform_17, window_bounds = array<i64: 1, 32>}, {pipeline_mode = #tpu.pipeline_mode<synchronous>, transform_indices = @transform_18, window_bounds = array<i64: 1, 32>}, {pipeline_mode = #tpu.pipeline_mode<synchronous>, transform_indices = @transform_19, window_bounds = array<i64: 32, 32>}, {pipeline_mode = #tpu.pipeline_mode<synchronous>, transform_indices = @transform_20, window_bounds = array<i64: 1, 32>}, {transform_indices = @transform_21, window_bounds = array<i64: 2, 16, 32>}]} {
    %c0 = arith.constant 0 : index
    %c0_0 = arith.constant 0 : index
    %c0_1 = arith.constant 0 : index
    %0 = vector.load %arg1[%c0, %c0_0, %c0_1] : memref<2x16x32xf32, #tpu.memory_space<vmem>>, vector<2x16x32xf32>
    %1 = vector.shape_cast %0 : vector<2x16x32xf32> to vector<32x32xf32>
    %c0_2 = arith.constant 0 : index
    %c0_3 = arith.constant 0 : index
    %2 = vector.load %arg3[%c0_2, %c0_3] : memref<32x32xf32, #tpu.memory_space<vmem>>, vector<32x32xf32>
    %cst = arith.constant dense<0.000000e+00> : vector<32x32xf32>
    %3 = tpu.matmul %1, %2, %cst {dimension_numbers = #tpu.dot_dimension_numbers<[1], [0], [0], [1], [0, 0, 1, 1], [], []>} : vector<32x32xf32>, vector<32x32xf32>, vector<32x32xf32> -> vector<32x32xf32>
    %c0_4 = arith.constant 0 : index
    %c0_5 = arith.constant 0 : index
    %4 = vector.load %arg4[%c0_4, %c0_5] : memref<1x32xf32, #tpu.memory_space<vmem>>, vector<1x32xf32>
    %5 = vector.broadcast %4 : vector<1x32xf32> to vector<32x32xf32>
    %6 = arith.addf %3, %5 : vector<32x32xf32>
    %7 = vector.shape_cast %6 : vector<32x32xf32> to vector<2x16x32xf32>
    %c0_6 = arith.constant 0 : index
    %c0_7 = arith.constant 0 : index
    %8 = vector.load %arg5[%c0_6, %c0_7] : memref<16x32xf32, #tpu.memory_space<vmem>>, vector<16x32xf32>
    %9 = vector.shape_cast %8 : vector<16x32xf32> to vector<1x16x32xf32>
    %10 = vector.broadcast %9 : vector<1x16x32xf32> to vector<2x16x32xf32>
    %11 = arith.addf %7, %10 : vector<2x16x32xf32>
    %12 = vector.shape_cast %11 : vector<2x16x32xf32> to vector<32x32xf32>
    %c0_8 = arith.constant 0 : index
    %c0_9 = arith.constant 0 : index
    %13 = vector.load %arg2[%c0_8, %c0_9] : memref<32x32xf32, #tpu.memory_space<vmem>>, vector<32x32xf32>
    %c0_10 = arith.constant 0 : index
    %c0_11 = arith.constant 0 : index
    %c0_12 = arith.constant 0 : index
    %14 = vector.load %arg6[%c0_10, %c0_11, %c0_12] : memref<2x32x96xf32, #tpu.memory_space<vmem>>, vector<1x32x96xf32>
    %15 = vector.shape_cast %14 : vector<1x32x96xf32> to vector<32x96xf32>
    %cst_13 = arith.constant dense<0.000000e+00> : vector<32x96xf32>
    %16 = tpu.matmul %12, %15, %cst_13 {dimension_numbers = #tpu.dot_dimension_numbers<[1], [0], [0], [1], [0, 0, 1, 1], [], []>} : vector<32x32xf32>, vector<32x96xf32>, vector<32x96xf32> -> vector<32x96xf32>
    %c0_14 = arith.constant 0 : index
    %c0_15 = arith.constant 0 : index
    %c0_16 = arith.constant 0 : index
    %17 = vector.load %arg7[%c0_14, %c0_15, %c0_16] : memref<2x1x96xf32, #tpu.memory_space<vmem>>, vector<1x1x96xf32>
    %18 = vector.shape_cast %17 : vector<1x1x96xf32> to vector<1x96xf32>
    %19 = vector.broadcast %18 : vector<1x96xf32> to vector<32x96xf32>
    %20 = arith.addf %16, %19 : vector<32x96xf32>
    %21 = vector.extract_strided_slice %20 {offsets = [0, 0], sizes = [32, 4], strides = [1, 1]} : vector<32x96xf32> to vector<32x4xf32>
    %22 = vector.extract_strided_slice %20 {offsets = [0, 4], sizes = [32, 4], strides = [1, 1]} : vector<32x96xf32> to vector<32x4xf32>
    %23 = vector.extract_strided_slice %20 {offsets = [0, 8], sizes = [32, 4], strides = [1, 1]} : vector<32x96xf32> to vector<32x4xf32>
    %24 = vector.extract_strided_slice %20 {offsets = [0, 12], sizes = [32, 4], strides = [1, 1]} : vector<32x96xf32> to vector<32x4xf32>
    %25 = vector.extract_strided_slice %20 {offsets = [0, 16], sizes = [32, 4], strides = [1, 1]} : vector<32x96xf32> to vector<32x4xf32>
    %26 = vector.extract_strided_slice %20 {offsets = [0, 20], sizes = [32, 4], strides = [1, 1]} : vector<32x96xf32> to vector<32x4xf32>
    %27 = vector.extract_strided_slice %20 {offsets = [0, 24], sizes = [32, 4], strides = [1, 1]} : vector<32x96xf32> to vector<32x4xf32>
    %28 = vector.extract_strided_slice %20 {offsets = [0, 28], sizes = [32, 4], strides = [1, 1]} : vector<32x96xf32> to vector<32x4xf32>
    %29 = vector.shape_cast %21 : vector<32x4xf32> to vector<1x32x4xf32>
    %30 = vector.shape_cast %22 : vector<32x4xf32> to vector<1x32x4xf32>
    %31 = vector.shape_cast %23 : vector<32x4xf32> to vector<1x32x4xf32>
    %32 = vector.shape_cast %24 : vector<32x4xf32> to vector<1x32x4xf32>
    %33 = vector.shape_cast %25 : vector<32x4xf32> to vector<1x32x4xf32>
    %34 = vector.shape_cast %26 : vector<32x4xf32> to vector<1x32x4xf32>
    %35 = vector.shape_cast %27 : vector<32x4xf32> to vector<1x32x4xf32>
    %36 = vector.shape_cast %28 : vector<32x4xf32> to vector<1x32x4xf32>
    %37 = tpu.concatenate %29, %30, %31, %32, %33, %34, %35, %36 in 0 : vector<1x32x4xf32>, vector<1x32x4xf32>, vector<1x32x4xf32>, vector<1x32x4xf32>, vector<1x32x4xf32>, vector<1x32x4xf32>, vector<1x32x4xf32>, vector<1x32x4xf32> -> vector<8x32x4xf32>
    %38 = vector.extract_strided_slice %20 {offsets = [0, 32], sizes = [32, 4], strides = [1, 1]} : vector<32x96xf32> to vector<32x4xf32>
    %39 = vector.extract_strided_slice %20 {offsets = [0, 36], sizes = [32, 4], strides = [1, 1]} : vector<32x96xf32> to vector<32x4xf32>
    %40 = vector.extract_strided_slice %20 {offsets = [0, 40], sizes = [32, 4], strides = [1, 1]} : vector<32x96xf32> to vector<32x4xf32>
    %41 = vector.extract_strided_slice %20 {offsets = [0, 44], sizes = [32, 4], strides = [1, 1]} : vector<32x96xf32> to vector<32x4xf32>
    %42 = vector.extract_strided_slice %20 {offsets = [0, 48], sizes = [32, 4], strides = [1, 1]} : vector<32x96xf32> to vector<32x4xf32>
    %43 = vector.extract_strided_slice %20 {offsets = [0, 52], sizes = [32, 4], strides = [1, 1]} : vector<32x96xf32> to vector<32x4xf32>
    %44 = vector.extract_strided_slice %20 {offsets = [0, 56], sizes = [32, 4], strides = [1, 1]} : vector<32x96xf32> to vector<32x4xf32>
    %45 = vector.extract_strided_slice %20 {offsets = [0, 60], sizes = [32, 4], strides = [1, 1]} : vector<32x96xf32> to vector<32x4xf32>
    %46 = vector.shape_cast %38 : vector<32x4xf32> to vector<1x32x4xf32>
    %47 = vector.shape_cast %39 : vector<32x4xf32> to vector<1x32x4xf32>
    %48 = vector.shape_cast %40 : vector<32x4xf32> to vector<1x32x4xf32>
    %49 = vector.shape_cast %41 : vector<32x4xf32> to vector<1x32x4xf32>
    %50 = vector.shape_cast %42 : vector<32x4xf32> to vector<1x32x4xf32>
    %51 = vector.shape_cast %43 : vector<32x4xf32> to vector<1x32x4xf32>
    %52 = vector.shape_cast %44 : vector<32x4xf32> to vector<1x32x4xf32>
    %53 = vector.shape_cast %45 : vector<32x4xf32> to vector<1x32x4xf32>
    %54 = tpu.concatenate %46, %47, %48, %49, %50, %51, %52, %53 in 0 : vector<1x32x4xf32>, vector<1x32x4xf32>, vector<1x32x4xf32>, vector<1x32x4xf32>, vector<1x32x4xf32>, vector<1x32x4xf32>, vector<1x32x4xf32>, vector<1x32x4xf32> -> vector<8x32x4xf32>
    %55 = vector.extract_strided_slice %20 {offsets = [0, 64], sizes = [32, 4], strides = [1, 1]} : vector<32x96xf32> to vector<32x4xf32>
    %56 = vector.extract_strided_slice %20 {offsets = [0, 68], sizes = [32, 4], strides = [1, 1]} : vector<32x96xf32> to vector<32x4xf32>
    %57 = vector.extract_strided_slice %20 {offsets = [0, 72], sizes = [32, 4], strides = [1, 1]} : vector<32x96xf32> to vector<32x4xf32>
    %58 = vector.extract_strided_slice %20 {offsets = [0, 76], sizes = [32, 4], strides = [1, 1]} : vector<32x96xf32> to vector<32x4xf32>
    %59 = vector.extract_strided_slice %20 {offsets = [0, 80], sizes = [32, 4], strides = [1, 1]} : vector<32x96xf32> to vector<32x4xf32>
    %60 = vector.extract_strided_slice %20 {offsets = [0, 84], sizes = [32, 4], strides = [1, 1]} : vector<32x96xf32> to vector<32x4xf32>
    %61 = vector.extract_strided_slice %20 {offsets = [0, 88], sizes = [32, 4], strides = [1, 1]} : vector<32x96xf32> to vector<32x4xf32>
    %62 = vector.extract_strided_slice %20 {offsets = [0, 92], sizes = [32, 4], strides = [1, 1]} : vector<32x96xf32> to vector<32x4xf32>
    %63 = vector.shape_cast %55 : vector<32x4xf32> to vector<1x32x4xf32>
    %64 = vector.shape_cast %56 : vector<32x4xf32> to vector<1x32x4xf32>
    %65 = vector.shape_cast %57 : vector<32x4xf32> to vector<1x32x4xf32>
    %66 = vector.shape_cast %58 : vector<32x4xf32> to vector<1x32x4xf32>
    %67 = vector.shape_cast %59 : vector<32x4xf32> to vector<1x32x4xf32>
    %68 = vector.shape_cast %60 : vector<32x4xf32> to vector<1x32x4xf32>
    %69 = vector.shape_cast %61 : vector<32x4xf32> to vector<1x32x4xf32>
    %70 = vector.shape_cast %62 : vector<32x4xf32> to vector<1x32x4xf32>
    %71 = tpu.concatenate %63, %64, %65, %66, %67, %68, %69, %70 in 0 : vector<1x32x4xf32>, vector<1x32x4xf32>, vector<1x32x4xf32>, vector<1x32x4xf32>, vector<1x32x4xf32>, vector<1x32x4xf32>, vector<1x32x4xf32>, vector<1x32x4xf32> -> vector<8x32x4xf32>
    %cst_17 = arith.constant dense<0.000000e+00> : vector<8x32x32xf32>
    %72 = tpu.matmul %37, %54, %cst_17 {dimension_numbers = #tpu.dot_dimension_numbers<[2], [2], [1], [1], [0, 0, 0, 1, 1, 1], [0], [0]>} : vector<8x32x4xf32>, vector<8x32x4xf32>, vector<8x32x32xf32> -> vector<8x32x32xf32>
    %73 = vector.shape_cast %13 : vector<32x32xf32> to vector<1x32x32xf32>
    %74 = vector.broadcast %73 : vector<1x32x32xf32> to vector<8x32x32xf32>
    %75 = arith.addf %72, %74 : vector<8x32x32xf32>
    %cst_18 = arith.constant dense<0xFF800000> : vector<8x32xf32>
    %76 = vector.multi_reduction <maximumf>, %75, %cst_18 [2] : vector<8x32x32xf32> to vector<8x32xf32>
    %77 = vector.shape_cast %76 : vector<8x32xf32> to vector<8x32x1xf32>
    %78 = vector.broadcast %77 : vector<8x32x1xf32> to vector<8x32x32xf32>
    %79 = arith.subf %75, %78 : vector<8x32x32xf32>
    %80 = math.exp %79 : vector<8x32x32xf32>
    %cst_19 = arith.constant dense<0.000000e+00> : vector<8x32xf32>
    %81 = vector.multi_reduction <add>, %80, %cst_19 [2] : vector<8x32x32xf32> to vector<8x32xf32>
    %82 = vector.shape_cast %81 : vector<8x32xf32> to vector<8x32x1xf32>
    %83 = tpu.reciprocal %82 {approx = true} : vector<8x32x1xf32> -> vector<8x32x1xf32>
    %84 = vector.broadcast %83 : vector<8x32x1xf32> to vector<8x32x32xf32>
    %85 = arith.mulf %80, %84 : vector<8x32x32xf32>
    %cst_20 = arith.constant dense<0.000000e+00> : vector<8x32x4xf32>
    %86 = tpu.matmul %85, %71, %cst_20 {dimension_numbers = #tpu.dot_dimension_numbers<[2], [1], [1], [2], [0, 0, 0, 1, 1, 2], [0], [0]>} : vector<8x32x32xf32>, vector<8x32x4xf32>, vector<8x32x4xf32> -> vector<8x32x4xf32>
    %87 = vector.extract_strided_slice %86 {offsets = [0, 0, 0], sizes = [1, 32, 4], strides = [1, 1, 1]} : vector<8x32x4xf32> to vector<1x32x4xf32>
    %88 = vector.shape_cast %87 : vector<1x32x4xf32> to vector<32x4xf32>
    %89 = vector.extract_strided_slice %86 {offsets = [1, 0, 0], sizes = [1, 32, 4], strides = [1, 1, 1]} : vector<8x32x4xf32> to vector<1x32x4xf32>
    %90 = vector.shape_cast %89 : vector<1x32x4xf32> to vector<32x4xf32>
    %91 = vector.extract_strided_slice %86 {offsets = [2, 0, 0], sizes = [1, 32, 4], strides = [1, 1, 1]} : vector<8x32x4xf32> to vector<1x32x4xf32>
    %92 = vector.shape_cast %91 : vector<1x32x4xf32> to vector<32x4xf32>
    %93 = vector.extract_strided_slice %86 {offsets = [3, 0, 0], sizes = [1, 32, 4], strides = [1, 1, 1]} : vector<8x32x4xf32> to vector<1x32x4xf32>
    %94 = vector.shape_cast %93 : vector<1x32x4xf32> to vector<32x4xf32>
    %95 = vector.extract_strided_slice %86 {offsets = [4, 0, 0], sizes = [1, 32, 4], strides = [1, 1, 1]} : vector<8x32x4xf32> to vector<1x32x4xf32>
    %96 = vector.shape_cast %95 : vector<1x32x4xf32> to vector<32x4xf32>
    %97 = vector.extract_strided_slice %86 {offsets = [5, 0, 0], sizes = [1, 32, 4], strides = [1, 1, 1]} : vector<8x32x4xf32> to vector<1x32x4xf32>
    %98 = vector.shape_cast %97 : vector<1x32x4xf32> to vector<32x4xf32>
    %99 = vector.extract_strided_slice %86 {offsets = [6, 0, 0], sizes = [1, 32, 4], strides = [1, 1, 1]} : vector<8x32x4xf32> to vector<1x32x4xf32>
    %100 = vector.shape_cast %99 : vector<1x32x4xf32> to vector<32x4xf32>
    %101 = vector.extract_strided_slice %86 {offsets = [7, 0, 0], sizes = [1, 32, 4], strides = [1, 1, 1]} : vector<8x32x4xf32> to vector<1x32x4xf32>
    %102 = vector.shape_cast %101 : vector<1x32x4xf32> to vector<32x4xf32>
    %103 = tpu.concatenate %88, %90, %92, %94, %96, %98, %100, %102 in 1 : vector<32x4xf32>, vector<32x4xf32>, vector<32x4xf32>, vector<32x4xf32>, vector<32x4xf32>, vector<32x4xf32>, vector<32x4xf32>, vector<32x4xf32> -> vector<32x32xf32>
    %c0_21 = arith.constant 0 : index
    %c0_22 = arith.constant 0 : index
    %c0_23 = arith.constant 0 : index
    %104 = vector.load %arg8[%c0_21, %c0_22, %c0_23] : memref<2x32x32xf32, #tpu.memory_space<vmem>>, vector<1x32x32xf32>
    %105 = vector.shape_cast %104 : vector<1x32x32xf32> to vector<32x32xf32>
    %cst_24 = arith.constant dense<0.000000e+00> : vector<32x32xf32>
    %106 = tpu.matmul %103, %105, %cst_24 {dimension_numbers = #tpu.dot_dimension_numbers<[1], [0], [0], [1], [0, 0, 1, 1], [], []>} : vector<32x32xf32>, vector<32x32xf32>, vector<32x32xf32> -> vector<32x32xf32>
    %c0_25 = arith.constant 0 : index
    %c0_26 = arith.constant 0 : index
    %c0_27 = arith.constant 0 : index
    %107 = vector.load %arg9[%c0_25, %c0_26, %c0_27] : memref<2x1x32xf32, #tpu.memory_space<vmem>>, vector<1x1x32xf32>
    %108 = vector.shape_cast %107 : vector<1x1x32xf32> to vector<1x32xf32>
    %109 = vector.broadcast %108 : vector<1x32xf32> to vector<32x32xf32>
    %110 = arith.addf %106, %109 : vector<32x32xf32>
    %111 = arith.addf %12, %110 : vector<32x32xf32>
    %c0_28 = arith.constant 0 : index
    %c0_29 = arith.constant 0 : index
    %c0_30 = arith.constant 0 : index
    %112 = vector.load %arg10[%c0_28, %c0_29, %c0_30] : memref<2x1x32xf32, #tpu.memory_space<vmem>>, vector<1x1x32xf32>
    %113 = vector.shape_cast %112 : vector<1x1x32xf32> to vector<1x32xf32>
    %c0_31 = arith.constant 0 : index
    %c0_32 = arith.constant 0 : index
    %c0_33 = arith.constant 0 : index
    %114 = vector.load %arg11[%c0_31, %c0_32, %c0_33] : memref<2x1x32xf32, #tpu.memory_space<vmem>>, vector<1x1x32xf32>
    %115 = vector.shape_cast %114 : vector<1x1x32xf32> to vector<1x32xf32>
    %cst_34 = arith.constant dense<0.000000e+00> : vector<32xf32>
    %116 = vector.multi_reduction <add>, %111, %cst_34 [1] : vector<32x32xf32> to vector<32xf32>
    %117 = vector.shape_cast %116 : vector<32xf32> to vector<32x1xf32>
    %cst_35 = arith.constant 3.200000e+01 : f32
    %118 = vector.broadcast %cst_35 : f32 to vector<32x1xf32>
    %119 = arith.divf %117, %118 : vector<32x1xf32>
    %120 = vector.broadcast %119 : vector<32x1xf32> to vector<32x32xf32>
    %121 = arith.subf %111, %120 : vector<32x32xf32>
    %122 = arith.mulf %121, %121 : vector<32x32xf32>
    %cst_36 = arith.constant dense<0.000000e+00> : vector<32xf32>
    %123 = vector.multi_reduction <add>, %122, %cst_36 [1] : vector<32x32xf32> to vector<32xf32>
    %124 = vector.shape_cast %123 : vector<32xf32> to vector<32x1xf32>
    %cst_37 = arith.constant 3.200000e+01 : f32
    %125 = vector.broadcast %cst_37 : f32 to vector<32x1xf32>
    %126 = arith.divf %124, %125 : vector<32x1xf32>
    %127 = vector.broadcast %119 : vector<32x1xf32> to vector<32x32xf32>
    %128 = arith.subf %111, %127 : vector<32x32xf32>
    %cst_38 = arith.constant 9.99999974E-6 : f32
    %129 = vector.broadcast %cst_38 : f32 to vector<32x1xf32>
    %130 = arith.addf %126, %129 : vector<32x1xf32>
    %131 = math.rsqrt %130 : vector<32x1xf32>
    %132 = vector.broadcast %131 : vector<32x1xf32> to vector<32x32xf32>
    %133 = arith.mulf %128, %132 : vector<32x32xf32>
    %134 = vector.broadcast %113 : vector<1x32xf32> to vector<32x32xf32>
    %135 = arith.mulf %133, %134 : vector<32x32xf32>
    %136 = vector.broadcast %115 : vector<1x32xf32> to vector<32x32xf32>
    %137 = arith.addf %135, %136 : vector<32x32xf32>
    %c0_39 = arith.constant 0 : index
    %c0_40 = arith.constant 0 : index
    %c0_41 = arith.constant 0 : index
    %138 = vector.load %arg12[%c0_39, %c0_40, %c0_41] : memref<2x32x256xf32, #tpu.memory_space<vmem>>, vector<1x32x256xf32>
    %139 = vector.shape_cast %138 : vector<1x32x256xf32> to vector<32x256xf32>
    %cst_42 = arith.constant dense<0.000000e+00> : vector<32x256xf32>
    %140 = tpu.matmul %137, %139, %cst_42 {dimension_numbers = #tpu.dot_dimension_numbers<[1], [0], [0], [1], [0, 0, 1, 1], [], []>} : vector<32x32xf32>, vector<32x256xf32>, vector<32x256xf32> -> vector<32x256xf32>
    %c0_43 = arith.constant 0 : index
    %c0_44 = arith.constant 0 : index
    %c0_45 = arith.constant 0 : index
    %141 = vector.load %arg13[%c0_43, %c0_44, %c0_45] : memref<2x1x256xf32, #tpu.memory_space<vmem>>, vector<1x1x256xf32>
    %142 = vector.shape_cast %141 : vector<1x1x256xf32> to vector<1x256xf32>
    %143 = vector.broadcast %142 : vector<1x256xf32> to vector<32x256xf32>
    %144 = arith.addf %140, %143 : vector<32x256xf32>
    %cst_46 = arith.constant 0.000000e+00 : f32
    %145 = vector.broadcast %cst_46 : f32 to vector<32x256xf32>
    %146 = arith.maximumf %144, %145 : vector<32x256xf32>
    %c0_47 = arith.constant 0 : index
    %c0_48 = arith.constant 0 : index
    %c0_49 = arith.constant 0 : index
    %147 = vector.load %arg14[%c0_47, %c0_48, %c0_49] : memref<2x256x32xf32, #tpu.memory_space<vmem>>, vector<1x256x32xf32>
    %148 = vector.shape_cast %147 : vector<1x256x32xf32> to vector<256x32xf32>
    %cst_50 = arith.constant dense<0.000000e+00> : vector<32x32xf32>
    %149 = tpu.matmul %146, %148, %cst_50 {dimension_numbers = #tpu.dot_dimension_numbers<[1], [0], [0], [1], [0, 0, 1, 1], [], []>} : vector<32x256xf32>, vector<256x32xf32>, vector<32x32xf32> -> vector<32x32xf32>
    %c0_51 = arith.constant 0 : index
    %c0_52 = arith.constant 0 : index
    %c0_53 = arith.constant 0 : index
    %150 = vector.load %arg15[%c0_51, %c0_52, %c0_53] : memref<2x1x32xf32, #tpu.memory_space<vmem>>, vector<1x1x32xf32>
    %151 = vector.shape_cast %150 : vector<1x1x32xf32> to vector<1x32xf32>
    %152 = vector.broadcast %151 : vector<1x32xf32> to vector<32x32xf32>
    %153 = arith.addf %149, %152 : vector<32x32xf32>
    %154 = arith.addf %137, %153 : vector<32x32xf32>
    %c0_54 = arith.constant 0 : index
    %c0_55 = arith.constant 0 : index
    %c0_56 = arith.constant 0 : index
    %155 = vector.load %arg16[%c0_54, %c0_55, %c0_56] : memref<2x1x32xf32, #tpu.memory_space<vmem>>, vector<1x1x32xf32>
    %156 = vector.shape_cast %155 : vector<1x1x32xf32> to vector<1x32xf32>
    %c0_57 = arith.constant 0 : index
    %c0_58 = arith.constant 0 : index
    %c0_59 = arith.constant 0 : index
    %157 = vector.load %arg17[%c0_57, %c0_58, %c0_59] : memref<2x1x32xf32, #tpu.memory_space<vmem>>, vector<1x1x32xf32>
    %158 = vector.shape_cast %157 : vector<1x1x32xf32> to vector<1x32xf32>
    %cst_60 = arith.constant dense<0.000000e+00> : vector<32xf32>
    %159 = vector.multi_reduction <add>, %154, %cst_60 [1] : vector<32x32xf32> to vector<32xf32>
    %160 = vector.shape_cast %159 : vector<32xf32> to vector<32x1xf32>
    %cst_61 = arith.constant 3.200000e+01 : f32
    %161 = vector.broadcast %cst_61 : f32 to vector<32x1xf32>
    %162 = arith.divf %160, %161 : vector<32x1xf32>
    %163 = vector.broadcast %162 : vector<32x1xf32> to vector<32x32xf32>
    %164 = arith.subf %154, %163 : vector<32x32xf32>
    %165 = arith.mulf %164, %164 : vector<32x32xf32>
    %cst_62 = arith.constant dense<0.000000e+00> : vector<32xf32>
    %166 = vector.multi_reduction <add>, %165, %cst_62 [1] : vector<32x32xf32> to vector<32xf32>
    %167 = vector.shape_cast %166 : vector<32xf32> to vector<32x1xf32>
    %cst_63 = arith.constant 3.200000e+01 : f32
    %168 = vector.broadcast %cst_63 : f32 to vector<32x1xf32>
    %169 = arith.divf %167, %168 : vector<32x1xf32>
    %170 = vector.broadcast %162 : vector<32x1xf32> to vector<32x32xf32>
    %171 = arith.subf %154, %170 : vector<32x32xf32>
    %cst_64 = arith.constant 9.99999974E-6 : f32
    %172 = vector.broadcast %cst_64 : f32 to vector<32x1xf32>
    %173 = arith.addf %169, %172 : vector<32x1xf32>
    %174 = math.rsqrt %173 : vector<32x1xf32>
    %175 = vector.broadcast %174 : vector<32x1xf32> to vector<32x32xf32>
    %176 = arith.mulf %171, %175 : vector<32x32xf32>
    %177 = vector.broadcast %156 : vector<1x32xf32> to vector<32x32xf32>
    %178 = arith.mulf %176, %177 : vector<32x32xf32>
    %179 = vector.broadcast %158 : vector<1x32xf32> to vector<32x32xf32>
    %180 = arith.addf %178, %179 : vector<32x32xf32>
    %c1 = arith.constant 1 : index
    %c0_65 = arith.constant 0 : index
    %c0_66 = arith.constant 0 : index
    %181 = vector.load %arg6[%c1, %c0_65, %c0_66] : memref<2x32x96xf32, #tpu.memory_space<vmem>>, vector<1x32x96xf32>
    %182 = vector.shape_cast %181 : vector<1x32x96xf32> to vector<32x96xf32>
    %cst_67 = arith.constant dense<0.000000e+00> : vector<32x96xf32>
    %183 = tpu.matmul %180, %182, %cst_67 {dimension_numbers = #tpu.dot_dimension_numbers<[1], [0], [0], [1], [0, 0, 1, 1], [], []>} : vector<32x32xf32>, vector<32x96xf32>, vector<32x96xf32> -> vector<32x96xf32>
    %c1_68 = arith.constant 1 : index
    %c0_69 = arith.constant 0 : index
    %c0_70 = arith.constant 0 : index
    %184 = vector.load %arg7[%c1_68, %c0_69, %c0_70] : memref<2x1x96xf32, #tpu.memory_space<vmem>>, vector<1x1x96xf32>
    %185 = vector.shape_cast %184 : vector<1x1x96xf32> to vector<1x96xf32>
    %186 = vector.broadcast %185 : vector<1x96xf32> to vector<32x96xf32>
    %187 = arith.addf %183, %186 : vector<32x96xf32>
    %188 = vector.extract_strided_slice %187 {offsets = [0, 0], sizes = [32, 4], strides = [1, 1]} : vector<32x96xf32> to vector<32x4xf32>
    %189 = vector.extract_strided_slice %187 {offsets = [0, 4], sizes = [32, 4], strides = [1, 1]} : vector<32x96xf32> to vector<32x4xf32>
    %190 = vector.extract_strided_slice %187 {offsets = [0, 8], sizes = [32, 4], strides = [1, 1]} : vector<32x96xf32> to vector<32x4xf32>
    %191 = vector.extract_strided_slice %187 {offsets = [0, 12], sizes = [32, 4], strides = [1, 1]} : vector<32x96xf32> to vector<32x4xf32>
    %192 = vector.extract_strided_slice %187 {offsets = [0, 16], sizes = [32, 4], strides = [1, 1]} : vector<32x96xf32> to vector<32x4xf32>
    %193 = vector.extract_strided_slice %187 {offsets = [0, 20], sizes = [32, 4], strides = [1, 1]} : vector<32x96xf32> to vector<32x4xf32>
    %194 = vector.extract_strided_slice %187 {offsets = [0, 24], sizes = [32, 4], strides = [1, 1]} : vector<32x96xf32> to vector<32x4xf32>
    %195 = vector.extract_strided_slice %187 {offsets = [0, 28], sizes = [32, 4], strides = [1, 1]} : vector<32x96xf32> to vector<32x4xf32>
    %196 = vector.shape_cast %188 : vector<32x4xf32> to vector<1x32x4xf32>
    %197 = vector.shape_cast %189 : vector<32x4xf32> to vector<1x32x4xf32>
    %198 = vector.shape_cast %190 : vector<32x4xf32> to vector<1x32x4xf32>
    %199 = vector.shape_cast %191 : vector<32x4xf32> to vector<1x32x4xf32>
    %200 = vector.shape_cast %192 : vector<32x4xf32> to vector<1x32x4xf32>
    %201 = vector.shape_cast %193 : vector<32x4xf32> to vector<1x32x4xf32>
    %202 = vector.shape_cast %194 : vector<32x4xf32> to vector<1x32x4xf32>
    %203 = vector.shape_cast %195 : vector<32x4xf32> to vector<1x32x4xf32>
    %204 = tpu.concatenate %196, %197, %198, %199, %200, %201, %202, %203 in 0 : vector<1x32x4xf32>, vector<1x32x4xf32>, vector<1x32x4xf32>, vector<1x32x4xf32>, vector<1x32x4xf32>, vector<1x32x4xf32>, vector<1x32x4xf32>, vector<1x32x4xf32> -> vector<8x32x4xf32>
    %205 = vector.extract_strided_slice %187 {offsets = [0, 32], sizes = [32, 4], strides = [1, 1]} : vector<32x96xf32> to vector<32x4xf32>
    %206 = vector.extract_strided_slice %187 {offsets = [0, 36], sizes = [32, 4], strides = [1, 1]} : vector<32x96xf32> to vector<32x4xf32>
    %207 = vector.extract_strided_slice %187 {offsets = [0, 40], sizes = [32, 4], strides = [1, 1]} : vector<32x96xf32> to vector<32x4xf32>
    %208 = vector.extract_strided_slice %187 {offsets = [0, 44], sizes = [32, 4], strides = [1, 1]} : vector<32x96xf32> to vector<32x4xf32>
    %209 = vector.extract_strided_slice %187 {offsets = [0, 48], sizes = [32, 4], strides = [1, 1]} : vector<32x96xf32> to vector<32x4xf32>
    %210 = vector.extract_strided_slice %187 {offsets = [0, 52], sizes = [32, 4], strides = [1, 1]} : vector<32x96xf32> to vector<32x4xf32>
    %211 = vector.extract_strided_slice %187 {offsets = [0, 56], sizes = [32, 4], strides = [1, 1]} : vector<32x96xf32> to vector<32x4xf32>
    %212 = vector.extract_strided_slice %187 {offsets = [0, 60], sizes = [32, 4], strides = [1, 1]} : vector<32x96xf32> to vector<32x4xf32>
    %213 = vector.shape_cast %205 : vector<32x4xf32> to vector<1x32x4xf32>
    %214 = vector.shape_cast %206 : vector<32x4xf32> to vector<1x32x4xf32>
    %215 = vector.shape_cast %207 : vector<32x4xf32> to vector<1x32x4xf32>
    %216 = vector.shape_cast %208 : vector<32x4xf32> to vector<1x32x4xf32>
    %217 = vector.shape_cast %209 : vector<32x4xf32> to vector<1x32x4xf32>
    %218 = vector.shape_cast %210 : vector<32x4xf32> to vector<1x32x4xf32>
    %219 = vector.shape_cast %211 : vector<32x4xf32> to vector<1x32x4xf32>
    %220 = vector.shape_cast %212 : vector<32x4xf32> to vector<1x32x4xf32>
    %221 = tpu.concatenate %213, %214, %215, %216, %217, %218, %219, %220 in 0 : vector<1x32x4xf32>, vector<1x32x4xf32>, vector<1x32x4xf32>, vector<1x32x4xf32>, vector<1x32x4xf32>, vector<1x32x4xf32>, vector<1x32x4xf32>, vector<1x32x4xf32> -> vector<8x32x4xf32>
    %222 = vector.extract_strided_slice %187 {offsets = [0, 64], sizes = [32, 4], strides = [1, 1]} : vector<32x96xf32> to vector<32x4xf32>
    %223 = vector.extract_strided_slice %187 {offsets = [0, 68], sizes = [32, 4], strides = [1, 1]} : vector<32x96xf32> to vector<32x4xf32>
    %224 = vector.extract_strided_slice %187 {offsets = [0, 72], sizes = [32, 4], strides = [1, 1]} : vector<32x96xf32> to vector<32x4xf32>
    %225 = vector.extract_strided_slice %187 {offsets = [0, 76], sizes = [32, 4], strides = [1, 1]} : vector<32x96xf32> to vector<32x4xf32>
    %226 = vector.extract_strided_slice %187 {offsets = [0, 80], sizes = [32, 4], strides = [1, 1]} : vector<32x96xf32> to vector<32x4xf32>
    %227 = vector.extract_strided_slice %187 {offsets = [0, 84], sizes = [32, 4], strides = [1, 1]} : vector<32x96xf32> to vector<32x4xf32>
    %228 = vector.extract_strided_slice %187 {offsets = [0, 88], sizes = [32, 4], strides = [1, 1]} : vector<32x96xf32> to vector<32x4xf32>
    %229 = vector.extract_strided_slice %187 {offsets = [0, 92], sizes = [32, 4], strides = [1, 1]} : vector<32x96xf32> to vector<32x4xf32>
    %230 = vector.shape_cast %222 : vector<32x4xf32> to vector<1x32x4xf32>
    %231 = vector.shape_cast %223 : vector<32x4xf32> to vector<1x32x4xf32>
    %232 = vector.shape_cast %224 : vector<32x4xf32> to vector<1x32x4xf32>
    %233 = vector.shape_cast %225 : vector<32x4xf32> to vector<1x32x4xf32>
    %234 = vector.shape_cast %226 : vector<32x4xf32> to vector<1x32x4xf32>
    %235 = vector.shape_cast %227 : vector<32x4xf32> to vector<1x32x4xf32>
    %236 = vector.shape_cast %228 : vector<32x4xf32> to vector<1x32x4xf32>
    %237 = vector.shape_cast %229 : vector<32x4xf32> to vector<1x32x4xf32>
    %238 = tpu.concatenate %230, %231, %232, %233, %234, %235, %236, %237 in 0 : vector<1x32x4xf32>, vector<1x32x4xf32>, vector<1x32x4xf32>, vector<1x32x4xf32>, vector<1x32x4xf32>, vector<1x32x4xf32>, vector<1x32x4xf32>, vector<1x32x4xf32> -> vector<8x32x4xf32>
    %cst_71 = arith.constant dense<0.000000e+00> : vector<8x32x32xf32>
    %239 = tpu.matmul %204, %221, %cst_71 {dimension_numbers = #tpu.dot_dimension_numbers<[2], [2], [1], [1], [0, 0, 0, 1, 1, 1], [0], [0]>} : vector<8x32x4xf32>, vector<8x32x4xf32>, vector<8x32x32xf32> -> vector<8x32x32xf32>
    %240 = vector.shape_cast %13 : vector<32x32xf32> to vector<1x32x32xf32>
    %241 = vector.broadcast %240 : vector<1x32x32xf32> to vector<8x32x32xf32>
    %242 = arith.addf %239, %241 : vector<8x32x32xf32>
    %cst_72 = arith.constant dense<0xFF800000> : vector<8x32xf32>
    %243 = vector.multi_reduction <maximumf>, %242, %cst_72 [2] : vector<8x32x32xf32> to vector<8x32xf32>
    %244 = vector.shape_cast %243 : vector<8x32xf32> to vector<8x32x1xf32>
    %245 = vector.broadcast %244 : vector<8x32x1xf32> to vector<8x32x32xf32>
    %246 = arith.subf %242, %245 : vector<8x32x32xf32>
    %247 = math.exp %246 : vector<8x32x32xf32>
    %cst_73 = arith.constant dense<0.000000e+00> : vector<8x32xf32>
    %248 = vector.multi_reduction <add>, %247, %cst_73 [2] : vector<8x32x32xf32> to vector<8x32xf32>
    %249 = vector.shape_cast %248 : vector<8x32xf32> to vector<8x32x1xf32>
    %250 = tpu.reciprocal %249 {approx = true} : vector<8x32x1xf32> -> vector<8x32x1xf32>
    %251 = vector.broadcast %250 : vector<8x32x1xf32> to vector<8x32x32xf32>
    %252 = arith.mulf %247, %251 : vector<8x32x32xf32>
    %cst_74 = arith.constant dense<0.000000e+00> : vector<8x32x4xf32>
    %253 = tpu.matmul %252, %238, %cst_74 {dimension_numbers = #tpu.dot_dimension_numbers<[2], [1], [1], [2], [0, 0, 0, 1, 1, 2], [0], [0]>} : vector<8x32x32xf32>, vector<8x32x4xf32>, vector<8x32x4xf32> -> vector<8x32x4xf32>
    %254 = vector.extract_strided_slice %253 {offsets = [0, 0, 0], sizes = [1, 32, 4], strides = [1, 1, 1]} : vector<8x32x4xf32> to vector<1x32x4xf32>
    %255 = vector.shape_cast %254 : vector<1x32x4xf32> to vector<32x4xf32>
    %256 = vector.extract_strided_slice %253 {offsets = [1, 0, 0], sizes = [1, 32, 4], strides = [1, 1, 1]} : vector<8x32x4xf32> to vector<1x32x4xf32>
    %257 = vector.shape_cast %256 : vector<1x32x4xf32> to vector<32x4xf32>
    %258 = vector.extract_strided_slice %253 {offsets = [2, 0, 0], sizes = [1, 32, 4], strides = [1, 1, 1]} : vector<8x32x4xf32> to vector<1x32x4xf32>
    %259 = vector.shape_cast %258 : vector<1x32x4xf32> to vector<32x4xf32>
    %260 = vector.extract_strided_slice %253 {offsets = [3, 0, 0], sizes = [1, 32, 4], strides = [1, 1, 1]} : vector<8x32x4xf32> to vector<1x32x4xf32>
    %261 = vector.shape_cast %260 : vector<1x32x4xf32> to vector<32x4xf32>
    %262 = vector.extract_strided_slice %253 {offsets = [4, 0, 0], sizes = [1, 32, 4], strides = [1, 1, 1]} : vector<8x32x4xf32> to vector<1x32x4xf32>
    %263 = vector.shape_cast %262 : vector<1x32x4xf32> to vector<32x4xf32>
    %264 = vector.extract_strided_slice %253 {offsets = [5, 0, 0], sizes = [1, 32, 4], strides = [1, 1, 1]} : vector<8x32x4xf32> to vector<1x32x4xf32>
    %265 = vector.shape_cast %264 : vector<1x32x4xf32> to vector<32x4xf32>
    %266 = vector.extract_strided_slice %253 {offsets = [6, 0, 0], sizes = [1, 32, 4], strides = [1, 1, 1]} : vector<8x32x4xf32> to vector<1x32x4xf32>
    %267 = vector.shape_cast %266 : vector<1x32x4xf32> to vector<32x4xf32>
    %268 = vector.extract_strided_slice %253 {offsets = [7, 0, 0], sizes = [1, 32, 4], strides = [1, 1, 1]} : vector<8x32x4xf32> to vector<1x32x4xf32>
    %269 = vector.shape_cast %268 : vector<1x32x4xf32> to vector<32x4xf32>
    %270 = tpu.concatenate %255, %257, %259, %261, %263, %265, %267, %269 in 1 : vector<32x4xf32>, vector<32x4xf32>, vector<32x4xf32>, vector<32x4xf32>, vector<32x4xf32>, vector<32x4xf32>, vector<32x4xf32>, vector<32x4xf32> -> vector<32x32xf32>
    %c1_75 = arith.constant 1 : index
    %c0_76 = arith.constant 0 : index
    %c0_77 = arith.constant 0 : index
    %271 = vector.load %arg8[%c1_75, %c0_76, %c0_77] : memref<2x32x32xf32, #tpu.memory_space<vmem>>, vector<1x32x32xf32>
    %272 = vector.shape_cast %271 : vector<1x32x32xf32> to vector<32x32xf32>
    %cst_78 = arith.constant dense<0.000000e+00> : vector<32x32xf32>
    %273 = tpu.matmul %270, %272, %cst_78 {dimension_numbers = #tpu.dot_dimension_numbers<[1], [0], [0], [1], [0, 0, 1, 1], [], []>} : vector<32x32xf32>, vector<32x32xf32>, vector<32x32xf32> -> vector<32x32xf32>
    %c1_79 = arith.constant 1 : index
    %c0_80 = arith.constant 0 : index
    %c0_81 = arith.constant 0 : index
    %274 = vector.load %arg9[%c1_79, %c0_80, %c0_81] : memref<2x1x32xf32, #tpu.memory_space<vmem>>, vector<1x1x32xf32>
    %275 = vector.shape_cast %274 : vector<1x1x32xf32> to vector<1x32xf32>
    %276 = vector.broadcast %275 : vector<1x32xf32> to vector<32x32xf32>
    %277 = arith.addf %273, %276 : vector<32x32xf32>
    %278 = arith.addf %180, %277 : vector<32x32xf32>
    %c1_82 = arith.constant 1 : index
    %c0_83 = arith.constant 0 : index
    %c0_84 = arith.constant 0 : index
    %279 = vector.load %arg10[%c1_82, %c0_83, %c0_84] : memref<2x1x32xf32, #tpu.memory_space<vmem>>, vector<1x1x32xf32>
    %280 = vector.shape_cast %279 : vector<1x1x32xf32> to vector<1x32xf32>
    %c1_85 = arith.constant 1 : index
    %c0_86 = arith.constant 0 : index
    %c0_87 = arith.constant 0 : index
    %281 = vector.load %arg11[%c1_85, %c0_86, %c0_87] : memref<2x1x32xf32, #tpu.memory_space<vmem>>, vector<1x1x32xf32>
    %282 = vector.shape_cast %281 : vector<1x1x32xf32> to vector<1x32xf32>
    %cst_88 = arith.constant dense<0.000000e+00> : vector<32xf32>
    %283 = vector.multi_reduction <add>, %278, %cst_88 [1] : vector<32x32xf32> to vector<32xf32>
    %284 = vector.shape_cast %283 : vector<32xf32> to vector<32x1xf32>
    %cst_89 = arith.constant 3.200000e+01 : f32
    %285 = vector.broadcast %cst_89 : f32 to vector<32x1xf32>
    %286 = arith.divf %284, %285 : vector<32x1xf32>
    %287 = vector.broadcast %286 : vector<32x1xf32> to vector<32x32xf32>
    %288 = arith.subf %278, %287 : vector<32x32xf32>
    %289 = arith.mulf %288, %288 : vector<32x32xf32>
    %cst_90 = arith.constant dense<0.000000e+00> : vector<32xf32>
    %290 = vector.multi_reduction <add>, %289, %cst_90 [1] : vector<32x32xf32> to vector<32xf32>
    %291 = vector.shape_cast %290 : vector<32xf32> to vector<32x1xf32>
    %cst_91 = arith.constant 3.200000e+01 : f32
    %292 = vector.broadcast %cst_91 : f32 to vector<32x1xf32>
    %293 = arith.divf %291, %292 : vector<32x1xf32>
    %294 = vector.broadcast %286 : vector<32x1xf32> to vector<32x32xf32>
    %295 = arith.subf %278, %294 : vector<32x32xf32>
    %cst_92 = arith.constant 9.99999974E-6 : f32
    %296 = vector.broadcast %cst_92 : f32 to vector<32x1xf32>
    %297 = arith.addf %293, %296 : vector<32x1xf32>
    %298 = math.rsqrt %297 : vector<32x1xf32>
    %299 = vector.broadcast %298 : vector<32x1xf32> to vector<32x32xf32>
    %300 = arith.mulf %295, %299 : vector<32x32xf32>
    %301 = vector.broadcast %280 : vector<1x32xf32> to vector<32x32xf32>
    %302 = arith.mulf %300, %301 : vector<32x32xf32>
    %303 = vector.broadcast %282 : vector<1x32xf32> to vector<32x32xf32>
    %304 = arith.addf %302, %303 : vector<32x32xf32>
    %c1_93 = arith.constant 1 : index
    %c0_94 = arith.constant 0 : index
    %c0_95 = arith.constant 0 : index
    %305 = vector.load %arg12[%c1_93, %c0_94, %c0_95] : memref<2x32x256xf32, #tpu.memory_space<vmem>>, vector<1x32x256xf32>
    %306 = vector.shape_cast %305 : vector<1x32x256xf32> to vector<32x256xf32>
    %cst_96 = arith.constant dense<0.000000e+00> : vector<32x256xf32>
    %307 = tpu.matmul %304, %306, %cst_96 {dimension_numbers = #tpu.dot_dimension_numbers<[1], [0], [0], [1], [0, 0, 1, 1], [], []>} : vector<32x32xf32>, vector<32x256xf32>, vector<32x256xf32> -> vector<32x256xf32>
    %c1_97 = arith.constant 1 : index
    %c0_98 = arith.constant 0 : index
    %c0_99 = arith.constant 0 : index
    %308 = vector.load %arg13[%c1_97, %c0_98, %c0_99] : memref<2x1x256xf32, #tpu.memory_space<vmem>>, vector<1x1x256xf32>
    %309 = vector.shape_cast %308 : vector<1x1x256xf32> to vector<1x256xf32>
    %310 = vector.broadcast %309 : vector<1x256xf32> to vector<32x256xf32>
    %311 = arith.addf %307, %310 : vector<32x256xf32>
    %cst_100 = arith.constant 0.000000e+00 : f32
    %312 = vector.broadcast %cst_100 : f32 to vector<32x256xf32>
    %313 = arith.maximumf %311, %312 : vector<32x256xf32>
    %c1_101 = arith.constant 1 : index
    %c0_102 = arith.constant 0 : index
    %c0_103 = arith.constant 0 : index
    %314 = vector.load %arg14[%c1_101, %c0_102, %c0_103] : memref<2x256x32xf32, #tpu.memory_space<vmem>>, vector<1x256x32xf32>
    %315 = vector.shape_cast %314 : vector<1x256x32xf32> to vector<256x32xf32>
    %cst_104 = arith.constant dense<0.000000e+00> : vector<32x32xf32>
    %316 = tpu.matmul %313, %315, %cst_104 {dimension_numbers = #tpu.dot_dimension_numbers<[1], [0], [0], [1], [0, 0, 1, 1], [], []>} : vector<32x256xf32>, vector<256x32xf32>, vector<32x32xf32> -> vector<32x32xf32>
    %c1_105 = arith.constant 1 : index
    %c0_106 = arith.constant 0 : index
    %c0_107 = arith.constant 0 : index
    %317 = vector.load %arg15[%c1_105, %c0_106, %c0_107] : memref<2x1x32xf32, #tpu.memory_space<vmem>>, vector<1x1x32xf32>
    %318 = vector.shape_cast %317 : vector<1x1x32xf32> to vector<1x32xf32>
    %319 = vector.broadcast %318 : vector<1x32xf32> to vector<32x32xf32>
    %320 = arith.addf %316, %319 : vector<32x32xf32>
    %321 = arith.addf %304, %320 : vector<32x32xf32>
    %c1_108 = arith.constant 1 : index
    %c0_109 = arith.constant 0 : index
    %c0_110 = arith.constant 0 : index
    %322 = vector.load %arg16[%c1_108, %c0_109, %c0_110] : memref<2x1x32xf32, #tpu.memory_space<vmem>>, vector<1x1x32xf32>
    %323 = vector.shape_cast %322 : vector<1x1x32xf32> to vector<1x32xf32>
    %c1_111 = arith.constant 1 : index
    %c0_112 = arith.constant 0 : index
    %c0_113 = arith.constant 0 : index
    %324 = vector.load %arg17[%c1_111, %c0_112, %c0_113] : memref<2x1x32xf32, #tpu.memory_space<vmem>>, vector<1x1x32xf32>
    %325 = vector.shape_cast %324 : vector<1x1x32xf32> to vector<1x32xf32>
    %cst_114 = arith.constant dense<0.000000e+00> : vector<32xf32>
    %326 = vector.multi_reduction <add>, %321, %cst_114 [1] : vector<32x32xf32> to vector<32xf32>
    %327 = vector.shape_cast %326 : vector<32xf32> to vector<32x1xf32>
    %cst_115 = arith.constant 3.200000e+01 : f32
    %328 = vector.broadcast %cst_115 : f32 to vector<32x1xf32>
    %329 = arith.divf %327, %328 : vector<32x1xf32>
    %330 = vector.broadcast %329 : vector<32x1xf32> to vector<32x32xf32>
    %331 = arith.subf %321, %330 : vector<32x32xf32>
    %332 = arith.mulf %331, %331 : vector<32x32xf32>
    %cst_116 = arith.constant dense<0.000000e+00> : vector<32xf32>
    %333 = vector.multi_reduction <add>, %332, %cst_116 [1] : vector<32x32xf32> to vector<32xf32>
    %334 = vector.shape_cast %333 : vector<32xf32> to vector<32x1xf32>
    %cst_117 = arith.constant 3.200000e+01 : f32
    %335 = vector.broadcast %cst_117 : f32 to vector<32x1xf32>
    %336 = arith.divf %334, %335 : vector<32x1xf32>
    %337 = vector.broadcast %329 : vector<32x1xf32> to vector<32x32xf32>
    %338 = arith.subf %321, %337 : vector<32x32xf32>
    %cst_118 = arith.constant 9.99999974E-6 : f32
    %339 = vector.broadcast %cst_118 : f32 to vector<32x1xf32>
    %340 = arith.addf %336, %339 : vector<32x1xf32>
    %341 = math.rsqrt %340 : vector<32x1xf32>
    %342 = vector.broadcast %341 : vector<32x1xf32> to vector<32x32xf32>
    %343 = arith.mulf %338, %342 : vector<32x32xf32>
    %344 = vector.broadcast %323 : vector<1x32xf32> to vector<32x32xf32>
    %345 = arith.mulf %343, %344 : vector<32x32xf32>
    %346 = vector.broadcast %325 : vector<1x32xf32> to vector<32x32xf32>
    %347 = arith.addf %345, %346 : vector<32x32xf32>
    %c0_119 = arith.constant 0 : index
    %c0_120 = arith.constant 0 : index
    %348 = vector.load %arg18[%c0_119, %c0_120] : memref<1x32xf32, #tpu.memory_space<vmem>>, vector<1x32xf32>
    %c0_121 = arith.constant 0 : index
    %c0_122 = arith.constant 0 : index
    %349 = vector.load %arg19[%c0_121, %c0_122] : memref<1x32xf32, #tpu.memory_space<vmem>>, vector<1x32xf32>
    %cst_123 = arith.constant dense<0.000000e+00> : vector<32xf32>
    %350 = vector.multi_reduction <add>, %347, %cst_123 [1] : vector<32x32xf32> to vector<32xf32>
    %351 = vector.shape_cast %350 : vector<32xf32> to vector<32x1xf32>
    %cst_124 = arith.constant 3.200000e+01 : f32
    %352 = vector.broadcast %cst_124 : f32 to vector<32x1xf32>
    %353 = arith.divf %351, %352 : vector<32x1xf32>
    %354 = vector.broadcast %353 : vector<32x1xf32> to vector<32x32xf32>
    %355 = arith.subf %347, %354 : vector<32x32xf32>
    %356 = arith.mulf %355, %355 : vector<32x32xf32>
    %cst_125 = arith.constant dense<0.000000e+00> : vector<32xf32>
    %357 = vector.multi_reduction <add>, %356, %cst_125 [1] : vector<32x32xf32> to vector<32xf32>
    %358 = vector.shape_cast %357 : vector<32xf32> to vector<32x1xf32>
    %cst_126 = arith.constant 3.200000e+01 : f32
    %359 = vector.broadcast %cst_126 : f32 to vector<32x1xf32>
    %360 = arith.divf %358, %359 : vector<32x1xf32>
    %361 = vector.broadcast %353 : vector<32x1xf32> to vector<32x32xf32>
    %362 = arith.subf %347, %361 : vector<32x32xf32>
    %cst_127 = arith.constant 9.99999974E-6 : f32
    %363 = vector.broadcast %cst_127 : f32 to vector<32x1xf32>
    %364 = arith.addf %360, %363 : vector<32x1xf32>
    %365 = math.rsqrt %364 : vector<32x1xf32>
    %366 = vector.broadcast %365 : vector<32x1xf32> to vector<32x32xf32>
    %367 = arith.mulf %362, %366 : vector<32x32xf32>
    %368 = vector.broadcast %348 : vector<1x32xf32> to vector<32x32xf32>
    %369 = arith.mulf %367, %368 : vector<32x32xf32>
    %370 = vector.broadcast %349 : vector<1x32xf32> to vector<32x32xf32>
    %371 = arith.addf %369, %370 : vector<32x32xf32>
    %c0_128 = arith.constant 0 : index
    %c0_129 = arith.constant 0 : index
    %372 = vector.load %arg20[%c0_128, %c0_129] : memref<32x32xf32, #tpu.memory_space<vmem>>, vector<32x32xf32>
    %cst_130 = arith.constant dense<0.000000e+00> : vector<32x32xf32>
    %373 = tpu.matmul %371, %372, %cst_130 {dimension_numbers = #tpu.dot_dimension_numbers<[1], [0], [0], [1], [0, 0, 1, 1], [], []>} : vector<32x32xf32>, vector<32x32xf32>, vector<32x32xf32> -> vector<32x32xf32>
    %c0_131 = arith.constant 0 : index
    %c0_132 = arith.constant 0 : index
    %374 = vector.load %arg21[%c0_131, %c0_132] : memref<1x32xf32, #tpu.memory_space<vmem>>, vector<1x32xf32>
    %375 = vector.broadcast %374 : vector<1x32xf32> to vector<32x32xf32>
    %376 = arith.addf %373, %375 : vector<32x32xf32>
    %377 = vector.shape_cast %376 : vector<32x32xf32> to vector<2x16x32xf32>
    %c0_133 = arith.constant 0 : index
    %c0_134 = arith.constant 0 : index
    %c0_135 = arith.constant 0 : index
    %378 = vector.load %arg22[%c0_133, %c0_134, %c0_135] : memref<2x16x32xf32, #tpu.memory_space<vmem>>, vector<2x16x32xf32>
    tpu.vector_store %arg22[%c0_133, %c0_134, %c0_135], %377 {strides = array<i32>} : memref<2x16x32xf32, #tpu.memory_space<vmem>>, vector<2x16x32xf32>,
    return
  }
  func.func @transform_0(%arg0: i32) -> (i32, i32, i32) {
    %c0_i32 = arith.constant 0 : i32
    %c0_i32_0 = arith.constant 0 : i32
    %c0_i32_1 = arith.constant 0 : i32
    return %arg0, %c0_i32, %c0_i32_0 : i32, i32, i32
  }
  func.func @transform_1(%arg0: i32) -> (i32, i32) {
    %c0_i32 = arith.constant 0 : i32
    %c0_i32_0 = arith.constant 0 : i32
    %c0_i32_1 = arith.constant 0 : i32
    return %c0_i32, %c0_i32_0 : i32, i32
  }
  func.func @transform_2(%arg0: i32) -> (i32, i32) {
    %c0_i32 = arith.constant 0 : i32
    %c0_i32_0 = arith.constant 0 : i32
    %c0_i32_1 = arith.constant 0 : i32
    return %c0_i32, %c0_i32_0 : i32, i32
  }
  func.func @transform_3(%arg0: i32) -> (i32, i32) {
    %c0_i32 = arith.constant 0 : i32
    %c0_i32_0 = arith.constant 0 : i32
    %c0_i32_1 = arith.constant 0 : i32
    return %c0_i32, %c0_i32_0 : i32, i32
  }
  func.func @transform_4(%arg0: i32) -> (i32, i32) {
    %c0_i32 = arith.constant 0 : i32
    %c0_i32_0 = arith.constant 0 : i32
    %c0_i32_1 = arith.constant 0 : i32
    return %c0_i32, %c0_i32_0 : i32, i32
  }
  func.func @transform_5(%arg0: i32) -> (i32, i32, i32) {
    %c0_i32 = arith.constant 0 : i32
    %c0_i32_0 = arith.constant 0 : i32
    %c0_i32_1 = arith.constant 0 : i32
    %c0_i32_2 = arith.constant 0 : i32
    return %c0_i32, %c0_i32_0, %c0_i32_1 : i32, i32, i32
  }
  func.func @transform_6(%arg0: i32) -> (i32, i32, i32) {
    %c0_i32 = arith.constant 0 : i32
    %c0_i32_0 = arith.constant 0 : i32
    %c0_i32_1 = arith.constant 0 : i32
    %c0_i32_2 = arith.constant 0 : i32
    return %c0_i32, %c0_i32_0, %c0_i32_1 : i32, i32, i32
  }
  func.func @transform_7(%arg0: i32) -> (i32, i32, i32) {
    %c0_i32 = arith.constant 0 : i32
    %c0_i32_0 = arith.constant 0 : i32
    %c0_i32_1 = arith.constant 0 : i32
    %c0_i32_2 = arith.constant 0 : i32
    return %c0_i32, %c0_i32_0, %c0_i32_1 : i32, i32, i32
  }
  func.func @transform_8(%arg0: i32) -> (i32, i32, i32) {
    %c0_i32 = arith.constant 0 : i32
    %c0_i32_0 = arith.constant 0 : i32
    %c0_i32_1 = arith.constant 0 : i32
    %c0_i32_2 = arith.constant 0 : i32
    return %c0_i32, %c0_i32_0, %c0_i32_1 : i32, i32, i32
  }
  func.func @transform_9(%arg0: i32) -> (i32, i32, i32) {
    %c0_i32 = arith.constant 0 : i32
    %c0_i32_0 = arith.constant 0 : i32
    %c0_i32_1 = arith.constant 0 : i32
    %c0_i32_2 = arith.constant 0 : i32
    return %c0_i32, %c0_i32_0, %c0_i32_1 : i32, i32, i32
  }
  func.func @transform_10(%arg0: i32) -> (i32, i32, i32) {
    %c0_i32 = arith.constant 0 : i32
    %c0_i32_0 = arith.constant 0 : i32
    %c0_i32_1 = arith.constant 0 : i32
    %c0_i32_2 = arith.constant 0 : i32
    return %c0_i32, %c0_i32_0, %c0_i32_1 : i32, i32, i32
  }
  func.func @transform_11(%arg0: i32) -> (i32, i32, i32) {
    %c0_i32 = arith.constant 0 : i32
    %c0_i32_0 = arith.constant 0 : i32
    %c0_i32_1 = arith.constant 0 : i32
    %c0_i32_2 = arith.constant 0 : i32
    return %c0_i32, %c0_i32_0, %c0_i32_1 : i32, i32, i32
  }
  func.func @transform_12(%arg0: i32) -> (i32, i32, i32) {
    %c0_i32 = arith.constant 0 : i32
    %c0_i32_0 = arith.constant 0 : i32
    %c0_i32_1 = arith.constant 0 : i32
    %c0_i32_2 = arith.constant 0 : i32
    return %c0_i32, %c0_i32_0, %c0_i32_1 : i32, i32, i32
  }
  func.func @transform_13(%arg0: i32) -> (i32, i32, i32) {
    %c0_i32 = arith.constant 0 : i32
    %c0_i32_0 = arith.constant 0 : i32
    %c0_i32_1 = arith.constant 0 : i32
    %c0_i32_2 = arith.constant 0 : i32
    return %c0_i32, %c0_i32_0, %c0_i32_1 : i32, i32, i32
  }
  func.func @transform_14(%arg0: i32) -> (i32, i32, i32) {
    %c0_i32 = arith.constant 0 : i32
    %c0_i32_0 = arith.constant 0 : i32
    %c0_i32_1 = arith.constant 0 : i32
    %c0_i32_2 = arith.constant 0 : i32
    return %c0_i32, %c0_i32_0, %c0_i32_1 : i32, i32, i32
  }
  func.func @transform_15(%arg0: i32) -> (i32, i32, i32) {
    %c0_i32 = arith.constant 0 : i32
    %c0_i32_0 = arith.constant 0 : i32
    %c0_i32_1 = arith.constant 0 : i32
    %c0_i32_2 = arith.constant 0 : i32
    return %c0_i32, %c0_i32_0, %c0_i32_1 : i32, i32, i32
  }
  func.func @transform_16(%arg0: i32) -> (i32, i32, i32) {
    %c0_i32 = arith.constant 0 : i32
    %c0_i32_0 = arith.constant 0 : i32
    %c0_i32_1 = arith.constant 0 : i32
    %c0_i32_2 = arith.constant 0 : i32
    return %c0_i32, %c0_i32_0, %c0_i32_1 : i32, i32, i32
  }
  func.func @transform_17(%arg0: i32) -> (i32, i32) {
    %c0_i32 = arith.constant 0 : i32
    %c0_i32_0 = arith.constant 0 : i32
    %c0_i32_1 = arith.constant 0 : i32
    return %c0_i32, %c0_i32_0 : i32, i32
  }
  func.func @transform_18(%arg0: i32) -> (i32, i32) {
    %c0_i32 = arith.constant 0 : i32
    %c0_i32_0 = arith.constant 0 : i32
    %c0_i32_1 = arith.constant 0 : i32
    return %c0_i32, %c0_i32_0 : i32, i32
  }
  func.func @transform_19(%arg0: i32) -> (i32, i32) {
    %c0_i32 = arith.constant 0 : i32
    %c0_i32_0 = arith.constant 0 : i32
    %c0_i32_1 = arith.constant 0 : i32
    return %c0_i32, %c0_i32_0 : i32, i32
  }
  func.func @transform_20(%arg0: i32) -> (i32, i32) {
    %c0_i32 = arith.constant 0 : i32
    %c0_i32_0 = arith.constant 0 : i32
    %c0_i32_1 = arith.constant 0 : i32
    return %c0_i32, %c0_i32_0 : i32, i32
  }
  func.func @transform_21(%arg0: i32) -> (i32, i32, i32) {
    %c0_i32 = arith.constant 0 : i32
    %c0_i32_0 = arith.constant 0 : i32
    %c0_i32_1 = arith.constant 0 : i32
    return %arg0, %c0_i32, %c0_i32_0 : i32, i32, i32
  }
}

</mosaic_0001>

<bundles_post_ra>
// kernel: _lambda_.2
= control target key start
LH: loop header
LB: loop body
LE: loop exit
PB: predicated region body
PF: predicated region fallthrough
CT: control target
= control target key end

     0   :  { %vm83_vm0 = vcmask 261120   ;;  %vm367_vm1 = vcmask 31744   ;;  %s8550_s30 = smov 124   ;;  %s11027_s23 = smov 116   ;;  %vm2572_vm3 = vcmask 64512   ;;  %vm2577_vm4 = vcmask 97280   ;;  %s10971_s2 = inlined_call_operand.vmem [shape: f32[32,32], index: 2, kind: input, shape index: {}]   ;;  %s10972_s0 = inlined_call_operand.vmem [shape: f32[2,16,32], index: 0, kind: input, shape index: {}]   ;;  %s10973_s5 = inlined_call_operand.vmem [shape: f32[2,32,96], index: 5, kind: input, shape index: {}]   ;;  %s10974_s3 = inlined_call_operand.vmem [shape: f32[1,32], index: 3, kind: input, shape index: {}]   ;;  %s10975_s4 = inlined_call_operand.vmem [shape: f32[16,32], index: 4, kind: input, shape index: {}]   ;;  %s10976_s6 = inlined_call_operand.vmem [shape: f32[2,1,96], index: 6, kind: input, shape index: {}]   ;;  %s10977_s1 = inlined_call_operand.vmem [shape: f32[32,32], index: 1, kind: input, shape index: {}]   ;;  %s10978_s7 = inlined_call_operand.vmem [shape: f32[2,32,32], index: 7, kind: input, shape index: {}]   ;;  %s10979_s8 = inlined_call_operand.vmem [shape: f32[2,1,32], index: 8, kind: input, shape index: {}]   ;;  %s10980_s11 = inlined_call_operand.vmem [shape: f32[2,32,256], index: 11, kind: input, shape index: {}]   ;;  %s10981_s13 = inlined_call_operand.vmem [shape: f32[2,256,32], index: 13, kind: input, shape index: {}]   ;;  %s10982_s9 = inlined_call_operand.vmem [shape: f32[2,1,32], index: 9, kind: input, shape index: {}]   ;;  %s10983_s10 = inlined_call_operand.vmem [shape: f32[2,1,32], index: 10, kind: input, shape index: {}]   ;;  %s10984_s12 = inlined_call_operand.vmem [shape: f32[2,1,256], index: 12, kind: input, shape index: {}]   ;;  %s10985_s14 = inlined_call_operand.vmem [shape: f32[2,1,32], index: 14, kind: input, shape index: {}]   ;;  %s10986_s15 = inlined_call_operand.vmem [shape: f32[2,1,32], index: 15, kind: input, shape index: {}]   ;;  %s10987_s16 = inlined_call_operand.vmem [shape: f32[2,1,32], index: 16, kind: input, shape index: {}]   ;;  %s10988_s19 = inlined_call_operand.vmem [shape: f32[32,32], index: 19, kind: input, shape index: {}]   ;;  %s10989_s17 = inlined_call_operand.vmem [shape: f32[1,32], index: 17, kind: input, shape index: {}]   ;;  %s10990_s18 = inlined_call_operand.vmem [shape: f32[1,32], index: 18, kind: input, shape index: {}]   ;;  %s10991_s20 = inlined_call_operand.vmem [shape: f32[1,32], index: 20, kind: input, shape index: {}]   ;;  %s10992_s21 = inlined_call_operand.vmem [shape: f32[2,16,32], index: 21, kind: output, shape index: {}]  }
   0x1   :  { %11036 = sst [smem:[#allocation5_spill]] %s10971_s2  ;;  %vm8929_vm2 = vmpackc.low %vm367_vm1, %vm367_vm1  ;;  %s11007_s29 = smov 12   ;;  %vm2582_vm5 = vcmask 130048   ;;  %vm2587_vm6 = vcmask 162816   ;;  %vm2592_vm7 = vcmask 195584   ;;  %vm2597_vm8 = vcmask 228352  }
   0x2   :  { %11037 = sst [smem:[#allocation6_spill]] %s10972_s0  ;;  %s11042_s26 = sld [smem:[#allocation5_spill]] }
   0x3   :  { %11038 = sst [smem:[#allocation7_spill]] %s10973_s5  ;;  %s11043_s22 = sld [smem:[#allocation6_spill]] }
   0x4   :  { %11039 = sst [smem:[#allocation8_spill]] %s10974_s3  ;;  %s11044_s24 = sld [smem:[#allocation7_spill]] }
   0x5   :  { %11040 = sst [smem:[#allocation9_spill]] %s10975_s4  ;;  %s11045_s25 = sld [smem:[#allocation8_spill]] }
   0x6   :  { %11041 = sst [smem:[#allocation10_spill]] %s10976_s6  ;;  %s11046_s27 = sld [smem:[#allocation9_spill]] }
   0x7   :  { %s11048_s4 = sld [smem:[#allocation10_spill]]  ;;  %s8551_s6 = smov 120  }
   0x8   :  { %v72_v0 = vld [vmem:[%s11042_s26] sm:$0xff]  ;;  %v73_v1 = vld [vmem:[%s11042_s26 + $0x8] sm:$0xff]  ;;  %v74_v2 = vld [vmem:[%s11042_s26 + $0x10] sm:$0xff]  ;;  %s11025_s0 = smov 112   ;;  %s11017_s5 = smov 108  }
   0x9   :  { %v7465_v3 = vpack.c.bf16 %v73_v1, %v72_v0  ;;  %v75_v4 = vld [vmem:[%s11042_s26 + $0x18] sm:$0xff]  ;;  %v68_v5 = vld [vmem:[%s11043_s22] sm:$0xff]  ;;  %v69_v10 = vld [vmem:[%s11043_s22 + $0x8] sm:$0xff]  ;;  %s10998_s26 = smov 96   ;;  %s11011_s2 = smov 16  }
   0xa   :  { %v7469_v6 = vpack.c.bf16 %v75_v4, %v74_v2  ;;  %6941 = vmatprep.mubr.msk.f32.mxu1 %vm83_vm0, %v68_v5  ;;  %v191_v7 = vld [vmem:[%s11044_s24] sm:$0xff]  ;;  %v192_v8 = vld [vmem:[%s11044_s24 + $0x8] sm:$0xff]  ;;  %v70_v11 = vld [vmem:[%s11043_s22 + $0x10] sm:$0xff]  ;;  %s11023_s3 = smov 20  }
   0xb   :  { %7466 = vmatprep.subr.bf16.mxu1 %v7465_v3  ;;  %v7473_v9 = vpack.c.bf16 %v192_v8, %v191_v7  ;;  %v71_v12 = vld [vmem:[%s11043_s22 + $0x18] sm:$0xff]  ;;  %v193_v13 = vld [vmem:[%s11044_s24 + $0x10] sm:$0xff]  ;;  %v6243_v16 = vld [vmem:[%s11045_s25] ss:$0 sm:$0xff]  ;;  %s11015_s25 = smov 104   ;;  %s11000_s22 = smov 100  }
   0xc   :  { %7468 = vmatpush3.bf16.msra.mxu1 %v7465_v3  ;;  %v194_v14 = vld [vmem:[%s11044_s24 + $0x18] sm:$0xff]  ;;  %v181_v20 = vld [vmem:[%s11046_s27] sm:$0xff]  ;;  %v182_v21 = vld [vmem:[%s11046_s27 + $0x8] sm:$0xff]  ;;  %s11013_s27 = smov 64  }
   0xd   :  { %7470 = vmatprep.subr.bf16.mxu1 %v7469_v6  ;;  %v7477_v15 = vpack.c.bf16 %v194_v14, %v193_v13  ;;  %v6248_v31 = vld [vmem:[%s11048_s4] ss:$0 sm:$0xff] }
  0x10   :  { %7472 = vmatpush3.bf16.msra.mxu1 %v7469_v6 }
  0x11   :  { %7474 = vmatprep.subr.bf16.mxu1 %v7473_v9 }
  0x13   :  { %6942 = vmatmul.mubr.msk.f32.vlgmr.msra.gmra.mrb[0].mxu1 %vm83_vm0, %v69_v10 }
  0x14   :  { %6944 = vmatprep.mubr.msk.f32.mxu1 %vm83_vm0, %v70_v11  ;;  %7476 = vmatpush3.bf16.msra.mxu1 %v7473_v9 }
  0x15   :  { %7478 = vmatprep.subr.bf16.mxu1 %v7477_v15 }
  0x17   :  { %6945 = vmatmul.mubr.msk.f32.gmra.mrb[2].mxu1 %vm83_vm0, %v71_v12 }
  0x18   :  { %7480 = vmatpush3.bf16.msra.mxu1 %v7477_v15 }
  0xe6   :  { %v6943_v17 = vpop.f32.mrb[0].mxu1 }
  0xe7   :  { %v168_v18 = vadd.f32 %v6943_v17, %v6243_v16  ;;  %v162_v19 = vpop.f32.mrb[1].mxu1 }
  0xe8   :  { %v163_v22 = vadd.f32 %v6243_v16, %v162_v19 }
  0xe9   :  { %v8728_v25 = vadd.f32 %v182_v21, %v168_v18 }
  0xea   :  { %v8726_v23 = vadd.f32 %v181_v20, %v163_v22  ;;  %v6946_v24 = vpop.f32.mrb[2].mxu1 }
  0xeb   :  { %v178_v26 = vadd.f32 %v6946_v24, %v6243_v16  ;;  %v172_v27 = vpop.f32.mrb[3].mxu1  ;;  %v11049_v24 = vmov 0 }
  0xec   :  { %v173_v28 = vadd.f32 %v6243_v16, %v172_v27  ;;  %6955 = vmatprep.mubr.msk.f32.mxu1 %vm83_vm0, %v8726_v23  ;;  %v11050_v24 = vsel %vm8929_vm2, 4294967295, %v11049_v24 }
  0xed   :  { %v8732_v29 = vadd.f32 %v182_v21, %v178_v26  ;;  %6956 = vmatmul.mubr.msk.f32.vlgmr.msra.gmra.mrb[4].mxu1 %vm83_vm0, %v8728_v25  ;;  %11051 = vst [vmem:[#allocation3_spill] sm:$0xff] %v11050_v24 }
  0xee   :  { %v8736_v30 = vadd.f32 %v181_v20, %v173_v28 }
  0xef   :  { %11047 = vst [vmem:[#allocation2_spill] sm:$0xff] %v8732_v29 }
  0xf0   :  { %6958 = vmatprep.mubr.msk.f32.mxu1 %vm83_vm0, %v8736_v30 }
  0xf1   :  { %6959 = vmatmul.mubr.msk.f32.gmra.mrb[6].mxu1 %vm83_vm0, %v8732_v29 }
 0x1c0   :  { %v6957_v32 = vpop.f32.mrb[4].mxu1 }
 0x1c1   :  { %v280_v33 = vpop.f32.mrb[5].mxu1  ;;  %v8749_v38 = vadd.f32 %v6957_v32, %v6248_v31 }
 0x1c2   :  { %v281_v34 = vadd.f32 %v6248_v31, %v280_v33 }
 0x1c4   :  { %v6960_v35 = vpop.f32.mrb[6].mxu1  ;;  %303 = vrot.lane.b32.xlu0 %v281_v34, %s8550_s30  ;;  %6969 = vmatprep.mubr.msk.f32.mxu0 %vm367_vm1, %v281_v34  ;;  %v8800_v40 = vpack.i.bf16 %v8749_v38, %v281_v34 }
 0x1c5   :  { %v8747_v36 = vadd.f32 %v6960_v35, %v6248_v31  ;;  %v290_v37 = vpop.f32.mrb[7].mxu1 }
 0x1c6   :  { %v8753_v39 = vadd.f32 %v6248_v31, %v290_v37 }
 0x1c7   :  { %309 = vrot.lane.b32.xlu1 %v8747_v36, %s8550_s30 }
 0x1c8   :  { %305 = vrot.lane.b32.xlu0 %v8749_v38, %s8550_s30  ;;  %v8808_v41 = vpack.i.bf16 %v8747_v36, %v8753_v39 }
 0x1cb   :  { %307 = vrot.lane.b32.xlu1 %v8753_v39, %s8550_s30 }
 0x1cc   :  { %311 = vrot.lane.b32.xlu0 %v281_v34, %s8551_s6 }
 0x1cf   :  { %313 = vrot.lane.b32.xlu1 %v8749_v38, %s8551_s6 }
 0x1d0   :  { %319 = vrot.lane.b32.xlu0 %v281_v34, %s11027_s23 }
 0x1d3   :  { %321 = vrot.lane.b32.xlu1 %v8749_v38, %s11027_s23 }
 0x1d4   :  { %315 = vrot.lane.b32.xlu0 %v8753_v39, %s8551_s6 }
 0x1d7   :  { %317 = vrot.lane.b32.xlu1 %v8747_v36, %s8551_s6 }
 0x1d8   :  { %323 = vrot.lane.b32.xlu0 %v8753_v39, %s11027_s23 }
 0x1db   :  { %325 = vrot.lane.b32.xlu1 %v8747_v36, %s11027_s23  ;;  %s11057_s23 = smov 108  }
 0x1dc   :  { %327 = vrot.lane.b32.xlu0 %v281_v34, %s11025_s0 }
 0x1df   :  { %329 = vrot.lane.b32.xlu1 %v8749_v38, %s11025_s0 }
 0x1e0   :  { %335 = vrot.lane.b32.xlu0 %v281_v34, %s11017_s5 }
 0x1e3   :  { %337 = vrot.lane.b32.xlu1 %v8749_v38, %s11017_s5 }
 0x1e4   :  { %331 = vrot.lane.b32.xlu0 %v8753_v39, %s11025_s0 }
 0x1e7   :  { %333 = vrot.lane.b32.xlu1 %v8747_v36, %s11025_s0  ;;  %s11062_s0 = smov 64  }
 0x1e8   :  { %339 = vrot.lane.b32.xlu0 %v8753_v39, %s11017_s5 }
 0x1eb   :  { %341 = vrot.lane.b32.xlu1 %v8747_v36, %s11017_s5  ;;  %s11019_s5 = smov 28  }
 0x1ec   :  { %343 = vrot.lane.b32.xlu0 %v281_v34, %s11015_s25 }
 0x1ef   :  { %345 = vrot.lane.b32.xlu1 %v8749_v38, %s11015_s25 }
 0x1f0   :  { %351 = vrot.lane.b32.xlu0 %v281_v34, %s11000_s22 }
 0x1f3   :  { %353 = vrot.lane.b32.xlu1 %v8749_v38, %s11000_s22 }
 0x1f4   :  { %347 = vrot.lane.b32.xlu0 %v8753_v39, %s11015_s25 }
 0x1f7   :  { %349 = vrot.lane.b32.xlu1 %v8747_v36, %s11015_s25  ;;  %s11055_s25 = smov 116  }
 0x1f8   :  { %355 = vrot.lane.b32.xlu0 %v8753_v39, %s11000_s22 }
 0x1fb   :  { %357 = vrot.lane.b32.xlu1 %v8747_v36, %s11000_s22  ;;  %s11009_s22 = smov 4  }
 0x1fc   :  { %7931 = vrot.lane.b32.xlu0 %v8800_v40, %s10998_s26 }
 0x200   :  { %7941 = vrot.lane.b32.xlu0 %v8808_v41, %s10998_s26 }
 0x236   :  { %v304_v42 = vpop.permute.xlu0 %303 }
 0x237   :  { %6983 = vmatprep.mubr.msk.f32.mxu1 %vm367_vm1, %v304_v42 }
 0x239   :  { %v8813_v43 = vpop.permute.xlu1 %309 }
 0x23a   :  { %v8815_v44 = vpop.permute.xlu0 %305 }
 0x23b   :  { %v7935_v45 = vpack.i.bf16 %v8815_v44, %v304_v42 }
 0x23d   :  { %v8818_v46 = vpop.permute.xlu1 %307  ;;  %7936 = vrot.lane.b32.xlu1 %v7935_v45, %s10998_s26 }
 0x23e   :  { %v8821_v47 = vpop.permute.xlu0 %311  ;;  %v8825_v48 = vpack.i.bf16 %v8813_v43, %v8818_v46 }
 0x241   :  { %v8827_v49 = vpop.permute.xlu1 %313  ;;  %7946 = vrot.lane.b32.xlu1 %v8825_v48, %s10998_s26 }
 0x242   :  { %v8831_v50 = vpop.permute.xlu0 %319  ;;  %v8835_v51 = vpack.i.bf16 %v8827_v49, %v8821_v47 }
 0x244   :  { %7951 = vrot.lane.b32.xlu0 %v8835_v51, %s10998_s26 }
 0x245   :  { %v8839_v52 = vpop.permute.xlu1 %321 }
 0x246   :  { %v8841_v53 = vpop.permute.xlu0 %315  ;;  %v7955_v54 = vpack.i.bf16 %v8839_v52, %v8831_v50 }
 0x248   :  { %7956 = vrot.lane.b32.xlu1 %v7955_v54, %s10998_s26 }
 0x249   :  { %v8846_v55 = vpop.permute.xlu1 %317 }
 0x24a   :  { %v8848_v56 = vpop.permute.xlu0 %323  ;;  %v7960_v57 = vpack.i.bf16 %v8846_v55, %v8841_v53 }
 0x24c   :  { %7961 = vrot.lane.b32.xlu0 %v7960_v57, %s10998_s26 }
 0x24d   :  { %v8853_v58 = vpop.permute.xlu1 %325 }
 0x24e   :  { %v8855_v59 = vpop.permute.xlu0 %327  ;;  %v7965_v60 = vpack.i.bf16 %v8853_v58, %v8848_v56 }
 0x250   :  { %7966 = vrot.lane.b32.xlu1 %v7965_v60, %s10998_s26 }
 0x251   :  { %v8860_v61 = vpop.permute.xlu1 %329 }
 0x252   :  { %v8862_v62 = vpop.permute.xlu0 %335  ;;  %v7970_v63 = vpack.i.bf16 %v8860_v61, %v8855_v59 }
 0x254   :  { %7971 = vrot.lane.b32.xlu0 %v7970_v63, %s10998_s26 }
 0x255   :  { %v8867_v0 = vpop.permute.xlu1 %337 }
 0x256   :  { %v8869_v1 = vpop.permute.xlu0 %331  ;;  %v7975_v2 = vpack.i.bf16 %v8867_v0, %v8862_v62 }
 0x258   :  { %7976 = vrot.lane.b32.xlu1 %v7975_v2, %s10998_s26 }
 0x259   :  { %v8874_v3 = vpop.permute.xlu1 %333 }
 0x25a   :  { %v8876_v4 = vpop.permute.xlu0 %339  ;;  %v7980_v5 = vpack.i.bf16 %v8874_v3, %v8869_v1 }
 0x25c   :  { %7981 = vrot.lane.b32.xlu0 %v7980_v5, %s10998_s26 }
 0x25d   :  { %v8881_v6 = vpop.permute.xlu1 %341 }
 0x25e   :  { %v8883_v7 = vpop.permute.xlu0 %343  ;;  %v7985_v8 = vpack.i.bf16 %v8881_v6, %v8876_v4 }
 0x260   :  { %7986 = vrot.lane.b32.xlu1 %v7985_v8, %s10998_s26 }
 0x261   :  { %v8888_v9 = vpop.permute.xlu1 %345 }
 0x262   :  { %v8890_v10 = vpop.permute.xlu0 %351  ;;  %v8894_v11 = vpack.i.bf16 %v8888_v9, %v8883_v7 }
 0x264   :  { %7991 = vrot.lane.b32.xlu0 %v8894_v11, %s10998_s26 }
 0x265   :  { %v8898_v12 = vpop.permute.xlu1 %353 }
 0x266   :  { %v8900_v13 = vpop.permute.xlu0 %347  ;;  %v8904_v14 = vpack.i.bf16 %v8898_v12, %v8890_v10 }
 0x268   :  { %7996 = vrot.lane.b32.xlu1 %v8904_v14, %s10998_s26 }
 0x269   :  { %v8908_v15 = vpop.permute.xlu1 %349 }
 0x26a   :  { %v8910_v16 = vpop.permute.xlu0 %355  ;;  %v8914_v17 = vpack.i.bf16 %v8908_v15, %v8900_v13 }
 0x26c   :  { %8001 = vrot.lane.b32.xlu0 %v8914_v17, %s10998_s26 }
 0x26d   :  { %v8918_v18 = vpop.permute.xlu1 %357 }
 0x26e   :  { %v7932_v19 = vpop.permute.xlu0 %7931  ;;  %v8922_v20 = vpack.i.bf16 %v8918_v18, %v8910_v16 }
 0x26f   :  { %v7934_v21 = vunpack.i.h.bf16 %v7932_v19  ;;  %v7933_v22 = vunpack.i.l.bf16 %v7932_v19 }
 0x270   :  { %8016 = vrot.lane.b32.xlu0 %v7935_v45, %s11013_s27  ;;  %8006 = vrot.lane.b32.xlu1 %v8922_v20, %s10998_s26  ;;  %s11005_s26 = smov 8  }
 0x271   :  { %v7481_v26 = vpack.c.bf16 %v7934_v21, %v7933_v22 }
 0x272   :  { %v7942_v27 = vpop.permute.xlu0 %7941 }
 0x273   :  { %v7944_v28 = vunpack.i.h.bf16 %v7942_v27  ;;  %v7943_v31 = vunpack.i.l.bf16 %v7942_v27  ;;  %7483 = vmatprep.subr.msk.bf16.mxu0 %vm8929_vm2, %v7481_v26 }
 0x274   :  { %8031 = vrot.lane.b32.xlu0 %v7955_v54, %s11013_s27  ;;  %8011 = vrot.lane.b32.xlu1 %v8800_v40, %s11013_s27 }
 0x275   :  { %v7487_v32 = vpack.c.bf16 %v7944_v28, %v7943_v31  ;;  %7486 = vmatpush3.bf16.xpose.msk.msra.mxu0 %vm8929_vm2, %v7481_v26 }
 0x277   :  { %7489 = vmatprep.subr.msk.bf16.mxu0 %vm8929_vm2, %v7487_v32 }
 0x278   :  { %8041 = vrot.lane.b32.xlu0 %v7975_v2, %s11013_s27  ;;  %8021 = vrot.lane.b32.xlu1 %v8808_v41, %s11013_s27 }
 0x27c   :  { %8046 = vrot.lane.b32.xlu0 %v8825_v48, %s11013_s27  ;;  %8026 = vrot.lane.b32.xlu1 %v8835_v51, %s11013_s27 }
 0x27d   :  { %7492 = vmatpush3.bf16.xpose.msk.msra.mxu0 %vm8929_vm2, %v7487_v32 }
 0x280   :  { %8036 = vrot.lane.b32.xlu1 %v7970_v63, %s11013_s27 }
 0x284   :  { %6970 = vmatmul.mubr.msk.f32.vlgmr.msra.gmra.mrb[0].mxu0 %vm367_vm1, %v8749_v38  ;;  %8051 = vrot.lane.b32.xlu1 %v7960_v57, %s11013_s27 }
 0x285   :  { %6972 = vmatprep.mubr.msk.f32.mxu0 %vm367_vm1, %v8753_v39 }
 0x288   :  { %6973 = vmatmul.mubr.msk.f32.gmra.mrb[2].mxu0 %vm367_vm1, %v8747_v36  ;;  %8056 = vrot.lane.b32.xlu1 %v7965_v60, %s11013_s27 }
 0x289   :  { %6997 = vmatprep.mubr.msk.f32.mxu0 %vm367_vm1, %v8821_v47 }
 0x28c   :  { %8061 = vrot.lane.b32.xlu1 %v7980_v5, %s11013_s27 }
 0x290   :  { %8066 = vrot.lane.b32.xlu1 %v7985_v8, %s11013_s27 }
 0x2af   :  { %v7937_v33 = vpop.permute.xlu1 %7936 }
 0x2b0   :  { %v7939_v34 = vunpack.i.h.bf16 %v7937_v33  ;;  %v7938_v35 = vunpack.i.l.bf16 %v7937_v33 }
 0x2b2   :  { %v7493_v37 = vpack.c.bf16 %v7939_v34, %v7938_v35 }
 0x2b3   :  { %v7947_v38 = vpop.permute.xlu1 %7946 }
 0x2b4   :  { %7495 = vmatprep.subr.msk.bf16.mxu1 %vm8929_vm2, %v7493_v37  ;;  %v7949_v39 = vunpack.i.h.bf16 %v7947_v38  ;;  %v7948_v40 = vunpack.i.l.bf16 %v7947_v38 }
 0x2b5   :  { %7498 = vmatpush3.bf16.xpose.msk.msra.mxu1 %vm8929_vm2, %v7493_v37 }
 0x2b6   :  { %v7499_v36 = vpack.c.bf16 %v7949_v39, %v7948_v40  ;;  %v7952_v41 = vpop.permute.xlu0 %7951 }
 0x2b7   :  { %v7954_v42 = vunpack.i.h.bf16 %v7952_v41  ;;  %v7953_v45 = vunpack.i.l.bf16 %v7952_v41 }
 0x2b8   :  { %7501 = vmatprep.subr.msk.bf16.mxu1 %vm8929_vm2, %v7499_v36 }
 0x2b9   :  { %v7505_v47 = vpack.c.bf16 %v7954_v42, %v7953_v45 }
 0x2ba   :  { %v7957_v48 = vpop.permute.xlu1 %7956 }
 0x2bb   :  { %v7959_v51 = vunpack.i.h.bf16 %v7957_v48  ;;  %v7958_v54 = vunpack.i.l.bf16 %v7957_v48  ;;  %7507 = vmatprep.subr.msk.bf16.mxu0 %vm8929_vm2, %v7505_v47 }
 0x2bc   :  { %7510 = vmatpush3.bf16.xpose.msk.msra.mxu0 %vm8929_vm2, %v7505_v47 }
 0x2bd   :  { %v7517_v57 = vpack.c.bf16 %v7959_v51, %v7958_v54  ;;  %7504 = vmatpush3.bf16.xpose.msk.msra.mxu1 %vm8929_vm2, %v7499_v36 }
 0x2be   :  { %v7962_v60 = vpop.permute.xlu0 %7961 }
 0x2bf   :  { %v7964_v63 = vunpack.i.h.bf16 %v7962_v60  ;;  %v7963_v2 = vunpack.i.l.bf16 %v7962_v60  ;;  %7519 = vmatprep.subr.msk.bf16.mxu1 %vm8929_vm2, %v7517_v57 }
 0x2c1   :  { %v7511_v5 = vpack.c.bf16 %v7964_v63, %v7963_v2 }
 0x2c2   :  { %v7967_v8 = vpop.permute.xlu1 %7966 }
 0x2c3   :  { %v7969_v19 = vunpack.i.h.bf16 %v7967_v8  ;;  %v7968_v21 = vunpack.i.l.bf16 %v7967_v8  ;;  %7513 = vmatprep.subr.msk.bf16.mxu0 %vm8929_vm2, %v7511_v5 }
 0x2c4   :  { %6984 = vmatmul.mubr.msk.f32.vlgmr.msra.gmra.mrb[8].mxu1 %vm367_vm1, %v8815_v44  ;;  %7516 = vmatpush3.bf16.xpose.msk.msra.mxu0 %vm8929_vm2, %v7511_v5 }
 0x2c5   :  { %v7523_v22 = vpack.c.bf16 %v7969_v19, %v7968_v21  ;;  %6986 = vmatprep.mubr.msk.f32.mxu1 %vm367_vm1, %v8818_v46  ;;  %7522 = vmatpush3.bf16.xpose.msk.msra.mxu1 %vm8929_vm2, %v7517_v57 }
 0x2c6   :  { %v7972_v26 = vpop.permute.xlu0 %7971 }
 0x2c7   :  { %v7974_v27 = vunpack.i.h.bf16 %v7972_v26  ;;  %v7973_v28 = vunpack.i.l.bf16 %v7972_v26  ;;  %7525 = vmatprep.subr.msk.bf16.mxu1 %vm8929_vm2, %v7523_v22 }
 0x2c8   :  { %6987 = vmatmul.mubr.msk.f32.gmra.mrb[10].mxu1 %vm367_vm1, %v8813_v43 }
 0x2c9   :  { %v7529_v44 = vpack.c.bf16 %v7974_v27, %v7973_v28  ;;  %7011 = vmatprep.mubr.msk.f32.mxu1 %vm367_vm1, %v8831_v50 }
 0x2ca   :  { %v7977_v31 = vpop.permute.xlu1 %7976 }
 0x2cb   :  { %v7979_v32 = vunpack.i.h.bf16 %v7977_v31  ;;  %v7978_v33 = vunpack.i.l.bf16 %v7977_v31  ;;  %6998 = vmatmul.mubr.msk.f32.vlgmr.msra.gmra.mrb[4].mxu0 %vm367_vm1, %v8827_v49  ;;  %7531 = vmatprep.subr.msk.bf16.mxu0 %vm8929_vm2, %v7529_v44 }
 0x2cc   :  { %7000 = vmatprep.mubr.msk.f32.mxu0 %vm367_vm1, %v8841_v53  ;;  %7534 = vmatpush3.bf16.xpose.msk.msra.mxu0 %vm8929_vm2, %v7529_v44 }
 0x2cd   :  { %v7541_v43 = vpack.c.bf16 %v7979_v32, %v7978_v33  ;;  %7528 = vmatpush3.bf16.xpose.msk.msra.mxu1 %vm8929_vm2, %v7523_v22  ;;  %v9083_v32 = vld [vmem:[%s10977_s1 + $0x8] sm:$0xff] }
 0x2ce   :  { %v7982_v46 = vpop.permute.xlu0 %7981 }
 0x2cf   :  { %v7984_v50 = vunpack.i.h.bf16 %v7982_v46  ;;  %v7983_v34 = vunpack.i.l.bf16 %v7982_v46  ;;  %7001 = vmatmul.mubr.msk.f32.gmra.mrb[6].mxu0 %vm367_vm1, %v8846_v55  ;;  %7543 = vmatprep.subr.msk.bf16.mxu1 %vm8929_vm2, %v7541_v43  ;;  %v9099_v46 = vld [vmem:[%s10977_s1 + $0x18] sm:$0xff] }
 0x2d0   :  { %7025 = vmatprep.mubr.msk.f32.mxu0 %vm367_vm1, %v8855_v59 }
 0x2d1   :  { %v7535_v49 = vpack.c.bf16 %v7984_v50, %v7983_v34  ;;  %v9106_v34 = vld [vmem:[%s10977_s1 + $0x10] sm:$0xff] }
 0x2d2   :  { %v7987_v53 = vpop.permute.xlu1 %7986 }
 0x2d3   :  { %v7989_v35 = vunpack.i.h.bf16 %v7987_v53  ;;  %v7988_v37 = vunpack.i.l.bf16 %v7987_v53  ;;  %7537 = vmatprep.subr.msk.bf16.mxu0 %vm8929_vm2, %v7535_v49 }
 0x2d4   :  { %7012 = vmatmul.mubr.msk.f32.vlgmr.msra.gmra.mrb[12].mxu1 %vm367_vm1, %v8839_v52  ;;  %7540 = vmatpush3.bf16.xpose.msk.msra.mxu0 %vm8929_vm2, %v7535_v49 }
 0x2d5   :  { %v7547_v55 = vpack.c.bf16 %v7989_v35, %v7988_v37  ;;  %7014 = vmatprep.mubr.msk.f32.mxu1 %vm367_vm1, %v8848_v56  ;;  %7546 = vmatpush3.bf16.xpose.msk.msra.mxu1 %vm8929_vm2, %v7541_v43 }
 0x2d6   :  { %v7992_v59 = vpop.permute.xlu0 %7991 }
 0x2d7   :  { %v7994_v38 = vunpack.i.h.bf16 %v7992_v59  ;;  %v7993_v39 = vunpack.i.l.bf16 %v7992_v59  ;;  %7549 = vmatprep.subr.msk.bf16.mxu1 %vm8929_vm2, %v7547_v55 }
 0x2d8   :  { %7015 = vmatmul.mubr.msk.f32.gmra.mrb[14].mxu1 %vm367_vm1, %v8853_v58 }
 0x2d9   :  { %v7553_v52 = vpack.c.bf16 %v7994_v38, %v7993_v39  ;;  %7039 = vmatprep.mubr.msk.f32.mxu1 %vm367_vm1, %v8862_v62 }
 0x2da   :  { %v7997_v40 = vpop.permute.xlu1 %7996 }
 0x2db   :  { %v7999_v36 = vunpack.i.h.bf16 %v7997_v40  ;;  %v7998_v41 = vunpack.i.l.bf16 %v7997_v40  ;;  %7026 = vmatmul.mubr.msk.f32.vlgmr.msra.gmra.mrb[8].mxu0 %vm367_vm1, %v8860_v61  ;;  %7555 = vmatprep.subr.msk.bf16.mxu0 %vm8929_vm2, %v7553_v52 }
 0x2dc   :  { %7028 = vmatprep.mubr.msk.f32.mxu0 %vm367_vm1, %v8869_v1  ;;  %7558 = vmatpush3.bf16.xpose.msk.msra.mxu0 %vm8929_vm2, %v7553_v52 }
 0x2dd   :  { %v7565_v56 = vpack.c.bf16 %v7999_v36, %v7998_v41  ;;  %7552 = vmatpush3.bf16.xpose.msk.msra.mxu1 %vm8929_vm2, %v7547_v55 }
 0x2de   :  { %v8002_v58 = vpop.permute.xlu0 %8001 }
 0x2df   :  { %v8004_v62 = vunpack.i.h.bf16 %v8002_v58  ;;  %v8003_v42 = vunpack.i.l.bf16 %v8002_v58  ;;  %7029 = vmatmul.mubr.msk.f32.gmra.mrb[10].mxu0 %vm367_vm1, %v8874_v3  ;;  %7567 = vmatprep.subr.msk.bf16.mxu1 %vm8929_vm2, %v7565_v56 }
 0x2e0   :  { %7053 = vmatprep.mubr.msk.f32.mxu0 %vm367_vm1, %v8883_v7 }
 0x2e1   :  { %v7559_v61 = vpack.c.bf16 %v8004_v62, %v8003_v42 }
 0x2e2   :  { %v8007_v1 = vpop.permute.xlu1 %8006  ;;  %v8017_v45 = vpop.permute.xlu0 %8016 }
 0x2e3   :  { %v8009_v47 = vunpack.i.h.bf16 %v8007_v1  ;;  %v8008_v48 = vunpack.i.l.bf16 %v8007_v1  ;;  %7561 = vmatprep.subr.msk.bf16.mxu0 %vm8929_vm2, %v7559_v61  ;;  %v8019_v60 = vunpack.i.h.bf16 %v8017_v45  ;;  %v8018_v63 = vunpack.i.l.bf16 %v8017_v45 }
 0x2e4   :  { %7040 = vmatmul.mubr.msk.f32.vlgmr.msra.gmra.mrb[16].mxu1 %vm367_vm1, %v8867_v0  ;;  %7564 = vmatpush3.bf16.xpose.msk.msra.mxu0 %vm8929_vm2, %v7559_v61 }
 0x2e5   :  { %v7571_v3 = vpack.c.bf16 %v8009_v47, %v8008_v48  ;;  %7042 = vmatprep.mubr.msk.f32.mxu1 %vm367_vm1, %v8876_v4  ;;  %7570 = vmatpush3.bf16.xpose.msk.msra.mxu1 %vm8929_vm2, %v7565_v56  ;;  %v7585_v19 = vpack.c.bf16 %v8019_v60, %v8018_v63 }
 0x2e6   :  { %v8012_v7 = vpop.permute.xlu1 %8011  ;;  %v8032_v51 = vpop.permute.xlu0 %8031 }
 0x2e7   :  { %v8014_v54 = vunpack.i.h.bf16 %v8012_v7  ;;  %v8013_v57 = vunpack.i.l.bf16 %v8012_v7  ;;  %7573 = vmatprep.subr.msk.bf16.mxu1 %vm8929_vm2, %v7571_v3  ;;  %v8033_v44 = vunpack.i.l.bf16 %v8032_v51 }
 0x2e8   :  { %7043 = vmatmul.mubr.msk.f32.gmra.mrb[18].mxu1 %vm367_vm1, %v8881_v6 }
 0x2e9   :  { %7067 = vmatprep.mubr.msk.f32.mxu1 %vm367_vm1, %v8890_v10  ;;  %v7577_v0 = vpack.c.bf16 %v8014_v54, %v8013_v57 }
 0x2ea   :  { %v8022_v4 = vpop.permute.xlu1 %8021  ;;  %v9058_v2 = vpop.permute.xlu0 %8041 }
 0x2eb   :  { %v8024_v5 = vunpack.i.h.bf16 %v8022_v4  ;;  %v8023_v8 = vunpack.i.l.bf16 %v8022_v4  ;;  %7054 = vmatmul.mubr.msk.f32.vlgmr.msra.gmra.mrb[12].mxu0 %vm367_vm1, %v8888_v9  ;;  %7578 = vmatprep.subr.bf16.mxu0 %v7577_v0 }
 0x2ec   :  { %7056 = vmatprep.mubr.msk.f32.mxu0 %vm367_vm1, %v8900_v13  ;;  %7580 = vmatpush3.bf16.msra.mxu0 %v7577_v0  ;;  %v8034_v13 = vunpack.i.h.bf16 %v8032_v51 }
 0x2ed   :  { %7576 = vmatpush3.bf16.xpose.msk.msra.mxu1 %vm8929_vm2, %v7571_v3  ;;  %v7581_v6 = vpack.c.bf16 %v8024_v5, %v8023_v8 }
 0x2ee   :  { %v8027_v10 = vpop.permute.xlu1 %8026  ;;  %v8047_v21 = vpop.permute.xlu0 %8046  ;;  %7586 = vmatprep.subr.bf16.mxu1 %v7585_v19 }
 0x2ef   :  { %v8029_v22 = vunpack.i.h.bf16 %v8027_v10  ;;  %v8028_v26 = vunpack.i.l.bf16 %v8027_v10  ;;  %7057 = vmatmul.mubr.msk.f32.gmra.mrb[14].mxu0 %vm367_vm1, %v8908_v15  ;;  %7582 = vmatprep.subr.bf16.mxu0 %v7581_v6  ;;  %v8049_v9 = vunpack.i.h.bf16 %v8047_v21  ;;  %v8048_v27 = vunpack.i.l.bf16 %v8047_v21 }
 0x2f0   :  { %7584 = vmatpush3.bf16.msra.mxu0 %v7581_v6  ;;  %v9077_v15 = vpack.c.bf16 %v8034_v13, %v8033_v44 }
 0x2f1   :  { %v9068_v28 = vpack.c.bf16 %v8029_v22, %v8028_v26  ;;  %v7589_v31 = vpack.c.bf16 %v8049_v9, %v8048_v27 }
 0x2f3   :  { %7594 = vmatprep.subr.bf16.mxu0 %v9068_v28 }
 0x2f4   :  { %7068 = vmatmul.mubr.msk.f32.vlgmr.msra.gmra.mrb[20].mxu1 %vm367_vm1, %v8898_v12  ;;  %v9088_v12 = vld [vmem:[%s10977_s1] sm:$0xff] }
 0x2f5   :  { %7070 = vmatprep.mubr.msk.f32.mxu1 %vm367_vm1, %v8910_v16  ;;  %7588 = vmatpush3.bf16.msra.mxu1 %v7585_v19 }
 0x2f6   :  { %7590 = vmatprep.subr.bf16.mxu1 %v7589_v31 }
 0x2f8   :  { %7071 = vmatmul.mubr.msk.f32.gmra.mrb[22].mxu1 %vm367_vm1, %v8918_v18 }
 0x2f9   :  { %7592 = vmatpush3.bf16.msra.mxu1 %v7589_v31 }
 0x2fa   :  { %7602 = vmatprep.subr.bf16.mxu1 %v9077_v15 }
 0x357   :  { %v6971_v16 = vpop.f32.mrb[0].mxu0 }
 0x358   :  { %v9091_v33 = vadd.f32 %v6971_v16, %v9083_v32  ;;  %v450_v18 = vpop.f32.mrb[1].mxu0 }
 0x359   :  { %v9094_v43 = vadd.f32 %v450_v18, %v9088_v12 }
 0x35a   :  { %v1235_v50 = vsel %vm83_vm0, %v9091_v33, -inf }
 0x35b   :  { %1236 = vmax.xlane.f32.xlu1 %v1235_v50  ;;  %v6974_v49 = vpop.f32.mrb[2].mxu0  ;;  %v1232_v53 = vsel %vm83_vm0, %v9094_v43, -inf }
 0x35c   :  { %v9111_v35 = vadd.f32 %v6974_v49, %v9099_v46  ;;  %v460_v37 = vpop.f32.mrb[3].mxu0  ;;  %1233 = vmax.xlane.f32.xlu0 %v1232_v53 }
 0x35d   :  { %v9114_v55 = vadd.f32 %v460_v37, %v9106_v34 }
 0x35e   :  { %v1241_v59 = vsel %vm83_vm0, %v9111_v35, -inf }
 0x35f   :  { %v1238_v38 = vsel %vm83_vm0, %v9114_v55, -inf }
 0x360   :  { %1239 = vmax.xlane.f32.xlu1 %v1238_v38  ;;  %1242 = vmax.xlane.f32.xlu0 %v1241_v59 }
 0x397   :  { %v6985_v39 = vpop.f32.mrb[8].mxu1 }
 0x398   :  { %v9121_v52 = vadd.f32 %v6985_v39, %v9083_v32  ;;  %v559_v40 = vpop.f32.mrb[9].mxu1 }
 0x399   :  { %v9132_v1 = vadd.f32 %v559_v40, %v9088_v12 }
 0x39a   :  { %v1247_v36 = vsel %vm83_vm0, %v9121_v52, -inf }
 0x39b   :  { %v6988_v41 = vpop.f32.mrb[10].mxu1  ;;  %1248 = vmax.xlane.f32.xlu0 %v1247_v36  ;;  %v1244_v54 = vsel %vm83_vm0, %v9132_v1, -inf }
 0x39c   :  { %v569_v56 = vpop.f32.mrb[11].mxu1  ;;  %v9142_v51 = vadd.f32 %v6988_v41, %v9099_v46 }
 0x39d   :  { %v9137_v47 = vadd.f32 %v569_v56, %v9106_v34 }
 0x39e   :  { %v6999_v58 = vpop.f32.mrb[4].mxu0  ;;  %v1253_v5 = vsel %vm83_vm0, %v9142_v51, -inf }
 0x39f   :  { %v9126_v62 = vadd.f32 %v6999_v58, %v9083_v32  ;;  %v668_v42 = vpop.f32.mrb[5].mxu0  ;;  %v1250_v60 = vsel %vm83_vm0, %v9137_v47, -inf }
 0x3a0   :  { %v9129_v61 = vadd.f32 %v668_v42, %v9088_v12 }
 0x3a1   :  { %v1259_v45 = vsel %vm83_vm0, %v9126_v62, -inf }
 0x3a2   :  { %v7002_v48 = vpop.f32.mrb[6].mxu0  ;;  %1260 = vmax.xlane.f32.xlu0 %v1259_v45  ;;  %v1256_v3 = vsel %vm83_vm0, %v9129_v61, -inf }
 0x3a3   :  { %v678_v7 = vpop.f32.mrb[7].mxu0  ;;  %1257 = vmax.xlane.f32.xlu1 %v1256_v3  ;;  %v9152_v4 = vadd.f32 %v7002_v48, %v9099_v46 }
 0x3a4   :  { %v9147_v57 = vadd.f32 %v678_v7, %v9106_v34 }
 0x3a5   :  { %v1265_v22 = vsel %vm83_vm0, %v9152_v4, -inf }
 0x3a6   :  { %1245 = vmax.xlane.f32.xlu0 %v1244_v54  ;;  %v1262_v19 = vsel %vm83_vm0, %v9147_v57, -inf }
 0x3a7   :  { %v7013_v63 = vpop.f32.mrb[12].mxu1  ;;  %1251 = vmax.xlane.f32.xlu1 %v1250_v60 }
 0x3a8   :  { %v777_v0 = vpop.f32.mrb[13].mxu1  ;;  %v9162_v21 = vadd.f32 %v7013_v63, %v9083_v32 }
 0x3a9   :  { %v9157_v8 = vadd.f32 %v777_v0, %v9088_v12 }
 0x3aa   :  { %1254 = vmax.xlane.f32.xlu0 %v1253_v5  ;;  %v1271_v31 = vsel %vm83_vm0, %v9162_v21, -inf }
 0x3ab   :  { %v7016_v6 = vpop.f32.mrb[14].mxu1  ;;  %1263 = vmax.xlane.f32.xlu1 %v1262_v19  ;;  %v1268_v9 = vsel %vm83_vm0, %v9157_v8, -inf }
 0x3ac   :  { %v787_v10 = vpop.f32.mrb[15].mxu1  ;;  %v9182_v53 = vadd.f32 %v7016_v6, %v9099_v46 }
 0x3ad   :  { %v9177_v16 = vadd.f32 %v787_v10, %v9106_v34 }
 0x3ae   :  { %v7027_v26 = vpop.f32.mrb[8].mxu0  ;;  %1266 = vmax.xlane.f32.xlu0 %v1265_v22  ;;  %v1277_v41 = vsel %vm83_vm0, %v9182_v53, -inf }
 0x3af   :  { %v886_v27 = vpop.f32.mrb[9].mxu0  ;;  %1269 = vmax.xlane.f32.xlu1 %v1268_v9  ;;  %v9172_v44 = vadd.f32 %v7027_v26, %v9083_v32  ;;  %v1274_v38 = vsel %vm83_vm0, %v9177_v16, -inf }
 0x3b0   :  { %v9169_v13 = vadd.f32 %v886_v27, %v9088_v12 }
 0x3b1   :  { %v1283_v37 = vsel %vm83_vm0, %v9172_v44, -inf }
 0x3b2   :  { %v7030_v18 = vpop.f32.mrb[10].mxu0  ;;  %1272 = vmax.xlane.f32.xlu0 %v1271_v31  ;;  %v1280_v50 = vsel %vm83_vm0, %v9169_v13, -inf }
 0x3b3   :  { %v896_v49 = vpop.f32.mrb[11].mxu0  ;;  %1281 = vmax.xlane.f32.xlu1 %v1280_v50  ;;  %v9192_v36 = vadd.f32 %v7030_v18, %v9099_v46 }
 0x3b4   :  { %v9187_v59 = vadd.f32 %v896_v49, %v9106_v34 }
 0x3b5   :  { %v1289_v3 = vsel %vm83_vm0, %v9192_v36, -inf }
 0x3b6   :  { %1284 = vmax.xlane.f32.xlu0 %v1283_v37  ;;  %v1286_v58 = vsel %vm83_vm0, %v9187_v59, -inf }
 0x3b7   :  { %v7041_v39 = vpop.f32.mrb[16].mxu1  ;;  %1275 = vmax.xlane.f32.xlu1 %v1274_v38 }
 0x3b8   :  { %v995_v40 = vpop.f32.mrb[17].mxu1  ;;  %v9202_v48 = vadd.f32 %v7041_v39, %v9083_v32 }
 0x3b9   :  { %v9197_v56 = vadd.f32 %v995_v40, %v9088_v12  ;;  %v9238_v40 = vpop.permute.xlu1 %8036 }
 0x3ba   :  { %1278 = vmax.xlane.f32.xlu0 %v1277_v41  ;;  %v1295_v5 = vsel %vm83_vm0, %v9202_v48, -inf }
 0x3bb   :  { %v7044_v42 = vpop.f32.mrb[18].mxu1  ;;  %1287 = vmax.xlane.f32.xlu1 %v1286_v58  ;;  %v1292_v54 = vsel %vm83_vm0, %v9197_v56, -inf }
 0x3bc   :  { %v1005_v45 = vpop.f32.mrb[19].mxu1  ;;  %v9222_v26 = vadd.f32 %v7044_v42, %v9099_v46 }
 0x3bd   :  { %v9217_v19 = vadd.f32 %v1005_v45, %v9106_v34  ;;  %v9242_v42 = vpop.permute.xlu1 %8051 }
 0x3be   :  { %v7055_v7 = vpop.f32.mrb[12].mxu0  ;;  %1290 = vmax.xlane.f32.xlu0 %v1289_v3  ;;  %v1301_v37 = vsel %vm83_vm0, %v9222_v26, -inf }
 0x3bf   :  { %v1104_v60 = vpop.f32.mrb[13].mxu0  ;;  %1293 = vmax.xlane.f32.xlu1 %v1292_v54  ;;  %v9212_v0 = vadd.f32 %v7055_v7, %v9083_v32  ;;  %v1298_v31 = vsel %vm83_vm0, %v9217_v19, -inf }
 0x3c0   :  { %v9209_v63 = vadd.f32 %v1104_v60, %v9088_v12 }
 0x3c1   :  { %v1307_v9 = vsel %vm83_vm0, %v9212_v0, -inf  ;;  %v9244_v45 = vpop.permute.xlu1 %8056 }
 0x3c2   :  { %v7058_v6 = vpop.f32.mrb[14].mxu0  ;;  %1296 = vmax.xlane.f32.xlu0 %v1295_v5  ;;  %v1304_v10 = vsel %vm83_vm0, %v9209_v63, -inf }
 0x3c3   :  { %v1114_v22 = vpop.f32.mrb[15].mxu0  ;;  %1305 = vmax.xlane.f32.xlu1 %v1304_v10  ;;  %v9232_v49 = vadd.f32 %v7058_v6, %v9099_v46 }
 0x3c4   :  { %v9227_v27 = vadd.f32 %v1114_v22, %v9106_v34 }
 0x3c5   :  { %v1313_v58 = vsel %vm83_vm0, %v9232_v49, -inf  ;;  %v9246_v3 = vpop.permute.xlu1 %8061 }
 0x3c6   :  { %1308 = vmax.xlane.f32.xlu0 %v1307_v9  ;;  %v1310_v38 = vsel %vm83_vm0, %v9227_v27, -inf }
 0x3c7   :  { %v7069_v18 = vpop.f32.mrb[20].mxu1  ;;  %1299 = vmax.xlane.f32.xlu1 %v1298_v31 }
 0x3c8   :  { %v1213_v50 = vpop.f32.mrb[21].mxu1 }
 0x3c9   :  { %v9248_v7 = vpop.permute.xlu1 %8066 }
 0x3ca   :  { %1302 = vmax.xlane.f32.xlu0 %v1301_v37 }
 0x3cb   :  { %v7072_v39 = vpop.f32.mrb[22].mxu1  ;;  %1311 = vmax.xlane.f32.xlu1 %v1310_v38 }
 0x3cc   :  { %v1223_v41 = vpop.f32.mrb[23].mxu1 }
 0x3ce   :  { %1314 = vmax.xlane.f32.xlu0 %v1313_v58 }
 0x3e8   :  { %v1237_v54 = vpop.xlane.xlu1 %1236 }
 0x3e9   :  { %v1329_v60 = vsub.f32 %v9091_v33, %v1237_v54  ;;  %v1234_v5 = vpop.xlane.xlu0 %1233 }
 0x3ea   :  { %v1328_v6 = vsub.f32 %v9094_v43, %v1234_v5  ;;  %v9272_v5 = vadd.f32 %v7069_v18, %v9083_v32 }
 0x3eb   :  { %v1362_v10 = vmul.f32 1.442695, %v1329_v60 }
 0x3ec   :  { %v1360_v22 = vmul.f32 1.442695, %v1328_v6 }
 0x3ed   :  { %8250 = vpow2.f32 %v1362_v10  ;;  %v1240_v9 = vpop.xlane.xlu1 %1239  ;;  %v1243_v31 = vpop.xlane.xlu0 %1242  ;;  %v9277_v10 = vadd.f32 %v1223_v41, %v9106_v34 }
 0x3ee   :  { %8252 = vpow2.f32 %v1360_v22  ;;  %v1330_v37 = vsub.f32 %v9114_v55, %v1240_v9  ;;  %v1331_v38 = vsub.f32 %v9111_v35, %v1243_v31  ;;  %v9267_v35 = vadd.f32 %v1213_v50, %v9088_v12 }
 0x3ef   :  { %v9282_v12 = vadd.f32 %v7072_v39, %v9099_v46  ;;  %v1319_v50 = vsel %vm83_vm0, %v9272_v5, -inf  ;;  %v1322_v32 = vsel %vm83_vm0, %v9277_v10, -inf }
 0x3f0   :  { %v1364_v58 = vmul.f32 1.442695, %v1330_v37  ;;  %v1366_v24 = vmul.f32 1.442695, %v1331_v38  ;;  %v1316_v22 = vsel %vm83_vm0, %v9267_v35, -inf }
 0x3f1   :  { %v1325_v18 = vsel %vm83_vm0, %v9282_v12, -inf }
 0x3f2   :  { %8254 = vpow2.f32 %v1364_v58 }
 0x3f3   :  { %8256 = vpow2.f32 %v1366_v24 }
 0x3f7   :  { %v9254_v29 = vpop.eup %8250 }
 0x3f8   :  { %v9256_v33 = vpop.eup %8252  ;;  %v1427_v43 = vsel %vm83_vm0, %v9254_v29, 0.0 }
 0x3f9   :  { %1428 = vadd.xlane.f32.xlu0 %v1427_v43  ;;  %v1424_v54 = vsel %vm83_vm0, %v9256_v33, 0.0 }
 0x3fa   :  { %1425 = vadd.xlane.f32.xlu1 %v1424_v54 }
 0x3fc   :  { %v9262_v60 = vpop.eup %8254 }
 0x3fd   :  { %v9264_v55 = vpop.eup %8256  ;;  %v1430_v24 = vsel %vm83_vm0, %v9262_v60, 0.0 }
 0x3fe   :  { %1431 = vadd.xlane.f32.xlu1 %v1430_v24  ;;  %v1433_v6 = vsel %vm83_vm0, %v9264_v55, 0.0 }
 0x3ff   :  { %1434 = vadd.xlane.f32.xlu0 %v1433_v6 }
 0x402   :  { %1317 = vmax.xlane.f32.xlu1 %v1316_v22 }
 0x403   :  { %1320 = vmax.xlane.f32.xlu0 %v1319_v50 }
 0x406   :  { %1323 = vmax.xlane.f32.xlu1 %v1322_v32 }
 0x407   :  { %1326 = vmax.xlane.f32.xlu0 %v1325_v18 }
 0x417   :  { %8076 = vrot.lane.b32.xlu1 %v8904_v14, %s11013_s27 }
 0x41d   :  { %8071 = vrot.lane.b32.xlu0 %v8894_v11, %s11013_s27 }
 0x428   :  { %v1249_v46 = vpop.xlane.xlu0 %1248 }
 0x429   :  { %v1333_v34 = vsub.f32 %v9121_v52, %v1249_v46 }
 0x42b   :  { %v1370_v39 = vmul.f32 1.442695, %v1333_v34 }
 0x42d   :  { %8258 = vpow2.f32 %v1370_v39 }
 0x42f   :  { %v1261_v41 = vpop.xlane.xlu0 %1260 }
 0x430   :  { %v1337_v9 = vsub.f32 %v9126_v62, %v1261_v41  ;;  %v1258_v31 = vpop.xlane.xlu1 %1257 }
 0x431   :  { %v1336_v38 = vsub.f32 %v9129_v61, %v1258_v31 }
 0x432   :  { %v1378_v37 = vmul.f32 1.442695, %v1337_v9 }
 0x433   :  { %v1246_v58 = vpop.xlane.xlu0 %1245  ;;  %v1376_v54 = vmul.f32 1.442695, %v1336_v38 }
 0x434   :  { %8260 = vpow2.f32 %v1378_v37  ;;  %v1332_v43 = vsub.f32 %v9132_v1, %v1246_v58  ;;  %v1252_v14 = vpop.xlane.xlu1 %1251 }
 0x435   :  { %v1334_v11 = vsub.f32 %v9137_v47, %v1252_v14 }
 0x436   :  { %v1368_v24 = vmul.f32 1.442695, %v1332_v43 }
 0x437   :  { %v9299_v6 = vpop.eup %8258  ;;  %v1255_v52 = vpop.xlane.xlu0 %1254  ;;  %v1372_v61 = vmul.f32 1.442695, %v1334_v11 }
 0x438   :  { %8262 = vpow2.f32 %v1368_v24  ;;  %v1335_v22 = vsub.f32 %v9142_v51, %v1255_v52  ;;  %v1264_v62 = vpop.xlane.xlu1 %1263  ;;  %v1439_v50 = vsel %vm83_vm0, %v9299_v6, 0.0 }
 0x439   :  { %8264 = vpow2.f32 %v1376_v54  ;;  %v1338_v1 = vsub.f32 %v9147_v57, %v1264_v62 }
 0x43a   :  { %v1374_v32 = vmul.f32 1.442695, %v1335_v22 }
 0x43b   :  { %v1267_v18 = vpop.xlane.xlu0 %1266  ;;  %v1380_v39 = vmul.f32 1.442695, %v1338_v1 }
 0x43c   :  { %8266 = vpow2.f32 %v1374_v32  ;;  %1440 = vadd.xlane.f32.xlu0 %v1439_v50  ;;  %v1339_v47 = vsub.f32 %v9152_v4, %v1267_v18  ;;  %v1270_v46 = vpop.xlane.xlu1 %1269 }
 0x43d   :  { %8268 = vpow2.f32 %v1372_v61  ;;  %v1340_v41 = vsub.f32 %v9157_v8, %v1270_v46 }
 0x43e   :  { %v9306_v34 = vpop.eup %8260  ;;  %v1382_v51 = vmul.f32 1.442695, %v1339_v47 }
 0x43f   :  { %v1273_v9 = vpop.xlane.xlu0 %1272  ;;  %v1451_v31 = vsel %vm83_vm0, %v9306_v34, 0.0  ;;  %v1384_v4 = vmul.f32 1.442695, %v1340_v41 }
 0x440   :  { %8270 = vpow2.f32 %v1382_v51  ;;  %v1341_v57 = vsub.f32 %v9162_v21, %v1273_v9  ;;  %v1282_v37 = vpop.xlane.xlu1 %1281  ;;  %1452 = vadd.xlane.f32.xlu0 %v1451_v31 }
 0x441   :  { %8272 = vpow2.f32 %v1380_v39  ;;  %v1344_v43 = vsub.f32 %v9169_v13, %v1282_v37 }
 0x442   :  { %v9312_v38 = vpop.eup %8262  ;;  %v1386_v58 = vmul.f32 1.442695, %v1341_v57 }
 0x443   :  { %v1285_v14 = vpop.xlane.xlu0 %1284  ;;  %v1436_v8 = vsel %vm83_vm0, %v9312_v38, 0.0  ;;  %v9317_v54 = vpop.eup %8264  ;;  %v1392_v52 = vmul.f32 1.442695, %v1344_v43 }
 0x444   :  { %8274 = vpow2.f32 %v1386_v58  ;;  %v1345_v24 = vsub.f32 %v9172_v44, %v1285_v14  ;;  %v1276_v11 = vpop.xlane.xlu1 %1275  ;;  %1437 = vadd.xlane.f32.xlu1 %v1436_v8  ;;  %v1448_v13 = vsel %vm83_vm0, %v9317_v54, 0.0 }
 0x445   :  { %8276 = vpow2.f32 %v1384_v4  ;;  %v1342_v62 = vsub.f32 %v9177_v16, %v1276_v11 }
 0x446   :  { %v9320_v21 = vpop.eup %8266  ;;  %v1394_v22 = vmul.f32 1.442695, %v1345_v24 }
 0x447   :  { %v1279_v50 = vpop.xlane.xlu0 %1278  ;;  %v1445_v61 = vsel %vm83_vm0, %v9320_v21, 0.0  ;;  %v9327_v32 = vpop.eup %8268  ;;  %v1388_v47 = vmul.f32 1.442695, %v1342_v62 }
 0x448   :  { %8278 = vpow2.f32 %v1394_v22  ;;  %v1343_v44 = vsub.f32 %v9182_v53, %v1279_v50  ;;  %v1288_v1 = vpop.xlane.xlu1 %1287  ;;  %1449 = vadd.xlane.f32.xlu1 %v1448_v13  ;;  %1446 = vadd.xlane.f32.xlu0 %v1445_v61  ;;  %v1442_v51 = vsel %vm83_vm0, %v9327_v32, 0.0 }
 0x449   :  { %8280 = vpow2.f32 %v1392_v52  ;;  %v1346_v46 = vsub.f32 %v9187_v59, %v1288_v1 }
 0x44a   :  { %v9330_v18 = vpop.eup %8270  ;;  %v1390_v16 = vmul.f32 1.442695, %v1343_v44 }
 0x44b   :  { %v1291_v39 = vpop.xlane.xlu0 %1290  ;;  %v1457_v41 = vsel %vm83_vm0, %v9330_v18, 0.0  ;;  %v9337_v9 = vpop.eup %8272  ;;  %v1396_v37 = vmul.f32 1.442695, %v1346_v46 }
 0x44c   :  { %8282 = vpow2.f32 %v1390_v16  ;;  %v1347_v53 = vsub.f32 %v9192_v36, %v1291_v39  ;;  %v1294_v31 = vpop.xlane.xlu1 %1293  ;;  %1443 = vadd.xlane.f32.xlu1 %v1442_v51  ;;  %1458 = vadd.xlane.f32.xlu0 %v1457_v41  ;;  %v1454_v43 = vsel %vm83_vm0, %v9337_v9, 0.0 }
 0x44d   :  { %8284 = vpow2.f32 %v1388_v47  ;;  %v1348_v4 = vsub.f32 %v9197_v56, %v1294_v31 }
 0x44e   :  { %v9340_v57 = vpop.eup %8274  ;;  %v1398_v59 = vmul.f32 1.442695, %v1347_v53 }
 0x44f   :  { %v1297_v58 = vpop.xlane.xlu0 %1296  ;;  %v1463_v14 = vsel %vm83_vm0, %v9340_v57, 0.0  ;;  %v9347_v8 = vpop.eup %8276  ;;  %v1400_v52 = vmul.f32 1.442695, %v1348_v4 }
 0x450   :  { %8286 = vpow2.f32 %v1398_v59  ;;  %v1349_v36 = vsub.f32 %v9202_v48, %v1297_v58  ;;  %v1306_v24 = vpop.xlane.xlu1 %1305  ;;  %1455 = vadd.xlane.f32.xlu1 %v1454_v43  ;;  %1464 = vadd.xlane.f32.xlu0 %v1463_v14  ;;  %v1460_v50 = vsel %vm83_vm0, %v9347_v8, 0.0 }
 0x451   :  { %8288 = vpow2.f32 %v1396_v37  ;;  %v1352_v22 = vsub.f32 %v9209_v63, %v1306_v24 }
 0x452   :  { %v9350_v11 = vpop.eup %8278  ;;  %v1402_v56 = vmul.f32 1.442695, %v1349_v36 }
 0x453   :  { %v1309_v62 = vpop.xlane.xlu0 %1308  ;;  %v1475_v13 = vsel %vm83_vm0, %v9350_v11, 0.0  ;;  %v9357_v61 = vpop.eup %8280  ;;  %v1408_v47 = vmul.f32 1.442695, %v1352_v22 }
 0x454   :  { %8290 = vpow2.f32 %v1402_v56  ;;  %v1353_v48 = vsub.f32 %v9212_v0, %v1309_v62  ;;  %v1300_v44 = vpop.xlane.xlu1 %1299  ;;  %1461 = vadd.xlane.f32.xlu1 %v1460_v50  ;;  %1476 = vadd.xlane.f32.xlu0 %v1475_v13  ;;  %v1472_v46 = vsel %vm83_vm0, %v9357_v61, 0.0 }
 0x455   :  { %8292 = vpow2.f32 %v1400_v52  ;;  %v1350_v37 = vsub.f32 %v9217_v19, %v1300_v44 }
 0x456   :  { %v9360_v1 = vpop.eup %8282  ;;  %v1410_v63 = vmul.f32 1.442695, %v1353_v48 }
 0x457   :  { %v1303_v16 = vpop.xlane.xlu0 %1302  ;;  %v1469_v39 = vsel %vm83_vm0, %v9360_v1, 0.0  ;;  %v9366_v51 = vpop.eup %8284  ;;  %v1404_v24 = vmul.f32 1.442695, %v1350_v37 }
 0x458   :  { %8294 = vpow2.f32 %v1410_v63  ;;  %v1351_v0 = vsub.f32 %v9222_v26, %v1303_v16  ;;  %v1312_v41 = vpop.xlane.xlu1 %1311  ;;  %1473 = vadd.xlane.f32.xlu1 %v1472_v46  ;;  %1470 = vadd.xlane.f32.xlu0 %v1469_v39  ;;  %v1466_v43 = vsel %vm83_vm0, %v9366_v51, 0.0 }
 0x459   :  { %v1354_v53 = vsub.f32 %v9227_v27, %v1312_v41  ;;  %8296 = vpow2.f32 %v1408_v47 }
 0x45a   :  { %v9370_v31 = vpop.eup %8286  ;;  %v1406_v59 = vmul.f32 1.442695, %v1351_v0 }
 0x45b   :  { %v1412_v4 = vmul.f32 1.442695, %v1354_v53  ;;  %v1315_v58 = vpop.xlane.xlu0 %1314  ;;  %v1481_v14 = vsel %vm83_vm0, %v9370_v31, 0.0  ;;  %v9377_v26 = vpop.eup %8288 }
 0x45c   :  { %8298 = vpow2.f32 %v1406_v59  ;;  %v1355_v36 = vsub.f32 %v9232_v49, %v1315_v58  ;;  %1467 = vadd.xlane.f32.xlu1 %v1466_v43  ;;  %1482 = vadd.xlane.f32.xlu0 %v1481_v14  ;;  %v1478_v52 = vsel %vm83_vm0, %v9377_v26, 0.0 }
 0x45d   :  { %8300 = vpow2.f32 %v1412_v4 }
 0x45e   :  { %v9380_v27 = vpop.eup %8290  ;;  %v1414_v19 = vmul.f32 1.442695, %v1355_v36 }
 0x45f   :  { %v1487_v56 = vsel %vm83_vm0, %v9380_v27, 0.0  ;;  %v9386_v22 = vpop.eup %8292 }
 0x460   :  { %8302 = vpow2.f32 %v1414_v19  ;;  %1479 = vadd.xlane.f32.xlu1 %v1478_v52  ;;  %1488 = vadd.xlane.f32.xlu0 %v1487_v56  ;;  %v1484_v49 = vsel %vm83_vm0, %v9386_v22, 0.0  ;;  %v8054_v52 = vunpack.i.h.bf16 %v9242_v42  ;;  %v8053_v56 = vunpack.i.l.bf16 %v9242_v42 }
 0x461   :  { %8304 = vpow2.f32 %v1404_v24  ;;  %v8038_v42 = vunpack.i.l.bf16 %v9238_v40 }
 0x462   :  { %v9388_v62 = vpop.eup %8294 }
 0x463   :  { %v1499_v50 = vsel %vm83_vm0, %v9388_v62, 0.0  ;;  %v9394_v13 = vpop.eup %8296 }
 0x464   :  { %1485 = vadd.xlane.f32.xlu1 %v1484_v49  ;;  %1500 = vadd.xlane.f32.xlu0 %v1499_v50  ;;  %v1496_v44 = vsel %vm83_vm0, %v9394_v13, 0.0 }
 0x466   :  { %v9396_v48 = vpop.eup %8298 }
 0x467   :  { %v1493_v47 = vsel %vm83_vm0, %v9396_v48, 0.0  ;;  %v9402_v63 = vpop.eup %8300 }
 0x468   :  { %1497 = vadd.xlane.f32.xlu1 %v1496_v44  ;;  %1494 = vadd.xlane.f32.xlu0 %v1493_v47  ;;  %v1502_v46 = vsel %vm83_vm0, %v9402_v63, 0.0 }
 0x46a   :  { %v9404_v16 = vpop.eup %8302 }
 0x46b   :  { %v1505_v39 = vsel %vm83_vm0, %v9404_v16, 0.0  ;;  %v9410_v0 = vpop.eup %8304 }
 0x46c   :  { %1503 = vadd.xlane.f32.xlu0 %v1502_v46  ;;  %1506 = vadd.xlane.f32.xlu1 %v1505_v39  ;;  %v1490_v41 = vsel %vm83_vm0, %v9410_v0, 0.0 }
 0x470   :  { %1491 = vadd.xlane.f32.xlu1 %v1490_v41 }
 0x486   :  { %v1429_v53 = vpop.xlane.xlu0 %1428 }
 0x487   :  { %8306 = vrcp.f32 %v1429_v53  ;;  %v1426_v37 = vpop.xlane.xlu1 %1425  ;;  %v8039_v53 = vunpack.i.h.bf16 %v9238_v40 }
 0x488   :  { %8308 = vrcp.f32 %v1426_v37  ;;  %v7597_v37 = vpack.c.bf16 %v8054_v52, %v8053_v56 }
 0x48b   :  { %v1432_v59 = vpop.xlane.xlu1 %1431 }
 0x48c   :  { %8310 = vrcp.f32 %v1432_v59  ;;  %v1435_v4 = vpop.xlane.xlu0 %1434 }
 0x48d   :  { %8312 = vrcp.f32 %v1435_v4  ;;  %v9431_v4 = vpack.c.bf16 %v8039_v53, %v8038_v42 }
 0x48f   :  { %v1318_v58 = vpop.xlane.xlu1 %1317 }
 0x490   :  { %v1356_v43 = vsub.f32 %v9267_v35, %v1318_v58  ;;  %v1321_v14 = vpop.xlane.xlu0 %1320 }
 0x491   :  { %v8307_v36 = vpop.eup %8306  ;;  %v1357_v24 = vsub.f32 %v9272_v5, %v1321_v14 }
 0x492   :  { %v8309_v19 = vpop.eup %8308  ;;  %v1416_v49 = vmul.f32 1.442695, %v1356_v43  ;;  %v1553_v46 = vmul.f32 %v8307_v36, %v9254_v29 }
 0x493   :  { %v1418_v50 = vmul.f32 1.442695, %v1357_v24  ;;  %v1324_v44 = vpop.xlane.xlu1 %1323  ;;  %v1552_v47 = vmul.f32 %v8309_v19, %v9256_v33 }
 0x494   :  { %8314 = vpow2.f32 %v1416_v49  ;;  %v1358_v39 = vsub.f32 %v9277_v10, %v1324_v44  ;;  %v1327_v35 = vpop.xlane.xlu0 %1326 }
 0x495   :  { %8316 = vpow2.f32 %v1418_v50  ;;  %v1359_v41 = vsub.f32 %v9282_v12, %v1327_v35  ;;  %7081 = vmatprep.mubr.msk.f32.mxu0 %vm83_vm0, %v1552_v47  ;;  %v8058_v35 = vunpack.i.l.bf16 %v9244_v45 }
 0x496   :  { %v8311_v5 = vpop.eup %8310  ;;  %7082 = vmatmul.mubr.msk.f32.vlgmr.msra.gmra.mrb[16].mxu0 %vm83_vm0, %v1553_v46  ;;  %v1420_v59 = vmul.f32 1.442695, %v1358_v39 }
 0x497   :  { %v8313_v33 = vpop.eup %8312  ;;  %v1422_v29 = vmul.f32 1.442695, %v1359_v41  ;;  %7596 = vmatpush3.bf16.msra.mxu0 %v9068_v28  ;;  %v1554_v10 = vmul.f32 %v8311_v5, %v9262_v60  ;;  %v9456_v19 = vpop.permute.xlu1 %8076 }
 0x498   :  { %7598 = vmatprep.subr.bf16.mxu0 %v7597_v37  ;;  %v1555_v12 = vmul.f32 %v8313_v33, %v9264_v55  ;;  %v9454_v24 = vpop.permute.xlu0 %8071  ;;  %v8044_v33 = vunpack.i.h.bf16 %v9058_v2 }
 0x499   :  { %8318 = vpow2.f32 %v1422_v29  ;;  %7084 = vmatprep.mubr.msk.f32.mxu0 %vm83_vm0, %v1554_v10  ;;  %v8043_v29 = vunpack.i.l.bf16 %v9058_v2  ;;  %v8064_v10 = vunpack.i.h.bf16 %v9246_v3 }
 0x49a   :  { %7085 = vmatmul.mubr.msk.f32.gmra.mrb[18].mxu0 %vm83_vm0, %v1555_v12  ;;  %8320 = vpow2.f32 %v1420_v59 }
 0x49b   :  { %7600 = vmatpush3.bf16.msra.mxu0 %v7597_v37 }
 0x49c   :  { %7610 = vmatprep.subr.bf16.mxu0 %v9431_v4 }
 0x49e   :  { %v9434_v40 = vpop.eup %8314 }
 0x49f   :  { %v9436_v58 = vpop.eup %8316  ;;  %v1508_v28 = vsel %vm83_vm0, %v9434_v40, 0.0 }
 0x4a0   :  { %1509 = vadd.xlane.f32.xlu1 %v1508_v28  ;;  %v1511_v60 = vsel %vm83_vm0, %v9436_v58, 0.0 }
 0x4a1   :  { %1512 = vadd.xlane.f32.xlu0 %v1511_v60 }
 0x4a3   :  { %v9442_v55 = vpop.eup %8318 }
 0x4a4   :  { %v1517_v43 = vsel %vm83_vm0, %v9442_v55, 0.0  ;;  %v9446_v14 = vpop.eup %8320 }
 0x4a5   :  { %1518 = vadd.xlane.f32.xlu0 %v1517_v43  ;;  %v1514_v36 = vsel %vm83_vm0, %v9446_v14, 0.0 }
 0x4a9   :  { %1515 = vadd.xlane.f32.xlu0 %v1514_v36  ;;  %v8073_v36 = vunpack.i.l.bf16 %v9454_v24 }
 0x4b1   :  { %8086 = vrot.lane.b32.xlu1 %v8922_v20, %s11013_s27 }
 0x4bf   :  { %8081 = vrot.lane.b32.xlu0 %v8914_v17, %s11013_s27  ;;  %v8059_v17 = vunpack.i.h.bf16 %v9244_v45  ;;  %v8063_v45 = vunpack.i.l.bf16 %v9246_v3  ;;  %v8074_v3 = vunpack.i.h.bf16 %v9454_v24  ;;  %s11059_s27 = smov 100  }
 0x4c1   :  { %v7605_v12 = vpack.c.bf16 %v8059_v17, %v8058_v35  ;;  %v8068_v17 = vunpack.i.l.bf16 %v9248_v7 }
 0x4c9   :  { %v1441_v52 = vpop.xlane.xlu0 %1440 }
 0x4ca   :  { %8322 = vrcp.f32 %v1441_v52  ;;  %v7613_v52 = vpack.c.bf16 %v8064_v10, %v8063_v45 }
 0x4cd   :  { %v1453_v56 = vpop.xlane.xlu0 %1452 }
 0x4d1   :  { %v1438_v49 = vpop.xlane.xlu1 %1437 }
 0x4d2   :  { %8324 = vrcp.f32 %v1438_v49 }
 0x4d3   :  { %8326 = vrcp.f32 %v1453_v56 }
 0x4d4   :  { %v8323_v20 = vpop.eup %8322 }
 0x4d5   :  { %v1450_v50 = vpop.xlane.xlu1 %1449  ;;  %v1447_v44 = vpop.xlane.xlu0 %1446  ;;  %v1557_v42 = vmul.f32 %v8323_v20, %v9299_v6 }
 0x4d6   :  { %8328 = vrcp.f32 %v1450_v50 }
 0x4d7   :  { %8330 = vrcp.f32 %v1447_v44  ;;  %v7625_v44 = vpack.c.bf16 %v8074_v3, %v8073_v36 }
 0x4d9   :  { %v1444_v47 = vpop.xlane.xlu1 %1443  ;;  %v1459_v46 = vpop.xlane.xlu0 %1458 }
 0x4da   :  { %8332 = vrcp.f32 %v1444_v47 }
 0x4db   :  { %8334 = vrcp.f32 %v1459_v46 }
 0x4dc   :  { %v8325_v39 = vpop.eup %8324 }
 0x4dd   :  { %v1456_v41 = vpop.xlane.xlu1 %1455  ;;  %v1465_v5 = vpop.xlane.xlu0 %1464  ;;  %v1556_v53 = vmul.f32 %v8325_v39, %v9312_v38  ;;  %v8069_v39 = vunpack.i.h.bf16 %v9248_v7 }
 0x4de   :  { %8336 = vrcp.f32 %v1456_v41  ;;  %v8327_v37 = vpop.eup %8326 }
 0x4df   :  { %7095 = vmatprep.mubr.msk.f32.mxu1 %vm83_vm0, %v1556_v53  ;;  %8338 = vrcp.f32 %v1465_v5  ;;  %v1561_v60 = vmul.f32 %v8327_v37, %v9306_v34  ;;  %v8078_v37 = vunpack.i.l.bf16 %v9456_v19  ;;  %v7621_v7 = vpack.c.bf16 %v8069_v39, %v8068_v17 }
 0x4e0   :  { %v8329_v59 = vpop.eup %8328  ;;  %7096 = vmatmul.mubr.msk.f32.vlgmr.msra.gmra.mrb[24].mxu1 %vm83_vm0, %v1557_v42  ;;  %v8079_v42 = vunpack.i.h.bf16 %v9456_v19 }
 0x4e1   :  { %7604 = vmatpush3.bf16.msra.mxu1 %v9077_v15  ;;  %v1462_v6 = vpop.xlane.xlu1 %1461  ;;  %v1477_v38 = vpop.xlane.xlu0 %1476  ;;  %v1560_v28 = vmul.f32 %v8329_v59, %v9317_v54  ;;  %v7617_v15 = vpack.c.bf16 %v8044_v33, %v8043_v29 }
 0x4e2   :  { %8340 = vrcp.f32 %v1462_v6  ;;  %7606 = vmatprep.subr.bf16.mxu1 %v7605_v12  ;;  %v8331_v43 = vpop.eup %8330  ;;  %v7633_v19 = vpack.c.bf16 %v8079_v42, %v8078_v37 }
 0x4e3   :  { %7109 = vmatprep.mubr.msk.f32.mxu0 %vm83_vm0, %v1560_v28  ;;  %8342 = vrcp.f32 %v1477_v38  ;;  %v1559_v49 = vmul.f32 %v8331_v43, %v9320_v21 }
 0x4e4   :  { %v8333_v2 = vpop.eup %8332  ;;  %7110 = vmatmul.mubr.msk.f32.vlgmr.msra.gmra.mrb[20].mxu0 %vm83_vm0, %v1561_v60 }
 0x4e5   :  { %7608 = vmatpush3.bf16.msra.mxu1 %v7605_v12  ;;  %7612 = vmatpush3.bf16.msra.mxu0 %v9431_v4  ;;  %v1474_v54 = vpop.xlane.xlu1 %1473  ;;  %v1471_v34 = vpop.xlane.xlu0 %1470  ;;  %v1558_v56 = vmul.f32 %v8333_v2, %v9327_v32 }
 0x4e6   :  { %8344 = vrcp.f32 %v1474_v54  ;;  %7614 = vmatprep.subr.bf16.mxu0 %v7613_v52  ;;  %7618 = vmatprep.subr.bf16.mxu1 %v7617_v15  ;;  %v8335_v50 = vpop.eup %8334 }
 0x4e7   :  { %7098 = vmatprep.mubr.msk.f32.mxu1 %vm83_vm0, %v1558_v56  ;;  %8346 = vrcp.f32 %v1471_v34  ;;  %v1563_v32 = vmul.f32 %v8335_v50, %v9330_v18 }
 0x4e8   :  { %v8337_v24 = vpop.eup %8336  ;;  %7099 = vmatmul.mubr.msk.f32.gmra.mrb[26].mxu1 %vm83_vm0, %v1559_v49 }
 0x4e9   :  { %7616 = vmatpush3.bf16.msra.mxu0 %v7613_v52  ;;  %v1468_v47 = vpop.xlane.xlu1 %1467  ;;  %v1483_v4 = vpop.xlane.xlu0 %1482  ;;  %v1562_v46 = vmul.f32 %v8337_v24, %v9337_v9 }
 0x4ea   :  { %8348 = vrcp.f32 %v1468_v47  ;;  %7626 = vmatprep.subr.bf16.mxu0 %v7625_v44  ;;  %v8339_v20 = vpop.eup %8338 }
 0x4eb   :  { %7112 = vmatprep.mubr.msk.f32.mxu0 %vm83_vm0, %v1562_v46  ;;  %8350 = vrcp.f32 %v1483_v4  ;;  %v1565_v9 = vmul.f32 %v8339_v20, %v9340_v57 }
 0x4ec   :  { %v8341_v21 = vpop.eup %8340  ;;  %7113 = vmatmul.mubr.msk.f32.gmra.mrb[22].mxu0 %vm83_vm0, %v1563_v32 }
 0x4ed   :  { %v1480_v35 = vpop.xlane.xlu1 %1479  ;;  %v1564_v41 = vmul.f32 %v8341_v21, %v9347_v8  ;;  %v1489_v5 = vpop.xlane.xlu0 %1488 }
 0x4ee   :  { %8352 = vrcp.f32 %v1480_v35  ;;  %v8343_v53 = vpop.eup %8342 }
 0x4ef   :  { %7123 = vmatprep.mubr.msk.f32.mxu1 %vm83_vm0, %v1564_v41  ;;  %8354 = vrcp.f32 %v1489_v5  ;;  %v1569_v57 = vmul.f32 %v8343_v53, %v9350_v11 }
 0x4f0   :  { %v8345_v18 = vpop.eup %8344  ;;  %7124 = vmatmul.mubr.msk.f32.vlgmr.msra.gmra.mrb[28].mxu1 %vm83_vm0, %v1565_v9 }
 0x4f1   :  { %7620 = vmatpush3.bf16.msra.mxu1 %v7617_v15  ;;  %v1486_v33 = vpop.xlane.xlu1 %1485  ;;  %v1568_v8 = vmul.f32 %v8345_v18, %v9357_v61  ;;  %v8347_v59 = vpop.eup %8346 }
 0x4f2   :  { %8356 = vrcp.f32 %v1486_v33  ;;  %7622 = vmatprep.subr.bf16.mxu1 %v7621_v7  ;;  %v1501_v10 = vpop.xlane.xlu0 %1500  ;;  %v1567_v61 = vmul.f32 %v8347_v59, %v9360_v1 }
 0x4f3   :  { %7137 = vmatprep.mubr.msk.f32.mxu0 %vm83_vm0, %v1568_v8 }
 0x4f4   :  { %v8349_v29 = vpop.eup %8348  ;;  %7138 = vmatmul.mubr.msk.f32.vlgmr.msra.gmra.mrb[24].mxu0 %vm83_vm0, %v1569_v57 }
 0x4f5   :  { %7624 = vmatpush3.bf16.msra.mxu1 %v7621_v7  ;;  %7628 = vmatpush3.bf16.msra.mxu0 %v7625_v44  ;;  %v1498_v45 = vpop.xlane.xlu1 %1497  ;;  %v1566_v12 = vmul.f32 %v8349_v29, %v9366_v51  ;;  %v8351_v11 = vpop.eup %8350 }
 0x4f6   :  { %8358 = vrcp.f32 %v1498_v45  ;;  %7634 = vmatprep.subr.bf16.mxu1 %v7633_v19  ;;  %v1495_v60 = vpop.xlane.xlu0 %1494  ;;  %v1571_v43 = vmul.f32 %v8351_v11, %v9370_v31 }
 0x4f7   :  { %7126 = vmatprep.mubr.msk.f32.mxu1 %vm83_vm0, %v1566_v12  ;;  %8360 = vrcp.f32 %v1495_v60 }
 0x4f8   :  { %v8353_v6 = vpop.eup %8352  ;;  %7127 = vmatmul.mubr.msk.f32.gmra.mrb[30].mxu1 %vm83_vm0, %v1567_v61 }
 0x4f9   :  { %v1507_v38 = vpop.xlane.xlu1 %1506  ;;  %v1570_v28 = vmul.f32 %v8353_v6, %v9377_v26  ;;  %v8355_v2 = vpop.eup %8354 }
 0x4fa   :  { %v1573_v36 = vmul.f32 %v8355_v2, %v9380_v27  ;;  %v1504_v27 = vpop.xlane.xlu0 %1503 }
 0x4fb   :  { %7140 = vmatprep.mubr.msk.f32.mxu0 %vm83_vm0, %v1570_v28 }
 0x4fc   :  { %v8357_v51 = vpop.eup %8356  ;;  %7141 = vmatmul.mubr.msk.f32.gmra.mrb[26].mxu0 %vm83_vm0, %v1571_v43 }
 0x4fd   :  { %v1492_v1 = vpop.xlane.xlu1 %1491  ;;  %v1572_v3 = vmul.f32 %v8357_v51, %v9386_v22  ;;  %v2602_v51 = vld [vmem:[%s10978_s7] sm:$0xff] }
 0x4fe   :  { %8362 = vrcp.f32 %v1492_v1  ;;  %v2603_v1 = vld [vmem:[%s10978_s7 + $0x8] sm:$0xff] }
 0x4ff   :  { %7151 = vmatprep.mubr.msk.f32.mxu1 %vm83_vm0, %v1572_v3  ;;  %v7641_v3 = vpack.c.bf16 %v2603_v1, %v2602_v51 }
 0x500   :  { %v8359_v52 = vpop.eup %8358  ;;  %7152 = vmatmul.mubr.msk.f32.vlgmr.msra.gmra.mrb[32].mxu1 %vm83_vm0, %v1573_v36  ;;  %v2604_v36 = vld [vmem:[%s10978_s7 + $0x10] sm:$0xff] }
 0x501   :  { %7636 = vmatpush3.bf16.msra.mxu1 %v7633_v19  ;;  %v1576_v31 = vmul.f32 %v8359_v52, %v9394_v13  ;;  %v8361_v26 = vpop.eup %8360  ;;  %v2605_v52 = vld [vmem:[%s10978_s7 + $0x18] sm:$0xff] }
 0x502   :  { %v1575_v34 = vmul.f32 %v8361_v26, %v9396_v48  ;;  %v7645_v26 = vpack.c.bf16 %v2605_v52, %v2604_v36 }
 0x503   :  { %7165 = vmatprep.mubr.msk.f32.mxu0 %vm83_vm0, %v1576_v31 }
 0x508   :  { %v8363_v15 = vpop.eup %8362 }
 0x509   :  { %v1574_v54 = vmul.f32 %v8363_v15, %v9410_v0 }
 0x50b   :  { %7154 = vmatprep.mubr.msk.f32.mxu1 %vm83_vm0, %v1574_v54 }
 0x50c   :  { %7155 = vmatmul.mubr.msk.f32.gmra.mrb[34].mxu1 %vm83_vm0, %v1575_v34 }
 0x52d   :  { %v1510_v22 = vpop.xlane.xlu1 %1509 }
 0x52e   :  { %8364 = vrcp.f32 %v1510_v22  ;;  %v1513_v56 = vpop.xlane.xlu0 %1512 }
 0x52f   :  { %8366 = vrcp.f32 %v1513_v56 }
 0x530   :  { %8368 = vrcp.f32 %v1501_v10 }
 0x531   :  { %v8087_v49 = vpop.permute.xlu1 %8086  ;;  %8370 = vrcp.f32 %v1504_v27 }
 0x532   :  { %v8089_v50 = vunpack.i.h.bf16 %v8087_v49  ;;  %v8088_v13 = vunpack.i.l.bf16 %v8087_v49  ;;  %v1519_v24 = vpop.xlane.xlu0 %1518 }
 0x533   :  { %8372 = vrcp.f32 %v1519_v24 }
 0x534   :  { %v7637_v44 = vpack.c.bf16 %v8089_v50, %v8088_v13 }
 0x536   :  { %v1516_v0 = vpop.xlane.xlu0 %1515  ;;  %7638 = vmatprep.subr.bf16.mxu1 %v7637_v44 }
 0x537   :  { %8374 = vrcp.f32 %v1516_v0  ;;  %7640 = vmatpush3.bf16.msra.mxu1 %v7637_v44 }
 0x538   :  { %v8365_v48 = vpop.eup %8364  ;;  %8376 = vrcp.f32 %v1507_v38 }
 0x539   :  { %v8367_v47 = vpop.eup %8366  ;;  %v1580_v4 = vmul.f32 %v8365_v48, %v9434_v40 }
 0x53a   :  { %v1581_v46 = vmul.f32 %v8367_v47, %v9436_v58  ;;  %v8082_v32 = vpop.permute.xlu0 %8081  ;;  %v8369_v17 = vpop.eup %8368 }
 0x53b   :  { %v8084_v20 = vunpack.i.h.bf16 %v8082_v32  ;;  %v8083_v21 = vunpack.i.l.bf16 %v8082_v32  ;;  %7179 = vmatprep.mubr.msk.f32.mxu1 %vm83_vm0, %v1580_v4  ;;  %v8371_v35 = vpop.eup %8370  ;;  %v1577_v5 = vmul.f32 %v8369_v17, %v9388_v62 }
 0x53c   :  { %7180 = vmatmul.mubr.msk.f32.vlgmr.msra.gmra.mrb[36].mxu1 %vm83_vm0, %v1581_v46  ;;  %v1578_v40 = vmul.f32 %v8371_v35, %v9402_v63 }
 0x53d   :  { %v7629_v39 = vpack.c.bf16 %v8084_v20, %v8083_v21  ;;  %v8373_v41 = vpop.eup %8372 }
 0x53e   :  { %v1583_v18 = vmul.f32 %v8373_v41, %v9442_v55 }
 0x53f   :  { %7630 = vmatprep.subr.bf16.mxu0 %v7629_v39 }
 0x540   :  { %7632 = vmatpush3.bf16.msra.mxu0 %v7629_v39 }
 0x541   :  { %v8375_v9 = vpop.eup %8374  ;;  %7642 = vmatprep.subr.bf16.mxu0 %v7641_v3 }
 0x542   :  { %v8377_v53 = vpop.eup %8376  ;;  %v1582_v58 = vmul.f32 %v8375_v9, %v9446_v14 }
 0x543   :  { %7166 = vmatmul.mubr.msk.f32.vlgmr.msra.gmra.mrb[28].mxu0 %vm83_vm0, %v1577_v5  ;;  %v1579_v42 = vmul.f32 %v8377_v53, %v9404_v16 }
 0x544   :  { %7168 = vmatprep.mubr.msk.f32.mxu0 %vm83_vm0, %v1578_v40  ;;  %7182 = vmatprep.mubr.msk.f32.mxu1 %vm83_vm0, %v1582_v58 }
 0x545   :  { %7183 = vmatmul.mubr.msk.f32.gmra.mrb[38].mxu1 %vm83_vm0, %v1583_v18  ;;  %7644 = vmatpush3.bf16.msra.mxu0 %v7641_v3 }
 0x546   :  { %7646 = vmatprep.subr.bf16.mxu0 %v7645_v26 }
 0x547   :  { %7169 = vmatmul.mubr.msk.f32.gmra.mrb[30].mxu0 %vm83_vm0, %v1579_v42 }
 0x549   :  { %7648 = vmatpush3.bf16.msra.mxu0 %v7645_v26 }
 0x569   :  { %v9528_v62 = vpop.f32.mrb[16].mxu0 }
 0x56a   :  { %v9530_v37 = vpop.f32.mrb[17].mxu0 }
 0x56d   :  { %v9532_v63 = vpop.f32.mrb[18].mxu0 }
 0x56e   :  { %v9534_v14 = vpop.f32.mrb[19].mxu0 }
 0x5b3   :  { %v7097_v7 = vpop.f32.mrb[24].mxu1 }
 0x5b4   :  { %2462 = vrot.lane.b32.xlu1 %v7097_v7, %s11009_s22  ;;  %v1783_v55 = vpop.f32.mrb[25].mxu1 }
 0x5b5   :  { %2460 = vrot.lane.b32.xlu0 %v1783_v55, %s11009_s22 }
 0x5b7   :  { %v7111_v33 = vpop.f32.mrb[20].mxu0 }
 0x5b8   :  { %2478 = vrot.lane.b32.xlu1 %v7111_v33, %s11005_s26  ;;  %v1892_v16 = vpop.f32.mrb[21].mxu0 }
 0x5b9   :  { %2476 = vrot.lane.b32.xlu0 %v1892_v16, %s11005_s26 }
 0x5bb   :  { %v7100_v8 = vpop.f32.mrb[26].mxu1 }
 0x5bc   :  { %2466 = vrot.lane.b32.xlu1 %v7100_v8, %s11009_s22  ;;  %v1793_v57 = vpop.f32.mrb[27].mxu1 }
 0x5bd   :  { %2464 = vrot.lane.b32.xlu0 %v1793_v57, %s11009_s22  ;;  %s11068_s22 = smov 20  }
 0x5bf   :  { %v7114_v59 = vpop.f32.mrb[22].mxu0 }
 0x5c0   :  { %2482 = vrot.lane.b32.xlu1 %v7114_v59, %s11005_s26  ;;  %v1902_v29 = vpop.f32.mrb[23].mxu0 }
 0x5c1   :  { %2480 = vrot.lane.b32.xlu0 %v1902_v29, %s11005_s26  ;;  %s11021_s26 = smov 24  }
 0x5c3   :  { %v7125_v10 = vpop.f32.mrb[28].mxu1 }
 0x5c4   :  { %2494 = vrot.lane.b32.xlu1 %v7125_v10, %s11007_s29  ;;  %v2001_v19 = vpop.f32.mrb[29].mxu1 }
 0x5c5   :  { %2492 = vrot.lane.b32.xlu0 %v2001_v19, %s11007_s29 }
 0x5c7   :  { %v7139_v45 = vpop.f32.mrb[24].mxu0 }
 0x5c8   :  { %2510 = vrot.lane.b32.xlu1 %v7139_v45, %s11011_s2  ;;  %v2110_v12 = vpop.f32.mrb[25].mxu0 }
 0x5c9   :  { %2508 = vrot.lane.b32.xlu0 %v2110_v12, %s11011_s2 }
 0x5cb   :  { %v7128_v61 = vpop.f32.mrb[30].mxu1 }
 0x5cc   :  { %2498 = vrot.lane.b32.xlu1 %v7128_v61, %s11007_s29  ;;  %v2011_v11 = vpop.f32.mrb[31].mxu1 }
 0x5cd   :  { %2496 = vrot.lane.b32.xlu0 %v2011_v11, %s11007_s29  ;;  %s11069_s29 = smov 24  }
 0x5cf   :  { %v7142_v6 = vpop.f32.mrb[26].mxu0 }
 0x5d0   :  { %2514 = vrot.lane.b32.xlu1 %v7142_v6, %s11011_s2  ;;  %v2120_v38 = vpop.f32.mrb[27].mxu0 }
 0x5d1   :  { %2512 = vrot.lane.b32.xlu0 %v2120_v38, %s11011_s2 }
 0x5d3   :  { %v7153_v28 = vpop.f32.mrb[32].mxu1 }
 0x5d4   :  { %2526 = vrot.lane.b32.xlu1 %v7153_v28, %s11023_s3  ;;  %v2219_v60 = vpop.f32.mrb[33].mxu1 }
 0x5d5   :  { %2524 = vrot.lane.b32.xlu0 %v2219_v60, %s11023_s3 }
 0x5df   :  { %v7156_v43 = vpop.f32.mrb[34].mxu1 }
 0x5e0   :  { %v2229_v2 = vpop.f32.mrb[35].mxu1 }
 0x60f   :  { %v7181_v31 = vpop.f32.mrb[36].mxu1 }
 0x610   :  { %v2437_v15 = vpop.f32.mrb[37].mxu1 }
 0x616   :  { %v7167_v54 = vpop.f32.mrb[28].mxu0 }
 0x617   :  { %2542 = vrot.lane.b32.xlu1 %v7167_v54, %s11021_s26  ;;  %v2328_v34 = vpop.f32.mrb[29].mxu0 }
 0x618   :  { %v7184_v27 = vpop.f32.mrb[38].mxu1  ;;  %2540 = vrot.lane.b32.xlu0 %v2328_v34, %s11021_s26  ;;  %v6349_v34 = vld [vmem:[%s10979_s8] ss:$0 sm:$0xff] }
 0x619   :  { %v2447_v22 = vpop.f32.mrb[39].mxu1 }
 0x61a   :  { %v7170_v56 = vpop.f32.mrb[30].mxu0 }
 0x61b   :  { %2530 = vrot.lane.b32.xlu1 %v7156_v43, %s11023_s3  ;;  %v2338_v49 = vpop.f32.mrb[31].mxu0 }
 0x61c   :  { %2528 = vrot.lane.b32.xlu0 %v2229_v2, %s11023_s3 }
 0x61f   :  { %2558 = vrot.lane.b32.xlu1 %v7181_v31, %s11019_s5 }
 0x620   :  { %2556 = vrot.lane.b32.xlu0 %v2437_v15, %s11019_s5 }
 0x623   :  { %2546 = vrot.lane.b32.xlu1 %v7170_v56, %s11021_s26 }
 0x624   :  { %2544 = vrot.lane.b32.xlu0 %v2338_v49, %s11021_s26 }
 0x626   :  { %v2463_v50 = vpop.permute.xlu1 %2462 }
 0x627   :  { %2562 = vrot.lane.b32.xlu1 %v7184_v27, %s11019_s5  ;;  %v2461_v13 = vpop.permute.xlu0 %2460  ;;  %v2569_v42 = vsel %vm367_vm1, %v9528_v62, %v2463_v50 }
 0x628   :  { %2560 = vrot.lane.b32.xlu0 %v2447_v22, %s11019_s5  ;;  %v2568_v58 = vsel %vm367_vm1, %v9530_v37, %v2461_v13 }
 0x62a   :  { %v2479_v24 = vpop.permute.xlu1 %2478 }
 0x62b   :  { %v2477_v44 = vpop.permute.xlu0 %2476  ;;  %v2574_v33 = vsel %vm2572_vm3, %v2569_v42, %v2479_v24 }
 0x62c   :  { %v2573_v7 = vsel %vm2572_vm3, %v2568_v58, %v2477_v44 }
 0x62e   :  { %v2467_v0 = vpop.permute.xlu1 %2466 }
 0x62f   :  { %v2465_v48 = vpop.permute.xlu0 %2464  ;;  %v2571_v38 = vsel %vm367_vm1, %v9532_v63, %v2467_v0 }
 0x630   :  { %v2570_v11 = vsel %vm367_vm1, %v9534_v14, %v2465_v48 }
 0x632   :  { %v2483_v47 = vpop.permute.xlu1 %2482 }
 0x633   :  { %v2481_v4 = vpop.permute.xlu0 %2480  ;;  %v2576_v43 = vsel %vm2572_vm3, %v2571_v38, %v2483_v47  ;;  %v2795_v38 = vld [vmem:[%s10980_s11 + $0x30] sm:$0xff] }
 0x634   :  { %v2575_v28 = vsel %vm2572_vm3, %v2570_v11, %v2481_v4 }
 0x636   :  { %v2495_v46 = vpop.permute.xlu1 %2494 }
 0x637   :  { %v2493_v32 = vpop.permute.xlu0 %2492  ;;  %v2579_v8 = vsel %vm2577_vm4, %v2574_v33, %v2495_v46 }
 0x638   :  { %v2578_v16 = vsel %vm2577_vm4, %v2573_v7, %v2493_v32  ;;  %v11052_v32 = vld [vmem:[#allocation2_spill] sm:$0xff] }
 0x63a   :  { %v2511_v20 = vpop.permute.xlu1 %2510 }
 0x63b   :  { %v2509_v21 = vpop.permute.xlu0 %2508  ;;  %v2584_v37 = vsel %vm2582_vm5, %v2579_v8, %v2511_v20 }
 0x63c   :  { %v2583_v57 = vsel %vm2582_vm5, %v2578_v16, %v2509_v21 }
 0x63e   :  { %v2499_v39 = vpop.permute.xlu1 %2498 }
 0x63f   :  { %v2497_v17 = vpop.permute.xlu0 %2496  ;;  %v2581_v51 = vsel %vm2577_vm4, %v2576_v43, %v2499_v39  ;;  %v2934_v43 = vld [vmem:[%s10981_s13 + $0x80] sm:$0xff] }
 0x640   :  { %v2580_v2 = vsel %vm2577_vm4, %v2575_v28, %v2497_v17 }
 0x642   :  { %v2515_v35 = vpop.permute.xlu1 %2514 }
 0x643   :  { %v2513_v41 = vpop.permute.xlu0 %2512  ;;  %v2586_v3 = vsel %vm2582_vm5, %v2581_v51, %v2515_v35  ;;  %v2918_v51 = vld [vmem:[%s10981_s13] sm:$0xff] }
 0x644   :  { %v2585_v1 = vsel %vm2582_vm5, %v2580_v2, %v2513_v41  ;;  %v2935_v2 = vld [vmem:[%s10981_s13 + $0x88] sm:$0xff] }
 0x646   :  { %v2527_v9 = vpop.permute.xlu1 %2526 }
 0x647   :  { %v2525_v5 = vpop.permute.xlu0 %2524  ;;  %v2589_v62 = vsel %vm2587_vm6, %v2584_v37, %v2527_v9 }
 0x648   :  { %v2588_v59 = vsel %vm2587_vm6, %v2583_v57, %v2525_v5 }
 0x689   :  { %v2543_v53 = vpop.permute.xlu1 %2542 }
 0x68a   :  { %v2541_v40 = vpop.permute.xlu0 %2540  ;;  %v2594_v45 = vsel %vm2592_vm7, %v2589_v62, %v2543_v53 }
 0x68b   :  { %v2593_v10 = vsel %vm2592_vm7, %v2588_v59, %v2541_v40  ;;  %v2790_v59 = vld [vmem:[%s10980_s11 + $0x8] sm:$0xff] }
 0x68d   :  { %v2531_v18 = vpop.permute.xlu1 %2530 }
 0x68e   :  { %v2529_v55 = vpop.permute.xlu0 %2528  ;;  %v2591_v52 = vsel %vm2587_vm6, %v2586_v3, %v2531_v18  ;;  %v2919_v3 = vld [vmem:[%s10981_s13 + $0x8] sm:$0xff] }
 0x68f   :  { %v2590_v14 = vsel %vm2587_vm6, %v2585_v1, %v2529_v55  ;;  %v7657_v1 = vpack.c.bf16 %v2935_v2, %v2934_v43 }
 0x691   :  { %v2559_v29 = vpop.permute.xlu1 %2558  ;;  %7658 = vmatprep.subr.bf16.mxu0 %v7657_v1 }
 0x692   :  { %v2557_v19 = vpop.permute.xlu0 %2556  ;;  %v2599_v61 = vsel %vm2597_vm8, %v2594_v45, %v2559_v29  ;;  %v2792_v29 = vld [vmem:[%s10980_s11 + $0x18] sm:$0xff] }
 0x693   :  { %v2598_v12 = vsel %vm2597_vm8, %v2593_v10, %v2557_v19  ;;  %v7649_v62 = vpack.c.bf16 %v2792_v29, %v2790_v59  ;;  %v2789_v10 = vld [vmem:[%s10980_s11] sm:$0xff]  ;;  %v2791_v19 = vld [vmem:[%s10980_s11 + $0x10] sm:$0xff] }
 0x694   :  { %7193 = vmatprep.mubr.msk.f32.mxu0 %vm83_vm0, %v2598_v12  ;;  %v7651_v45 = vpack.c.bf16 %v2791_v19, %v2789_v10  ;;  %v2794_v12 = vld [vmem:[%s10980_s11 + $0x28] sm:$0xff] }
 0x695   :  { %7194 = vmatmul.mubr.msk.f32.vlgmr.msra.gmra.mrb[32].mxu0 %vm83_vm0, %v2599_v61  ;;  %v2547_v6 = vpop.permute.xlu1 %2546  ;;  %7650 = vmatprep.subr.bf16.mxu1 %v7649_v62  ;;  %v2796_v61 = vld [vmem:[%s10980_s11 + $0x38] sm:$0xff] }
 0x696   :  { %v2545_v60 = vpop.permute.xlu0 %2544  ;;  %v2596_v26 = vsel %vm2592_vm7, %v2591_v52, %v2547_v6  ;;  %7652 = vmatpush1.bf16.msra.mxu1 %v7651_v45  ;;  %v7653_v11 = vpack.c.bf16 %v2796_v61, %v2794_v12  ;;  %v2793_v6 = vld [vmem:[%s10980_s11 + $0x20] sm:$0xff]  ;;  %v7659_v52 = vpack.c.bf16 %v2919_v3, %v2918_v51 }
 0x697   :  { %v2595_v63 = vsel %vm2592_vm7, %v2590_v14, %v2545_v60  ;;  %v7655_v28 = vpack.c.bf16 %v2795_v38, %v2793_v6  ;;  %v11031_v60 = vmov 0.0   ;;  %v2936_v14 = vld [vmem:[%s10981_s13 + $0x90] sm:$0xff]  ;;  %v6354_v45 = vld [vmem:[%s10982_s9] ss:$0 sm:$0xff] }
 0x698   :  { %7654 = vmatprep.subr.bf16.mxu1 %v7653_v11  ;;  %2885 = vmatprep.mubr.f32.mxu1 %v11031_v60  ;;  %v6355_v6 = vld [vmem:[%s10983_s10] ss:$0 sm:$0xff] }
 0x699   :  { %v2563_v36 = vpop.permute.xlu1 %2562  ;;  %7660 = vmatpush3.bf16.msra.mxu0 %v7659_v52 }
 0x69a   :  { %v2561_v31 = vpop.permute.xlu0 %2560  ;;  %v2601_v54 = vsel %vm2597_vm8, %v2596_v26, %v2563_v36  ;;  %7656 = vmatpush1.bf16.msra.mxu1 %v7655_v28  ;;  %v2937_v36 = vld [vmem:[%s10981_s13 + $0x98] sm:$0xff] }
 0x69b   :  { %v2600_v15 = vsel %vm2597_vm8, %v2595_v63, %v2561_v31  ;;  %v7661_v63 = vpack.c.bf16 %v2937_v36, %v2936_v14  ;;  %v2920_v31 = vld [vmem:[%s10981_s13 + $0x10] sm:$0xff]  ;;  %v2921_v26 = vld [vmem:[%s10981_s13 + $0x18] sm:$0xff] }
 0x69c   :  { %7196 = vmatprep.mubr.msk.f32.mxu0 %vm83_vm0, %v2600_v15  ;;  %v2938_v15 = vld [vmem:[%s10981_s13 + $0xa0] sm:$0xff] }
 0x69d   :  { %7197 = vmatmul.mubr.msk.f32.gmra.mrb[34].mxu0 %vm83_vm0, %v2601_v54  ;;  %v2939_v54 = vld [vmem:[%s10981_s13 + $0xa8] sm:$0xff]  ;;  %7662 = vmatprep.subr.bf16.mxu0 %v7661_v63 }
 0x69e   :  { %v2931_v63 = vld [vmem:[%s10981_s13 + $0x68] sm:$0xff] }
 0x768   :  { %v7195_v27 = vpop.f32.mrb[32].mxu0 }
 0x769   :  { %v2697_v22 = vadd.f32 %v7195_v27, %v6349_v34  ;;  %v2691_v56 = vpop.f32.mrb[33].mxu0  ;;  %v7665_v27 = vpack.c.bf16 %v2939_v54, %v2938_v15  ;;  %v2932_v54 = vld [vmem:[%s10981_s13 + $0x70] sm:$0xff] }
 0x76a   :  { %v2692_v49 = vadd.f32 %v6349_v34, %v2691_v56  ;;  %v2923_v56 = vld [vmem:[%s10981_s13 + $0x28] sm:$0xff] }
 0x76b   :  { %v2711_v50 = vadd.f32 %v2697_v22, %v8728_v25  ;;  %v2922_v22 = vld [vmem:[%s10981_s13 + $0x20] sm:$0xff] }
 0x76c   :  { %v2710_v13 = vadd.f32 %v2692_v49, %v8726_v23  ;;  %v2940_v49 = vld [vmem:[%s10981_s13 + $0xb0] sm:$0xff] }
 0x76d   :  { %v2719_v24 = vsel %vm83_vm0, %v2711_v50, 0.0 }
 0x76e   :  { %2720 = vadd.xlane.f32.xlu1 %v2719_v24  ;;  %v2716_v44 = vsel %vm83_vm0, %v2710_v13, 0.0 }
 0x76f   :  { %2717 = vadd.xlane.f32.xlu0 %v2716_v44  ;;  %v2924_v44 = vld [vmem:[%s10981_s13 + $0x30] sm:$0xff] }
 0x770   :  { %v7198_v0 = vpop.f32.mrb[34].mxu0 }
 0x771   :  { %v2701_v48 = vpop.f32.mrb[35].mxu0  ;;  %v2707_v47 = vadd.f32 %v7198_v0, %v6349_v34  ;;  %v2925_v0 = vld [vmem:[%s10981_s13 + $0x38] sm:$0xff] }
 0x772   :  { %v2702_v4 = vadd.f32 %v6349_v34, %v2701_v48  ;;  %v7663_v34 = vpack.c.bf16 %v2921_v26, %v2920_v31  ;;  %v2942_v48 = vld [vmem:[%s10981_s13 + $0xc0] sm:$0xff]  ;;  %v2948_v31 = vld [vmem:[%s10981_s13 + $0xf0] sm:$0xff]  ;;  %v2949_v26 = vld [vmem:[%s10981_s13 + $0xf8] sm:$0xff] }
 0x773   :  { %v2713_v20 = vadd.f32 %v2707_v47, %v11052_v32  ;;  %v2943_v47 = vld [vmem:[%s10981_s13 + $0xc8] sm:$0xff]  ;;  %v2926_v32 = vld [vmem:[%s10981_s13 + $0x40] sm:$0xff]  ;;  %v7685_v15 = vpack.c.bf16 %v2949_v26, %v2948_v31 }
 0x774   :  { %v2712_v46 = vadd.f32 %v2702_v4, %v8736_v30  ;;  %7664 = vmatpush3.bf16.msra.mxu0 %v7663_v34  ;;  %v7671_v4 = vpack.c.bf16 %v2925_v0, %v2924_v44  ;;  %v2933_v34 = vld [vmem:[%s10981_s13 + $0x78] sm:$0xff] }
 0x775   :  { %v2725_v25 = vsel %vm83_vm0, %v2713_v20, 0.0  ;;  %7666 = vmatprep.subr.bf16.mxu0 %v7665_v27  ;;  %v7687_v27 = vpack.c.bf16 %v2933_v34, %v2932_v54 }
 0x776   :  { %v2722_v21 = vsel %vm83_vm0, %v2712_v46, 0.0 }
 0x777   :  { %2723 = vadd.xlane.f32.xlu0 %v2722_v21  ;;  %v2944_v21 = vld [vmem:[%s10981_s13 + $0xd0] sm:$0xff] }
 0x77b   :  { %2726 = vadd.xlane.f32.xlu0 %v2725_v25  ;;  %v2945_v25 = vld [vmem:[%s10981_s13 + $0xd8] sm:$0xff] }
 0x7fb   :  { %v2721_v23 = vpop.xlane.xlu1 %2720 }
 0x7fc   :  { %v2730_v39 = vmul.f32 0.03125, %v2721_v23  ;;  %v2718_v17 = vpop.xlane.xlu0 %2717 }
 0x7fd   :  { %v2729_v35 = vmul.f32 0.03125, %v2718_v17  ;;  %v2928_v17 = vld [vmem:[%s10981_s13 + $0x50] sm:$0xff] }
 0x7fe   :  { %v9623_v41 = vsub.f32 %v2711_v50, %v2730_v39  ;;  %v2941_v50 = vld [vmem:[%s10981_s13 + $0xb8] sm:$0xff]  ;;  %v7677_v39 = vpack.c.bf16 %v2945_v25, %v2944_v21 }
 0x7ff   :  { %v9625_v9 = vsub.f32 %v2710_v13, %v2729_v35  ;;  %v7667_v13 = vpack.c.bf16 %v2923_v56, %v2922_v22  ;;  %v7669_v24 = vpack.c.bf16 %v2941_v50, %v2940_v49  ;;  %v2929_v35 = vld [vmem:[%s10981_s13 + $0x58] sm:$0xff]  ;;  %v2799_v22 = vlaneseq  ;;  %v2797_v50 = vld [vmem:[%s10984_s12] sm:$0x3] }
 0x800   :  { %v2738_v5 = vmul.f32 %v9623_v41, %v9623_v41 }
 0x801   :  { %v2737_v30 = vmul.f32 %v9625_v9, %v9625_v9  ;;  %7668 = vmatpush3.bf16.msra.mxu0 %v7667_v13  ;;  %v9793_v56 = vshrl.u32 %v2799_v22, 7 }
 0x802   :  { %v2744_v53 = vsel %vm83_vm0, %v2738_v5, 0.0  ;;  %7670 = vmatprep.subr.bf16.mxu0 %v7669_v24  ;;  %v2946_v5 = vld [vmem:[%s10981_s13 + $0xe0] sm:$0xff] }
 0x803   :  { %2745 = vadd.xlane.f32.xlu0 %v2744_v53  ;;  %v2741_v40 = vsel %vm83_vm0, %v2737_v30, 0.0  ;;  %v2947_v30 = vld [vmem:[%s10981_s13 + $0xe8] sm:$0xff]  ;;  %v7679_v53 = vpack.c.bf16 %v2929_v35, %v2928_v17  ;;  %11053 = vst [vmem:[#allocation2_spill] sm:$0xff] %v9793_v56  ;;  %v11030_v49 = vsub.s32 0, %v9793_v56  ;;  %v11029_v13 = vsub.s32 1, %v9793_v56 }
 0x804   :  { %2742 = vadd.xlane.f32.xlu1 %v2741_v40  ;;  %v2724_v58 = vpop.xlane.xlu0 %2723  ;;  %v7681_v40 = vpack.c.bf16 %v2947_v30, %v2946_v5 }
 0x805   :  { %v2731_v18 = vmul.f32 0.03125, %v2724_v58  ;;  %7672 = vmatpush3.bf16.msra.mxu0 %v7671_v4  ;;  %v2802_v24 = vrot.slane %v2797_v50, %v11030_v49  ;;  %v2806_v44 = vrot.slane %v2797_v50, %v11029_v13 }
 0x807   :  { %v9633_v42 = vsub.f32 %v2712_v46, %v2731_v18  ;;  %v7673_v46 = vpack.c.bf16 %v2943_v47, %v2942_v48 }
 0x808   :  { %v2727_v7 = vpop.xlane.xlu0 %2726 }
 0x809   :  { %v2732_v55 = vmul.f32 0.03125, %v2727_v7  ;;  %v2739_v33 = vmul.f32 %v9633_v42, %v9633_v42  ;;  %7674 = vmatprep.subr.bf16.mxu0 %v7673_v46 }
 0x80b   :  { %v9637_v16 = vsub.f32 %v2713_v20, %v2732_v55  ;;  %v2747_v8 = vsel %vm83_vm0, %v2739_v33, 0.0  ;;  %v2927_v20 = vld [vmem:[%s10981_s13 + $0x48] sm:$0xff] }
 0x80c   :  { %2748 = vadd.xlane.f32.xlu1 %v2747_v8  ;;  %v7675_v23 = vpack.c.bf16 %v2927_v20, %v2926_v32 }
 0x80d   :  { %v2740_v57 = vmul.f32 %v9637_v16, %v9637_v16 }
 0x80e   :  { %7676 = vmatpush3.bf16.msra.mxu0 %v7675_v23 }
 0x80f   :  { %v2750_v37 = vsel %vm83_vm0, %v2740_v57, 0.0  ;;  %7678 = vmatprep.subr.bf16.mxu0 %v7677_v39 }
 0x810   :  { %2751 = vadd.xlane.f32.xlu0 %v2750_v37 }
 0x812   :  { %7680 = vmatpush3.bf16.msra.mxu0 %v7679_v53 }
 0x813   :  { %7682 = vmatprep.subr.bf16.mxu0 %v7681_v40 }
 0x890   :  { %v2746_v58 = vpop.xlane.xlu0 %2745 }
 0x891   :  { %v2754_v18 = vmul.f32 0.03125, %v2746_v58  ;;  %v2743_v7 = vpop.xlane.xlu1 %2742 }
 0x892   :  { %v2753_v55 = vmul.f32 0.03125, %v2743_v7 }
 0x893   :  { %v2758_v33 = vadd.f32 1e-05, %v2754_v18 }
 0x894   :  { %v2757_v8 = vadd.f32 1e-05, %v2753_v55 }
 0x895   :  { %8378 = vrsqrt.f32 %v2758_v33 }
 0x896   :  { %8380 = vrsqrt.f32 %v2757_v8 }
 0x899   :  { %v2749_v57 = vpop.xlane.xlu1 %2748 }
 0x89a   :  { %v2755_v37 = vmul.f32 0.03125, %v2749_v57 }
 0x89c   :  { %v2759_v59 = vadd.f32 1e-05, %v2755_v37 }
 0x89d   :  { %v2752_v29 = vpop.xlane.xlu0 %2751 }
 0x89e   :  { %8382 = vrsqrt.f32 %v2759_v59  ;;  %v2756_v62 = vmul.f32 0.03125, %v2752_v29  ;;  %v6360_v59 = vld [vmem:[%s10985_s14] ss:$0 sm:$0xff] }
 0x89f   :  { %v8379_v10 = vpop.eup %8378 }
 0x8a0   :  { %v8381_v19 = vpop.eup %8380  ;;  %v2760_v12 = vadd.f32 1e-05, %v2756_v62  ;;  %v2766_v11 = vmul.f32 %v8379_v10, %v9623_v41 }
 0x8a1   :  { %v2765_v61 = vmul.f32 %v8381_v19, %v9625_v9 }
 0x8a2   :  { %8384 = vrsqrt.f32 %v2760_v12  ;;  %v2776_v43 = vmul.f32 %v6354_v45, %v2766_v11 }
 0x8a3   :  { %v2775_v38 = vmul.f32 %v6354_v45, %v2765_v61 }
 0x8a4   :  { %v9759_v51 = vadd.f32 %v6355_v6, %v2776_v43 }
 0x8a5   :  { %v9754_v28 = vadd.f32 %v6355_v6, %v2775_v38 }
 0x8a7   :  { %6356 = vmatmul.mubr.msk.f32.vlgmr.msra.gmra.mrb[40].mxu1 %vm83_vm0, %v9754_v28 }
 0x8a8   :  { %v8383_v2 = vpop.eup %8382  ;;  %2891 = vmatprep.mubr.f32.mxu1 %v11031_v60 }
 0x8a9   :  { %v2767_v9 = vmul.f32 %v8383_v2, %v9633_v42  ;;  %v2930_v42 = vld [vmem:[%s10981_s13 + $0x60] sm:$0xff] }
 0x8ab   :  { %6357 = vmatmul.mubr.msk.f32.gmra.mrb[42].mxu1 %vm83_vm0, %v9759_v51  ;;  %v2777_v41 = vmul.f32 %v6354_v45, %v2767_v9 }
 0x8ac   :  { %v8385_v1 = vpop.eup %8384  ;;  %2897 = vmatprep.mubr.f32.mxu1 %v11031_v60 }
 0x8ad   :  { %v9765_v3 = vadd.f32 %v6355_v6, %v2777_v41  ;;  %v2768_v14 = vmul.f32 %v8385_v1, %v9637_v16  ;;  %v7683_v16 = vpack.c.bf16 %v2931_v63, %v2930_v42 }
 0x8af   :  { %6358 = vmatmul.mubr.msk.f32.gmra.mrb[44].mxu1 %vm83_vm0, %v9765_v3  ;;  %v2778_v36 = vmul.f32 %v6354_v45, %v2768_v14  ;;  %7684 = vmatpush3.bf16.msra.mxu0 %v7683_v16 }
 0x8b0   :  { %2903 = vmatprep.mubr.f32.mxu1 %v11031_v60  ;;  %7686 = vmatprep.subr.bf16.mxu0 %v7685_v15 }
 0x8b1   :  { %v9771_v52 = vadd.f32 %v6355_v6, %v2778_v36 }
 0x8b3   :  { %6359 = vmatmul.mubr.msk.f32.gmra.mrb[46].mxu1 %vm83_vm0, %v9771_v52  ;;  %7688 = vmatpush3.bf16.msra.mxu0 %v7687_v27 }
 0x97a   :  { %v2887_v0 = vpop.f32.mrb[40].mxu1 }
 0x97b   :  { %v2888_v48 = vadd.f32 %v2887_v0, %v2802_v24  ;;  %v2889_v47 = vpop.f32.mrb[41].mxu1 }
 0x97c   :  { %v2890_v4 = vadd.f32 %v2889_v47, %v2806_v44 }
 0x97d   :  { %v2910_v20 = vmax.f32 %v2888_v48, 0.0 }
 0x97e   :  { %v2911_v46 = vmax.f32 %v2890_v4, 0.0  ;;  %v2893_v32 = vpop.f32.mrb[42].mxu1 }
 0x97f   :  { %v2894_v21 = vadd.f32 %v2893_v32, %v2802_v24  ;;  %v2895_v25 = vpop.f32.mrb[43].mxu1 }
 0x980   :  { %v2896_v23 = vadd.f32 %v2895_v25, %v2806_v44  ;;  %3021 = vmatprep.mubr.f32.mxu0 %v2911_v46 }
 0x981   :  { %3022 = vmatmul.mubr.f32.vlgmr.msra.gmra.mrb[36].mxu0 %v2910_v20  ;;  %v2912_v35 = vmax.f32 %v2894_v21, 0.0 }
 0x982   :  { %v2913_v39 = vmax.f32 %v2896_v23, 0.0  ;;  %v2899_v17 = vpop.f32.mrb[44].mxu1  ;;  %v6363_v23 = vld [vmem:[%s11044_s24 + $0x20] sm:$0xff] }
 0x983   :  { %v2900_v5 = vadd.f32 %v2899_v17, %v2802_v24  ;;  %v2901_v30 = vpop.f32.mrb[45].mxu1 }
 0x984   :  { %v2902_v53 = vadd.f32 %v2901_v30, %v2806_v44  ;;  %3026 = vmatprep.mubr.f32.mxu0 %v2913_v39  ;;  %v6364_v39 = vld [vmem:[%s11044_s24 + $0x28] sm:$0xff] }
 0x985   :  { %3027 = vmatmul.mubr.f32.gmra.mrb[38].mxu0 %v2912_v35  ;;  %v2914_v18 = vmax.f32 %v2900_v5, 0.0  ;;  %v7689_v17 = vpack.c.bf16 %v6364_v39, %v6363_v23  ;;  %v6365_v35 = vld [vmem:[%s11044_s24 + $0x30] sm:$0xff]  ;;  %v6366_v5 = vld [vmem:[%s11044_s24 + $0x38] sm:$0xff] }
 0x986   :  { %v2915_v40 = vmax.f32 %v2902_v53, 0.0  ;;  %v2905_v58 = vpop.f32.mrb[46].mxu1  ;;  %v7693_v30 = vpack.c.bf16 %v6366_v5, %v6365_v35 }
 0x987   :  { %v2906_v7 = vadd.f32 %v2905_v58, %v2802_v24  ;;  %v2907_v55 = vpop.f32.mrb[47].mxu1  ;;  %7690 = vmatprep.subr.bf16.mxu1 %v7689_v17 }
 0x988   :  { %v2908_v33 = vadd.f32 %v2907_v55, %v2806_v44  ;;  %3031 = vmatprep.mubr.f32.mxu0 %v2915_v40  ;;  %7692 = vmatpush3.bf16.msra.mxu1 %v7689_v17 }
 0x989   :  { %3032 = vmatmul.mubr.f32.gmra.mrb[40].mxu0 %v2914_v18  ;;  %v2916_v57 = vmax.f32 %v2906_v7, 0.0  ;;  %7694 = vmatprep.subr.bf16.mxu1 %v7693_v30 }
 0x98a   :  { %v2917_v8 = vmax.f32 %v2908_v33, 0.0 }
 0x98c   :  { %3036 = vmatprep.mubr.f32.mxu0 %v2917_v8  ;;  %7696 = vmatpush3.bf16.msra.mxu1 %v7693_v30 }
 0x98d   :  { %3037 = vmatmul.mubr.f32.gmra.mrb[42].mxu0 %v2916_v57 }
 0xa54   :  { %v6725_v37 = vpop.f32.mrb[36].mxu0 }
 0xa55   :  { %v6726_v29 = vpop.f32.mrb[37].mxu0 }
 0xa56   :  { %v6727_v62 = vadd.f32 %v6726_v29, %v6725_v37 }
 0xa58   :  { %v3024_v10 = vadd.f32 %v6727_v62, %v6360_v59  ;;  %v6728_v19 = vpop.f32.mrb[38].mxu0 }
 0xa59   :  { %v6729_v45 = vpop.f32.mrb[39].mxu0 }
 0xa5a   :  { %v6730_v12 = vadd.f32 %v6729_v45, %v6728_v19  ;;  %v3042_v61 = vadd.f32 %v3024_v10, %v9754_v28  ;;  %v6361_v10 = vld [vmem:[%s10986_s15] ss:$0 sm:$0xff] }
 0xa5b   :  { %v6362_v45 = vld [vmem:[%s10987_s16] ss:$0 sm:$0xff] }
 0xa5c   :  { %v3029_v11 = vadd.f32 %v6730_v12, %v6360_v59  ;;  %v6731_v6 = vpop.f32.mrb[40].mxu0  ;;  %v3048_v38 = vsel %vm83_vm0, %v3042_v61, 0.0 }
 0xa5d   :  { %3049 = vadd.xlane.f32.xlu1 %v3048_v38  ;;  %v6732_v43 = vpop.f32.mrb[41].mxu0 }
 0xa5e   :  { %v6733_v2 = vadd.f32 %v6732_v43, %v6731_v6  ;;  %v3043_v9 = vadd.f32 %v3029_v11, %v9759_v51 }
 0xa60   :  { %v3034_v41 = vadd.f32 %v6733_v2, %v6360_v59  ;;  %v6734_v1 = vpop.f32.mrb[42].mxu0  ;;  %v3051_v14 = vsel %vm83_vm0, %v3043_v9, 0.0 }
 0xa61   :  { %3052 = vadd.xlane.f32.xlu0 %v3051_v14  ;;  %v6735_v36 = vpop.f32.mrb[43].mxu0 }
 0xa62   :  { %v6736_v42 = vadd.f32 %v6735_v36, %v6734_v1  ;;  %v3044_v63 = vadd.f32 %v3034_v41, %v9765_v3 }
 0xa64   :  { %v3039_v16 = vadd.f32 %v6736_v42, %v6360_v59  ;;  %v3054_v28 = vsel %vm83_vm0, %v3044_v63, 0.0 }
 0xa65   :  { %3055 = vadd.xlane.f32.xlu1 %v3054_v28 }
 0xa66   :  { %v3045_v31 = vadd.f32 %v3039_v16, %v9771_v52  ;;  %v6368_v16 = vld [vmem:[%s11048_s4 + $0x1] ss:$0 sm:$0xff]  ;;  %s11056_s4 = smov 112  }
 0xa68   :  { %v3057_v26 = vsel %vm83_vm0, %v3045_v31, 0.0 }
 0xa69   :  { %3058 = vadd.xlane.f32.xlu0 %v3057_v26 }
 0xaea   :  { %v3050_v15 = vpop.xlane.xlu1 %3049 }
 0xaeb   :  { %v3060_v51 = vmul.f32 0.03125, %v3050_v15 }
 0xaed   :  { %v3064_v54 = vsub.f32 %v3042_v61, %v3060_v51 }
 0xaee   :  { %v3053_v34 = vpop.xlane.xlu0 %3052 }
 0xaef   :  { %v3061_v27 = vmul.f32 0.03125, %v3053_v34  ;;  %v3068_v22 = vmul.f32 %v3064_v54, %v3064_v54 }
 0xaf1   :  { %v3065_v50 = vsub.f32 %v3043_v9, %v3061_v27  ;;  %v3072_v24 = vsel %vm83_vm0, %v3068_v22, 0.0 }
 0xaf2   :  { %3073 = vadd.xlane.f32.xlu1 %v3072_v24  ;;  %v3056_v3 = vpop.xlane.xlu1 %3055 }
 0xaf3   :  { %v3062_v44 = vmul.f32 0.03125, %v3056_v3  ;;  %v3069_v0 = vmul.f32 %v3065_v50, %v3065_v50 }
 0xaf5   :  { %v3066_v48 = vsub.f32 %v3044_v63, %v3062_v44  ;;  %v3075_v47 = vsel %vm83_vm0, %v3069_v0, 0.0 }
 0xaf6   :  { %3076 = vadd.xlane.f32.xlu0 %v3075_v47  ;;  %v3059_v52 = vpop.xlane.xlu0 %3058 }
 0xaf7   :  { %v3063_v4 = vmul.f32 0.03125, %v3059_v52  ;;  %v3070_v46 = vmul.f32 %v3066_v48, %v3066_v48 }
 0xaf9   :  { %v3067_v32 = vsub.f32 %v3045_v31, %v3063_v4  ;;  %v3078_v20 = vsel %vm83_vm0, %v3070_v46, 0.0 }
 0xafa   :  { %3079 = vadd.xlane.f32.xlu1 %v3078_v20 }
 0xafb   :  { %v3071_v21 = vmul.f32 %v3067_v32, %v3067_v32 }
 0xafd   :  { %v3081_v25 = vsel %vm83_vm0, %v3071_v21, 0.0 }
 0xafe   :  { %3082 = vadd.xlane.f32.xlu0 %v3081_v25 }
 0xb7f   :  { %v3074_v53 = vpop.xlane.xlu1 %3073 }
 0xb80   :  { %v3084_v40 = vmul.f32 0.03125, %v3074_v53 }
 0xb82   :  { %v3088_v58 = vadd.f32 1e-05, %v3084_v40 }
 0xb83   :  { %v3077_v18 = vpop.xlane.xlu0 %3076 }
 0xb84   :  { %8386 = vrsqrt.f32 %v3088_v58  ;;  %v3085_v7 = vmul.f32 0.03125, %v3077_v18 }
 0xb86   :  { %v3089_v55 = vadd.f32 1e-05, %v3085_v7 }
 0xb87   :  { %v3080_v33 = vpop.xlane.xlu1 %3079 }
 0xb88   :  { %8388 = vrsqrt.f32 %v3089_v55  ;;  %v3086_v8 = vmul.f32 0.03125, %v3080_v33 }
 0xb8a   :  { %v3090_v57 = vadd.f32 1e-05, %v3086_v8 }
 0xb8b   :  { %v3083_v37 = vpop.xlane.xlu0 %3082 }
 0xb8c   :  { %8390 = vrsqrt.f32 %v3090_v57  ;;  %v3087_v59 = vmul.f32 0.03125, %v3083_v37 }
 0xb8e   :  { %v8387_v29 = vpop.eup %8386  ;;  %v3091_v62 = vadd.f32 1e-05, %v3087_v59 }
 0xb8f   :  { %v3096_v19 = vmul.f32 %v8387_v29, %v3064_v54 }
 0xb90   :  { %8392 = vrsqrt.f32 %v3091_v62 }
 0xb91   :  { %v3106_v12 = vmul.f32 %v6361_v10, %v3096_v19 }
 0xb92   :  { %v8389_v61 = vpop.eup %8388 }
 0xb93   :  { %v3097_v11 = vmul.f32 %v8389_v61, %v3065_v50  ;;  %v9837_v6 = vadd.f32 %v6362_v45, %v3106_v12 }
 0xb95   :  { %v3107_v38 = vmul.f32 %v6361_v10, %v3097_v11  ;;  %7207 = vmatprep.mubr.msk.f32.mxu1 %vm83_vm0, %v9837_v6 }
 0xb96   :  { %v8391_v43 = vpop.eup %8390 }
 0xb97   :  { %v9841_v2 = vadd.f32 %v6362_v45, %v3107_v38  ;;  %v3098_v9 = vmul.f32 %v8391_v43, %v3066_v48 }
 0xb99   :  { %7208 = vmatmul.mubr.msk.f32.vlgmr.msra.gmra.mrb[48].mxu1 %vm83_vm0, %v9841_v2  ;;  %v3108_v41 = vmul.f32 %v6361_v10, %v3098_v9 }
 0xb9a   :  { %v8393_v1 = vpop.eup %8392 }
 0xb9b   :  { %v9845_v14 = vadd.f32 %v6362_v45, %v3108_v41  ;;  %v3099_v36 = vmul.f32 %v8393_v1, %v3067_v32 }
 0xb9d   :  { %11054 = vst [vmem:[#allocation4_spill] sm:$0xff] %v9845_v14  ;;  %7210 = vmatprep.mubr.msk.f32.mxu1 %vm83_vm0, %v9845_v14  ;;  %v3109_v42 = vmul.f32 %v6361_v10, %v3099_v36 }
 0xb9f   :  { %v9849_v63 = vadd.f32 %v6362_v45, %v3109_v42 }
 0xba1   :  { %7211 = vmatmul.mubr.msk.f32.gmra.mrb[50].mxu1 %vm83_vm0, %v9849_v63 }
 0xc6c   :  { %v7209_v28 = vpop.f32.mrb[48].mxu1 }
 0xc6d   :  { %v9856_v31 = vadd.f32 %v7209_v28, %v6368_v16  ;;  %v3211_v26 = vpop.f32.mrb[49].mxu1 }
 0xc6e   :  { %v3212_v15 = vadd.f32 %v6368_v16, %v3211_v26 }
 0xc6f   :  { %3236 = vrot.lane.b32.xlu0 %v9856_v31, %s8550_s30 }
 0xc70   :  { %3234 = vrot.lane.b32.xlu1 %v3212_v15, %s8550_s30  ;;  %7221 = vmatprep.mubr.msk.f32.mxu1 %vm367_vm1, %v3212_v15  ;;  %v9907_v22 = vpack.i.bf16 %v9856_v31, %v3212_v15 }
 0xc73   :  { %3242 = vrot.lane.b32.xlu0 %v3212_v15, %s8551_s6 }
 0xc74   :  { %v7212_v51 = vpop.f32.mrb[50].mxu1 }
 0xc75   :  { %v9863_v54 = vadd.f32 %v7212_v51, %v6368_v16  ;;  %v3221_v34 = vpop.f32.mrb[51].mxu1 }
 0xc76   :  { %v9868_v27 = vadd.f32 %v6368_v16, %v3221_v34 }
 0xc77   :  { %3250 = vrot.lane.b32.xlu0 %v3212_v15, %s11055_s25  ;;  %3240 = vrot.lane.b32.xlu1 %v9863_v54, %s8550_s30 }
 0xc78   :  { %v9915_v50 = vpack.i.bf16 %v9863_v54, %v9868_v27 }
 0xc7b   :  { %3246 = vrot.lane.b32.xlu0 %v9868_v27, %s8551_s6  ;;  %3238 = vrot.lane.b32.xlu1 %v9868_v27, %s8550_s30  ;;  %s11058_s30 = smov 104  }
 0xc7f   :  { %3254 = vrot.lane.b32.xlu0 %v9868_v27, %s11055_s25  ;;  %3244 = vrot.lane.b32.xlu1 %v9856_v31, %s8551_s6 }
 0xc83   :  { %3258 = vrot.lane.b32.xlu0 %v3212_v15, %s11056_s4  ;;  %3252 = vrot.lane.b32.xlu1 %v9856_v31, %s11055_s25 }
 0xc87   :  { %3266 = vrot.lane.b32.xlu0 %v3212_v15, %s11057_s23  ;;  %3248 = vrot.lane.b32.xlu1 %v9863_v54, %s8551_s6  ;;  %s11060_s6 = smov 96  }
 0xc8b   :  { %3262 = vrot.lane.b32.xlu0 %v9868_v27, %s11056_s4  ;;  %3256 = vrot.lane.b32.xlu1 %v9863_v54, %s11055_s25  ;;  %s11065_s25 = smov 8  }
 0xc8f   :  { %3270 = vrot.lane.b32.xlu0 %v9868_v27, %s11057_s23  ;;  %3260 = vrot.lane.b32.xlu1 %v9856_v31, %s11056_s4 }
 0xc93   :  { %3274 = vrot.lane.b32.xlu0 %v3212_v15, %s11058_s30  ;;  %3268 = vrot.lane.b32.xlu1 %v9856_v31, %s11057_s23 }
 0xc97   :  { %3282 = vrot.lane.b32.xlu0 %v3212_v15, %s11059_s27  ;;  %3264 = vrot.lane.b32.xlu1 %v9863_v54, %s11056_s4  ;;  %s11066_s4 = smov 12  }
 0xc9b   :  { %3278 = vrot.lane.b32.xlu0 %v9868_v27, %s11058_s30  ;;  %3272 = vrot.lane.b32.xlu1 %v9863_v54, %s11057_s23  ;;  %s11067_s23 = smov 16  }
 0xc9f   :  { %3286 = vrot.lane.b32.xlu0 %v9868_v27, %s11059_s27  ;;  %3276 = vrot.lane.b32.xlu1 %v9856_v31, %s11058_s30 }
 0xca3   :  { %8091 = vrot.lane.b32.xlu0 %v9907_v22, %s11060_s6  ;;  %3284 = vrot.lane.b32.xlu1 %v9856_v31, %s11059_s27 }
 0xca7   :  { %8101 = vrot.lane.b32.xlu0 %v9915_v50, %s11060_s6  ;;  %3280 = vrot.lane.b32.xlu1 %v9863_v54, %s11058_s30 }
 0xcab   :  { %3288 = vrot.lane.b32.xlu1 %v9863_v54, %s11059_s27 }
 0xce1   :  { %v9923_v24 = vpop.permute.xlu0 %3236 }
 0xce2   :  { %v3235_v3 = vpop.permute.xlu1 %3234 }
 0xce3   :  { %v9926_v44 = vpack.i.bf16 %v9923_v24, %v3235_v3  ;;  %7235 = vmatprep.mubr.msk.f32.mxu0 %vm367_vm1, %v3235_v3 }
 0xce5   :  { %8096 = vrot.lane.b32.xlu1 %v9926_v44, %s11060_s6  ;;  %v9931_v0 = vpop.permute.xlu0 %3242 }
 0xce9   :  { %v9933_v48 = vpop.permute.xlu1 %3240  ;;  %v9935_v47 = vpop.permute.xlu0 %3250 }
 0xced   :  { %v9937_v52 = vpop.permute.xlu1 %3238  ;;  %v9939_v4 = vpop.permute.xlu0 %3246 }
 0xcee   :  { %v9943_v46 = vpack.i.bf16 %v9933_v48, %v9937_v52 }
 0xcf0   :  { %8106 = vrot.lane.b32.xlu1 %v9943_v46, %s11060_s6 }
 0xcf1   :  { %v9947_v32 = vpop.permute.xlu1 %3244  ;;  %v9949_v20 = vpop.permute.xlu0 %3254 }
 0xcf2   :  { %v8110_v21 = vpack.i.bf16 %v9947_v32, %v9931_v0 }
 0xcf4   :  { %8111 = vrot.lane.b32.xlu0 %v8110_v21, %s11060_s6 }
 0xcf5   :  { %v9954_v25 = vpop.permute.xlu1 %3252  ;;  %v9956_v23 = vpop.permute.xlu0 %3258 }
 0xcf6   :  { %v8115_v39 = vpack.i.bf16 %v9954_v25, %v9935_v47 }
 0xcf8   :  { %8116 = vrot.lane.b32.xlu1 %v8115_v39, %s11060_s6 }
 0xcf9   :  { %v9961_v17 = vpop.permute.xlu1 %3248  ;;  %v9963_v35 = vpop.permute.xlu0 %3266 }
 0xcfa   :  { %v8120_v5 = vpack.i.bf16 %v9961_v17, %v9939_v4 }
 0xcfc   :  { %8121 = vrot.lane.b32.xlu0 %v8120_v5, %s11060_s6 }
 0xcfd   :  { %v9968_v30 = vpop.permute.xlu1 %3256  ;;  %v9970_v53 = vpop.permute.xlu0 %3262 }
 0xcfe   :  { %v8125_v40 = vpack.i.bf16 %v9968_v30, %v9949_v20 }
 0xd00   :  { %8126 = vrot.lane.b32.xlu1 %v8125_v40, %s11060_s6 }
 0xd01   :  { %v9975_v58 = vpop.permute.xlu1 %3260  ;;  %v9977_v18 = vpop.permute.xlu0 %3270 }
 0xd02   :  { %v8130_v7 = vpack.i.bf16 %v9975_v58, %v9956_v23 }
 0xd04   :  { %8131 = vrot.lane.b32.xlu0 %v8130_v7, %s11060_s6 }
 0xd05   :  { %v9982_v55 = vpop.permute.xlu1 %3268  ;;  %v9984_v33 = vpop.permute.xlu0 %3274 }
 0xd06   :  { %v8135_v8 = vpack.i.bf16 %v9982_v55, %v9963_v35 }
 0xd08   :  { %8136 = vrot.lane.b32.xlu1 %v8135_v8, %s11060_s6 }
 0xd09   :  { %v9989_v57 = vpop.permute.xlu1 %3264  ;;  %v9991_v37 = vpop.permute.xlu0 %3282 }
 0xd0a   :  { %v8140_v59 = vpack.i.bf16 %v9989_v57, %v9970_v53 }
 0xd0c   :  { %8141 = vrot.lane.b32.xlu0 %v8140_v59, %s11060_s6 }
 0xd0d   :  { %v9996_v29 = vpop.permute.xlu1 %3272  ;;  %v9998_v62 = vpop.permute.xlu0 %3278 }
 0xd0e   :  { %v8145_v10 = vpack.i.bf16 %v9996_v29, %v9977_v18 }
 0xd10   :  { %8146 = vrot.lane.b32.xlu1 %v8145_v10, %s11060_s6 }
 0xd11   :  { %v10003_v19 = vpop.permute.xlu1 %3276  ;;  %v10005_v45 = vpop.permute.xlu0 %3286 }
 0xd12   :  { %v10009_v12 = vpack.i.bf16 %v10003_v19, %v9984_v33 }
 0xd14   :  { %8151 = vrot.lane.b32.xlu0 %v10009_v12, %s11060_s6 }
 0xd15   :  { %v10013_v61 = vpop.permute.xlu1 %3284  ;;  %v8092_v11 = vpop.permute.xlu0 %8091 }
 0xd16   :  { %v10017_v38 = vpack.i.bf16 %v10013_v61, %v9991_v37  ;;  %v8094_v43 = vunpack.i.h.bf16 %v8092_v11  ;;  %v8093_v9 = vunpack.i.l.bf16 %v8092_v11 }
 0xd18   :  { %v7697_v41 = vpack.c.bf16 %v8094_v43, %v8093_v9  ;;  %8156 = vrot.lane.b32.xlu1 %v10017_v38, %s11060_s6 }
 0xd19   :  { %v10021_v1 = vpop.permute.xlu1 %3280  ;;  %v8102_v36 = vpop.permute.xlu0 %8101 }
 0xd1a   :  { %v10025_v42 = vpack.i.bf16 %v10021_v1, %v9998_v62  ;;  %v8104_v16 = vunpack.i.h.bf16 %v8102_v36  ;;  %v8103_v28 = vunpack.i.l.bf16 %v8102_v36  ;;  %7699 = vmatprep.subr.msk.bf16.mxu1 %vm8929_vm2, %v7697_v41 }
 0xd1b   :  { %7702 = vmatpush3.bf16.xpose.msk.msra.mxu1 %vm8929_vm2, %v7697_v41 }
 0xd1c   :  { %v7703_v15 = vpack.c.bf16 %v8104_v16, %v8103_v28  ;;  %8161 = vrot.lane.b32.xlu0 %v10025_v42, %s11060_s6 }
 0xd1d   :  { %v10033_v51 = vpop.permute.xlu1 %3288 }
 0xd1e   :  { %v10037_v34 = vpack.i.bf16 %v10033_v51, %v10005_v45  ;;  %7705 = vmatprep.subr.msk.bf16.mxu1 %vm8929_vm2, %v7703_v15 }
 0xd20   :  { %8181 = vrot.lane.b32.xlu0 %v9926_v44, %s11062_s0  ;;  %8166 = vrot.lane.b32.xlu1 %v10037_v34, %s11060_s6 }
 0xd23   :  { %7708 = vmatpush3.bf16.xpose.msk.msra.mxu1 %vm8929_vm2, %v7703_v15 }
 0xd24   :  { %8186 = vrot.lane.b32.xlu0 %v8110_v21, %s11062_s0  ;;  %8171 = vrot.lane.b32.xlu1 %v9907_v22, %s11062_s0 }
 0xd28   :  { %8191 = vrot.lane.b32.xlu0 %v8115_v39, %s11062_s0  ;;  %8176 = vrot.lane.b32.xlu1 %v9915_v50, %s11062_s0 }
 0xd2a   :  { %7222 = vmatmul.mubr.msk.f32.vlgmr.msra.gmra.mrb[52].mxu1 %vm367_vm1, %v9856_v31 }
 0xd2b   :  { %7224 = vmatprep.mubr.msk.f32.mxu1 %vm367_vm1, %v9868_v27 }
 0xd2c   :  { %8196 = vrot.lane.b32.xlu0 %v8130_v7, %s11062_s0  ;;  %8201 = vrot.lane.b32.xlu1 %v8135_v8, %s11062_s0 }
 0xd2e   :  { %7225 = vmatmul.mubr.msk.f32.gmra.mrb[54].mxu1 %vm367_vm1, %v9863_v54 }
 0xd2f   :  { %7249 = vmatprep.mubr.msk.f32.mxu1 %vm367_vm1, %v9931_v0 }
 0xd30   :  { %8211 = vrot.lane.b32.xlu0 %v8120_v5, %s11062_s0  ;;  %8206 = vrot.lane.b32.xlu1 %v9943_v46, %s11062_s0 }
 0xd34   :  { %8221 = vrot.lane.b32.xlu0 %v8140_v59, %s11062_s0  ;;  %8216 = vrot.lane.b32.xlu1 %v8125_v40, %s11062_s0 }
 0xd38   :  { %8226 = vrot.lane.b32.xlu0 %v8145_v10, %s11062_s0 }
 0xd57   :  { %v8097_v31 = vpop.permute.xlu1 %8096 }
 0xd58   :  { %v8099_v27 = vunpack.i.h.bf16 %v8097_v31  ;;  %v8098_v22 = vunpack.i.l.bf16 %v8097_v31 }
 0xd5a   :  { %v7709_v50 = vpack.c.bf16 %v8099_v27, %v8098_v22 }
 0xd5c   :  { %7711 = vmatprep.subr.msk.bf16.mxu0 %vm8929_vm2, %v7709_v50 }
 0xd5d   :  { %7714 = vmatpush3.bf16.xpose.msk.msra.mxu0 %vm8929_vm2, %v7709_v50 }
 0xd62   :  { %v8107_v54 = vpop.permute.xlu1 %8106 }
 0xd63   :  { %v8109_v3 = vunpack.i.h.bf16 %v8107_v54  ;;  %v8108_v44 = vunpack.i.l.bf16 %v8107_v54 }
 0xd65   :  { %v7715_v0 = vpack.c.bf16 %v8109_v3, %v8108_v44 }
 0xd66   :  { %v8112_v46 = vpop.permute.xlu0 %8111 }
 0xd67   :  { %v8114_v21 = vunpack.i.h.bf16 %v8112_v46  ;;  %v8113_v39 = vunpack.i.l.bf16 %v8112_v46  ;;  %7717 = vmatprep.subr.msk.bf16.mxu0 %vm8929_vm2, %v7715_v0 }
 0xd68   :  { %7720 = vmatpush3.bf16.xpose.msk.msra.mxu0 %vm8929_vm2, %v7715_v0 }
 0xd69   :  { %v7721_v5 = vpack.c.bf16 %v8114_v21, %v8113_v39 }
 0xd6a   :  { %v8117_v40 = vpop.permute.xlu1 %8116 }
 0xd6b   :  { %v8119_v7 = vunpack.i.h.bf16 %v8117_v40  ;;  %v8118_v8 = vunpack.i.l.bf16 %v8117_v40  ;;  %7723 = vmatprep.subr.msk.bf16.mxu1 %vm8929_vm2, %v7721_v5 }
 0xd6c   :  { %7726 = vmatpush3.bf16.xpose.msk.msra.mxu1 %vm8929_vm2, %v7721_v5 }
 0xd6d   :  { %v7733_v59 = vpack.c.bf16 %v8119_v7, %v8118_v8 }
 0xd6e   :  { %v8122_v10 = vpop.permute.xlu0 %8121 }
 0xd6f   :  { %v8124_v11 = vunpack.i.h.bf16 %v8122_v10  ;;  %v8123_v43 = vunpack.i.l.bf16 %v8122_v10  ;;  %7236 = vmatmul.mubr.msk.f32.vlgmr.msra.gmra.mrb[44].mxu0 %vm367_vm1, %v9923_v24  ;;  %7735 = vmatprep.subr.msk.bf16.mxu0 %vm8929_vm2, %v7733_v59 }
 0xd70   :  { %7238 = vmatprep.mubr.msk.f32.mxu0 %vm367_vm1, %v9937_v52  ;;  %7738 = vmatpush3.bf16.xpose.msk.msra.mxu0 %vm8929_vm2, %v7733_v59 }
 0xd71   :  { %v7727_v9 = vpack.c.bf16 %v8124_v11, %v8123_v43 }
 0xd72   :  { %v8127_v41 = vpop.permute.xlu1 %8126 }
 0xd73   :  { %v8129_v36 = vunpack.i.h.bf16 %v8127_v41  ;;  %v8128_v16 = vunpack.i.l.bf16 %v8127_v41  ;;  %7239 = vmatmul.mubr.msk.f32.gmra.mrb[46].mxu0 %vm367_vm1, %v9933_v48  ;;  %7729 = vmatprep.subr.msk.bf16.mxu1 %vm8929_vm2, %v7727_v9 }
 0xd74   :  { %7732 = vmatpush3.bf16.xpose.msk.msra.mxu1 %vm8929_vm2, %v7727_v9  ;;  %7263 = vmatprep.mubr.msk.f32.mxu0 %vm367_vm1, %v9935_v47 }
 0xd75   :  { %v7739_v24 = vpack.c.bf16 %v8129_v36, %v8128_v16 }
 0xd76   :  { %v8132_v52 = vpop.permute.xlu0 %8131 }
 0xd77   :  { %v8134_v28 = vunpack.i.h.bf16 %v8132_v52  ;;  %v8133_v15 = vunpack.i.l.bf16 %v8132_v52  ;;  %7741 = vmatprep.subr.msk.bf16.mxu0 %vm8929_vm2, %v7739_v24 }
 0xd78   :  { %7744 = vmatpush3.bf16.xpose.msk.msra.mxu0 %vm8929_vm2, %v7739_v24 }
 0xd79   :  { %v7745_v48 = vpack.c.bf16 %v8134_v28, %v8133_v15 }
 0xd7a   :  { %v8137_v31 = vpop.permute.xlu1 %8136 }
 0xd7b   :  { %v8139_v27 = vunpack.i.h.bf16 %v8137_v31  ;;  %v8138_v22 = vunpack.i.l.bf16 %v8137_v31  ;;  %7250 = vmatmul.mubr.msk.f32.vlgmr.msra.gmra.mrb[56].mxu1 %vm367_vm1, %v9947_v32  ;;  %7747 = vmatprep.subr.msk.bf16.mxu1 %vm8929_vm2, %v7745_v48 }
 0xd7c   :  { %7252 = vmatprep.mubr.msk.f32.mxu1 %vm367_vm1, %v9939_v4  ;;  %7750 = vmatpush3.bf16.xpose.msk.msra.mxu1 %vm8929_vm2, %v7745_v48 }
 0xd7d   :  { %v7757_v47 = vpack.c.bf16 %v8139_v27, %v8138_v22 }
 0xd7e   :  { %v8142_v50 = vpop.permute.xlu0 %8141 }
 0xd7f   :  { %v8144_v54 = vunpack.i.h.bf16 %v8142_v50  ;;  %v8143_v3 = vunpack.i.l.bf16 %v8142_v50  ;;  %7253 = vmatmul.mubr.msk.f32.gmra.mrb[58].mxu1 %vm367_vm1, %v9961_v17  ;;  %7264 = vmatmul.mubr.msk.f32.vlgmr.msra.gmra.mrb[48].mxu0 %vm367_vm1, %v9954_v25 }
 0xd80   :  { %7759 = vmatprep.subr.msk.bf16.mxu0 %vm8929_vm2, %v7757_v47  ;;  %7266 = vmatprep.mubr.msk.f32.mxu0 %vm367_vm1, %v9949_v20 }
 0xd81   :  { %v7751_v4 = vpack.c.bf16 %v8144_v54, %v8143_v3  ;;  %7277 = vmatprep.mubr.msk.f32.mxu1 %vm367_vm1, %v9956_v23  ;;  %7762 = vmatpush3.bf16.xpose.msk.msra.mxu0 %vm8929_vm2, %v7757_v47  ;;  %v10188_v47 = vld [vmem:[%s10977_s1 + $0x8] sm:$0xff] }
 0xd82   :  { %v8147_v32 = vpop.permute.xlu1 %8146 }
 0xd83   :  { %v8149_v44 = vunpack.i.h.bf16 %v8147_v32  ;;  %v8148_v0 = vunpack.i.l.bf16 %v8147_v32  ;;  %7267 = vmatmul.mubr.msk.f32.gmra.mrb[50].mxu0 %vm367_vm1, %v9968_v30  ;;  %7753 = vmatprep.subr.msk.bf16.mxu1 %vm8929_vm2, %v7751_v4 }
 0xd84   :  { %7756 = vmatpush3.bf16.xpose.msk.msra.mxu1 %vm8929_vm2, %v7751_v4  ;;  %7291 = vmatprep.mubr.msk.f32.mxu0 %vm367_vm1, %v9963_v35 }
 0xd85   :  { %v7763_v20 = vpack.c.bf16 %v8149_v44, %v8148_v0  ;;  %v10208_v0 = vld [vmem:[%s10977_s1 + $0x18] sm:$0xff] }
 0xd86   :  { %v8152_v25 = vpop.permute.xlu0 %8151 }
 0xd87   :  { %v8154_v23 = vunpack.i.h.bf16 %v8152_v25  ;;  %v8153_v17 = vunpack.i.l.bf16 %v8152_v25  ;;  %7765 = vmatprep.subr.msk.bf16.mxu0 %vm8929_vm2, %v7763_v20 }
 0xd89   :  { %v7769_v46 = vpack.c.bf16 %v8154_v23, %v8153_v17  ;;  %7768 = vmatpush3.bf16.xpose.msk.msra.mxu0 %vm8929_vm2, %v7763_v20  ;;  %v10218_v17 = vld [vmem:[%s10977_s1 + $0x10] sm:$0xff] }
 0xd8a   :  { %v8157_v30 = vpop.permute.xlu1 %8156 }
 0xd8b   :  { %v8159_v21 = vunpack.i.h.bf16 %v8157_v30  ;;  %v8158_v39 = vunpack.i.l.bf16 %v8157_v30  ;;  %7278 = vmatmul.mubr.msk.f32.vlgmr.msra.gmra.mrb[60].mxu1 %vm367_vm1, %v9975_v58  ;;  %7771 = vmatprep.subr.msk.bf16.mxu1 %vm8929_vm2, %v7769_v46 }
 0xd8c   :  { %7280 = vmatprep.mubr.msk.f32.mxu1 %vm367_vm1, %v9970_v53  ;;  %7774 = vmatpush3.bf16.xpose.msk.msra.mxu1 %vm8929_vm2, %v7769_v46 }
 0xd8d   :  { %v7781_v35 = vpack.c.bf16 %v8159_v21, %v8158_v39 }
 0xd8e   :  { %v8162_v5 = vpop.permute.xlu0 %8161 }
 0xd8f   :  { %v8164_v40 = vunpack.i.h.bf16 %v8162_v5  ;;  %v8163_v7 = vunpack.i.l.bf16 %v8162_v5  ;;  %7281 = vmatmul.mubr.msk.f32.gmra.mrb[62].mxu1 %vm367_vm1, %v9989_v57  ;;  %7783 = vmatprep.subr.msk.bf16.mxu0 %vm8929_vm2, %v7781_v35 }
 0xd90   :  { %7292 = vmatmul.mubr.msk.f32.vlgmr.msra.gmra.mrb[52].mxu0 %vm367_vm1, %v9982_v55  ;;  %7305 = vmatprep.mubr.msk.f32.mxu1 %vm367_vm1, %v9984_v33 }
 0xd91   :  { %v7775_v53 = vpack.c.bf16 %v8164_v40, %v8163_v7  ;;  %7294 = vmatprep.mubr.msk.f32.mxu0 %vm367_vm1, %v9977_v18  ;;  %7786 = vmatpush3.bf16.xpose.msk.msra.mxu0 %vm8929_vm2, %v7781_v35 }
 0xd92   :  { %v8167_v58 = vpop.permute.xlu1 %8166  ;;  %v8182_v8 = vpop.permute.xlu0 %8181 }
 0xd93   :  { %v8169_v59 = vunpack.i.h.bf16 %v8167_v58  ;;  %v8168_v57 = vunpack.i.l.bf16 %v8167_v58  ;;  %7777 = vmatprep.subr.msk.bf16.mxu1 %vm8929_vm2, %v7775_v53  ;;  %v8183_v28 = vunpack.i.l.bf16 %v8182_v8 }
 0xd94   :  { %7295 = vmatmul.mubr.msk.f32.gmra.mrb[54].mxu0 %vm367_vm1, %v9996_v29  ;;  %7780 = vmatpush3.bf16.xpose.msk.msra.mxu1 %vm8929_vm2, %v7775_v53 }
 0xd95   :  { %v7787_v55 = vpack.c.bf16 %v8169_v59, %v8168_v57  ;;  %7319 = vmatprep.mubr.msk.f32.mxu0 %vm367_vm1, %v9991_v37  ;;  %v8184_v37 = vunpack.i.h.bf16 %v8182_v8 }
 0xd96   :  { %v8172_v18 = vpop.permute.xlu1 %8171  ;;  %v8187_v33 = vpop.permute.xlu0 %8186 }
 0xd97   :  { %v8174_v10 = vunpack.i.h.bf16 %v8172_v18  ;;  %v8173_v11 = vunpack.i.l.bf16 %v8172_v18  ;;  %v8189_v43 = vunpack.i.h.bf16 %v8187_v33  ;;  %v8188_v9 = vunpack.i.l.bf16 %v8187_v33  ;;  %7789 = vmatprep.subr.msk.bf16.mxu0 %vm8929_vm2, %v7787_v55 }
 0xd98   :  { %v10175_v48 = vpack.c.bf16 %v8184_v37, %v8183_v28 }
 0xd99   :  { %7792 = vmatpush3.bf16.xpose.msk.msra.mxu0 %vm8929_vm2, %v7787_v55  ;;  %v7793_v29 = vpack.c.bf16 %v8174_v10, %v8173_v11  ;;  %v7809_v41 = vpack.c.bf16 %v8189_v43, %v8188_v9 }
 0xd9a   :  { %v8177_v36 = vpop.permute.xlu1 %8176  ;;  %v10165_v16 = vpop.permute.xlu0 %8191 }
 0xd9b   :  { %v8179_v24 = vunpack.i.h.bf16 %v8177_v36  ;;  %v8178_v52 = vunpack.i.l.bf16 %v8177_v36  ;;  %7306 = vmatmul.mubr.msk.f32.vlgmr.msra.gmra.mrb[64].mxu1 %vm367_vm1, %v10003_v19  ;;  %7794 = vmatprep.subr.bf16.mxu1 %v7793_v29 }
 0xd9c   :  { %7810 = vmatprep.subr.bf16.mxu0 %v7809_v41  ;;  %7308 = vmatprep.mubr.msk.f32.mxu1 %vm367_vm1, %v9998_v62 }
 0xd9d   :  { %7796 = vmatpush3.bf16.msra.mxu1 %v7793_v29  ;;  %v7797_v26 = vpack.c.bf16 %v8179_v24, %v8178_v52 }
 0xd9e   :  { %v8197_v15 = vpop.permute.xlu0 %8196 }
 0xd9f   :  { %7309 = vmatmul.mubr.msk.f32.gmra.mrb[66].mxu1 %vm367_vm1, %v10021_v1  ;;  %7798 = vmatprep.subr.bf16.mxu1 %v7797_v26  ;;  %v8199_v19 = vunpack.i.h.bf16 %v8197_v15  ;;  %v8198_v31 = vunpack.i.l.bf16 %v8197_v15 }
 0xda0   :  { %7320 = vmatmul.mubr.msk.f32.vlgmr.msra.gmra.mrb[56].mxu0 %vm367_vm1, %v10013_v61 }
 0xda1   :  { %7322 = vmatprep.mubr.msk.f32.mxu0 %vm367_vm1, %v10005_v45  ;;  %7800 = vmatpush3.bf16.msra.mxu1 %v7797_v26  ;;  %v10182_v61 = vpack.c.bf16 %v8199_v19, %v8198_v31 }
 0xda2   :  { %7812 = vmatpush3.bf16.msra.mxu0 %v7809_v41  ;;  %7802 = vmatprep.subr.bf16.mxu1 %v10175_v48  ;;  %v8212_v62 = vpop.permute.xlu0 %8211 }
 0xda3   :  { %v8214_v27 = vunpack.i.h.bf16 %v8212_v62  ;;  %v8213_v22 = vunpack.i.l.bf16 %v8212_v62 }
 0xda4   :  { %7323 = vmatmul.mubr.msk.f32.gmra.mrb[58].mxu0 %vm367_vm1, %v10033_v51  ;;  %v10196_v51 = vld [vmem:[%s10977_s1] sm:$0xff]  ;;  %s11064_s1 = smov 4  }
 0xda5   :  { %v7813_v1 = vpack.c.bf16 %v8214_v27, %v8213_v22 }
 0xda7   :  { %7814 = vmatprep.subr.bf16.mxu0 %v7813_v1 }
 0xda8   :  { %7816 = vmatpush3.bf16.msra.mxu0 %v7813_v1 }
 0xda9   :  { %7826 = vmatprep.subr.bf16.mxu0 %v10182_v61 }
 0xdfd   :  { %v7223_v45 = vpop.f32.mrb[52].mxu1 }
 0xdfe   :  { %v10191_v50 = vadd.f32 %v10188_v47, %v7223_v45  ;;  %v3380_v54 = vpop.f32.mrb[53].mxu1 }
 0xdff   :  { %v10199_v3 = vadd.f32 %v10196_v51, %v3380_v54 }
 0xe00   :  { %v4165_v4 = vsel %vm83_vm0, %v10191_v50, -inf }
 0xe01   :  { %4166 = vmax.xlane.f32.xlu1 %v4165_v4  ;;  %v7226_v32 = vpop.f32.mrb[54].mxu1  ;;  %v4162_v44 = vsel %vm83_vm0, %v10199_v3, -inf }
 0xe02   :  { %v10211_v20 = vadd.f32 %v10208_v0, %v7226_v32  ;;  %v3390_v25 = vpop.f32.mrb[55].mxu1  ;;  %4163 = vmax.xlane.f32.xlu0 %v4162_v44 }
 0xe03   :  { %v10221_v46 = vadd.f32 %v10218_v17, %v3390_v25 }
 0xe04   :  { %v4171_v23 = vsel %vm83_vm0, %v10211_v20, -inf }
 0xe05   :  { %v4168_v30 = vsel %vm83_vm0, %v10221_v46, -inf }
 0xe06   :  { %4172 = vmax.xlane.f32.xlu0 %v4171_v23 }
 0xe0a   :  { %4169 = vmax.xlane.f32.xlu0 %v4168_v30 }
 0xe42   :  { %v7237_v21 = vpop.f32.mrb[44].mxu0 }
 0xe43   :  { %v10226_v39 = vadd.f32 %v10188_v47, %v7237_v21  ;;  %v3489_v35 = vpop.f32.mrb[45].mxu0 }
 0xe44   :  { %v10229_v5 = vadd.f32 %v10196_v51, %v3489_v35 }
 0xe45   :  { %v4177_v40 = vsel %vm83_vm0, %v10226_v39, -inf }
 0xe46   :  { %v7240_v7 = vpop.f32.mrb[46].mxu0  ;;  %4178 = vmax.xlane.f32.xlu0 %v4177_v40  ;;  %v4174_v53 = vsel %vm83_vm0, %v10229_v5, -inf }
 0xe47   :  { %v3499_v58 = vpop.f32.mrb[47].mxu0  ;;  %4175 = vmax.xlane.f32.xlu1 %v4174_v53  ;;  %v10242_v18 = vadd.f32 %v10208_v0, %v7240_v7 }
 0xe48   :  { %v10247_v10 = vadd.f32 %v10218_v17, %v3499_v58 }
 0xe49   :  { %v4183_v24 = vsel %vm83_vm0, %v10242_v18, -inf }
 0xe4a   :  { %v4180_v28 = vsel %vm83_vm0, %v10247_v10, -inf }
 0xe4e   :  { %v7251_v8 = vpop.f32.mrb[56].mxu1 }
 0xe4f   :  { %v10236_v59 = vadd.f32 %v10188_v47, %v7251_v8  ;;  %v3598_v57 = vpop.f32.mrb[57].mxu1 }
 0xe50   :  { %v10239_v55 = vadd.f32 %v10196_v51, %v3598_v57 }
 0xe51   :  { %v4189_v33 = vsel %vm83_vm0, %v10236_v59, -inf }
 0xe52   :  { %v7254_v11 = vpop.f32.mrb[58].mxu1  ;;  %v7265_v43 = vpop.f32.mrb[48].mxu0  ;;  %4190 = vmax.xlane.f32.xlu0 %v4189_v33  ;;  %v4186_v9 = vsel %vm83_vm0, %v10239_v55, -inf }
 0xe53   :  { %v3608_v29 = vpop.f32.mrb[59].mxu1  ;;  %v3707_v41 = vpop.f32.mrb[49].mxu0  ;;  %4187 = vmax.xlane.f32.xlu1 %v4186_v9  ;;  %v10252_v36 = vadd.f32 %v10208_v0, %v7254_v11  ;;  %v10262_v15 = vadd.f32 %v10188_v47, %v7265_v43 }
 0xe54   :  { %v10257_v52 = vadd.f32 %v10218_v17, %v3608_v29  ;;  %v10267_v19 = vadd.f32 %v10196_v51, %v3707_v41 }
 0xe55   :  { %v4195_v62 = vsel %vm83_vm0, %v10252_v36, -inf  ;;  %v4201_v27 = vsel %vm83_vm0, %v10262_v15, -inf }
 0xe56   :  { %v7268_v37 = vpop.f32.mrb[50].mxu0  ;;  %4184 = vmax.xlane.f32.xlu0 %v4183_v24  ;;  %v4192_v31 = vsel %vm83_vm0, %v10257_v52, -inf  ;;  %v4198_v1 = vsel %vm83_vm0, %v10267_v19, -inf }
 0xe57   :  { %v3717_v26 = vpop.f32.mrb[51].mxu0  ;;  %4181 = vmax.xlane.f32.xlu1 %v4180_v28  ;;  %v10282_v32 = vadd.f32 %v10208_v0, %v7268_v37 }
 0xe58   :  { %v10287_v25 = vadd.f32 %v10218_v17, %v3717_v26 }
 0xe59   :  { %v4207_v53 = vsel %vm83_vm0, %v10282_v32, -inf }
 0xe5a   :  { %4196 = vmax.xlane.f32.xlu0 %v4195_v62  ;;  %v4204_v8 = vsel %vm83_vm0, %v10287_v25, -inf }
 0xe5b   :  { %4193 = vmax.xlane.f32.xlu1 %v4192_v31 }
 0xe5e   :  { %v7279_v22 = vpop.f32.mrb[60].mxu1  ;;  %4202 = vmax.xlane.f32.xlu0 %v4201_v27 }
 0xe5f   :  { %v10276_v45 = vadd.f32 %v10188_v47, %v7279_v22  ;;  %v3816_v54 = vpop.f32.mrb[61].mxu1  ;;  %4199 = vmax.xlane.f32.xlu1 %v4198_v1 }
 0xe60   :  { %v10279_v4 = vadd.f32 %v10196_v51, %v3816_v54 }
 0xe61   :  { %v4213_v44 = vsel %vm83_vm0, %v10276_v45, -inf }
 0xe62   :  { %v7282_v23 = vpop.f32.mrb[62].mxu1  ;;  %4214 = vmax.xlane.f32.xlu0 %v4213_v44  ;;  %v4210_v30 = vsel %vm83_vm0, %v10279_v4, -inf }
 0xe63   :  { %v7293_v21 = vpop.f32.mrb[52].mxu0  ;;  %v3826_v35 = vpop.f32.mrb[63].mxu1  ;;  %4211 = vmax.xlane.f32.xlu1 %v4210_v30  ;;  %v10292_v7 = vadd.f32 %v10208_v0, %v7282_v23 }
 0xe64   :  { %v3925_v40 = vpop.f32.mrb[53].mxu0  ;;  %v10297_v58 = vadd.f32 %v10218_v17, %v3826_v35  ;;  %v10302_v11 = vadd.f32 %v10188_v47, %v7293_v21 }
 0xe65   :  { %v4219_v43 = vsel %vm83_vm0, %v10292_v7, -inf  ;;  %v10307_v9 = vadd.f32 %v10196_v51, %v3925_v40 }
 0xe66   :  { %4208 = vmax.xlane.f32.xlu0 %v4207_v53  ;;  %v4216_v29 = vsel %vm83_vm0, %v10297_v58, -inf  ;;  %v4225_v41 = vsel %vm83_vm0, %v10302_v11, -inf }
 0xe67   :  { %v7296_v57 = vpop.f32.mrb[54].mxu0  ;;  %4205 = vmax.xlane.f32.xlu1 %v4204_v8  ;;  %v4222_v37 = vsel %vm83_vm0, %v10307_v9, -inf }
 0xe68   :  { %v3935_v33 = vpop.f32.mrb[55].mxu0  ;;  %v10322_v31 = vadd.f32 %v10208_v0, %v7296_v57 }
 0xe69   :  { %v10327_v22 = vadd.f32 %v10218_v17, %v3935_v33 }
 0xe6a   :  { %4220 = vmax.xlane.f32.xlu0 %v4219_v43  ;;  %v4231_v35 = vsel %vm83_vm0, %v10322_v31, -inf }
 0xe6b   :  { %4217 = vmax.xlane.f32.xlu1 %v4216_v29  ;;  %v4228_v53 = vsel %vm83_vm0, %v10327_v22, -inf  ;;  %v10345_v29 = vpop.permute.xlu1 %8201 }
 0xe6e   :  { %v7307_v24 = vpop.f32.mrb[64].mxu1  ;;  %4226 = vmax.xlane.f32.xlu0 %v4225_v41 }
 0xe6f   :  { %v10316_v28 = vadd.f32 %v10188_v47, %v7307_v24  ;;  %v4034_v26 = vpop.f32.mrb[65].mxu1  ;;  %4223 = vmax.xlane.f32.xlu1 %v4222_v37  ;;  %v10347_v41 = vpop.permute.xlu1 %8206 }
 0xe70   :  { %v10319_v62 = vadd.f32 %v10196_v51, %v4034_v26  ;;  %v10349_v24 = vpop.permute.xlu0 %8221 }
 0xe71   :  { %v4237_v27 = vsel %vm83_vm0, %v10316_v28, -inf }
 0xe72   :  { %v7310_v1 = vpop.f32.mrb[66].mxu1  ;;  %4238 = vmax.xlane.f32.xlu0 %v4237_v27  ;;  %v4234_v54 = vsel %vm83_vm0, %v10319_v62, -inf }
 0xe73   :  { %v7321_v44 = vpop.f32.mrb[56].mxu0  ;;  %v4044_v23 = vpop.f32.mrb[67].mxu1  ;;  %4235 = vmax.xlane.f32.xlu1 %v4234_v54  ;;  %v10332_v21 = vadd.f32 %v10208_v0, %v7310_v1 }
 0xe74   :  { %v4143_v30 = vpop.f32.mrb[57].mxu0  ;;  %v10337_v40 = vadd.f32 %v10218_v17, %v4044_v23  ;;  %v10351_v37 = vpop.permute.xlu1 %8216 }
 0xe75   :  { %v4243_v33 = vsel %vm83_vm0, %v10332_v21, -inf  ;;  %v10353_v26 = vpop.permute.xlu0 %8226 }
 0xe76   :  { %4232 = vmax.xlane.f32.xlu0 %v4231_v35  ;;  %v4240_v43 = vsel %vm83_vm0, %v10337_v40, -inf }
 0xe77   :  { %v7324_v8 = vpop.f32.mrb[58].mxu0  ;;  %4229 = vmax.xlane.f32.xlu1 %v4228_v53 }
 0xe78   :  { %v4153_v57 = vpop.f32.mrb[59].mxu0 }
 0xe7a   :  { %4244 = vmax.xlane.f32.xlu0 %v4243_v33 }
 0xe7b   :  { %4241 = vmax.xlane.f32.xlu1 %v4240_v43 }
 0xe8e   :  { %v4167_v27 = vpop.xlane.xlu1 %4166 }
 0xe8f   :  { %v4259_v1 = vsub.f32 %v10191_v50, %v4167_v27  ;;  %v4164_v54 = vpop.xlane.xlu0 %4163 }
 0xe90   :  { %v4258_v23 = vsub.f32 %v10199_v3, %v4164_v54 }
 0xe91   :  { %v4292_v35 = vmul.f32 1.442695, %v4259_v1 }
 0xe92   :  { %v4290_v53 = vmul.f32 1.442695, %v4258_v23 }
 0xe93   :  { %8394 = vpow2.f32 %v4292_v35  ;;  %v4173_v33 = vpop.xlane.xlu0 %4172 }
 0xe94   :  { %8396 = vpow2.f32 %v4290_v53  ;;  %v4261_v43 = vsub.f32 %v10211_v20, %v4173_v33 }
 0xe96   :  { %v4296_v13 = vmul.f32 1.442695, %v4261_v43 }
 0xe97   :  { %v4170_v49 = vpop.xlane.xlu0 %4169 }
 0xe98   :  { %8398 = vpow2.f32 %v4296_v13  ;;  %v4260_v60 = vsub.f32 %v10221_v46, %v4170_v49  ;;  %v10370_v13 = vadd.f32 %v10188_v47, %v7321_v44  ;;  %v10377_v49 = vadd.f32 %v10196_v51, %v4143_v30 }
 0xe99   :  { %v10380_v46 = vadd.f32 %v10208_v0, %v7324_v8  ;;  %v10387_v47 = vadd.f32 %v10218_v17, %v4153_v57 }
 0xe9a   :  { %v4294_v56 = vmul.f32 1.442695, %v4260_v60  ;;  %v4249_v1 = vsel %vm83_vm0, %v10370_v13, -inf  ;;  %v4246_v51 = vsel %vm83_vm0, %v10377_v49, -inf }
 0xe9b   :  { %v4255_v44 = vsel %vm83_vm0, %v10380_v46, -inf  ;;  %v4252_v0 = vsel %vm83_vm0, %v10387_v47, -inf }
 0xe9c   :  { %8400 = vpow2.f32 %v4294_v56 }
 0xe9d   :  { %v10359_v14 = vpop.eup %8394 }
 0xe9e   :  { %v10361_v50 = vpop.eup %8396  ;;  %v4357_v3 = vsel %vm83_vm0, %v10359_v14, 0.0 }
 0xe9f   :  { %4358 = vadd.xlane.f32.xlu0 %v4357_v3  ;;  %v4354_v27 = vsel %vm83_vm0, %v10361_v50, 0.0 }
 0xea0   :  { %4355 = vadd.xlane.f32.xlu1 %v4354_v27 }
 0xea2   :  { %v10367_v20 = vpop.eup %8398 }
 0xea3   :  { %v4363_v60 = vsel %vm83_vm0, %v10367_v20, 0.0 }
 0xea4   :  { %4364 = vadd.xlane.f32.xlu0 %v4363_v60 }
 0xea6   :  { %v10374_v56 = vpop.eup %8400 }
 0xea7   :  { %v4360_v54 = vsel %vm83_vm0, %v10374_v56, 0.0 }
 0xea8   :  { %4250 = vmax.xlane.f32.xlu0 %v4249_v1  ;;  %4361 = vadd.xlane.f32.xlu1 %v4360_v54 }
 0xeac   :  { %4256 = vmax.xlane.f32.xlu0 %v4255_v44  ;;  %4247 = vmax.xlane.f32.xlu1 %v4246_v51 }
 0xeb0   :  { %4253 = vmax.xlane.f32.xlu1 %v4252_v0 }
 0xec1   :  { %8231 = vrot.lane.b32.xlu1 %v10009_v12, %s11062_s0 }
 0xec2   :  { %8236 = vrot.lane.b32.xlu0 %v10017_v38, %s11062_s0 }
 0xed3   :  { %v4179_v17 = vpop.xlane.xlu0 %4178 }
 0xed4   :  { %v4263_v30 = vsub.f32 %v10226_v39, %v4179_v17  ;;  %v4176_v8 = vpop.xlane.xlu1 %4175 }
 0xed5   :  { %v4262_v57 = vsub.f32 %v10229_v5, %v4176_v8 }
 0xed6   :  { %v4300_v23 = vmul.f32 1.442695, %v4263_v30 }
 0xed7   :  { %v4298_v35 = vmul.f32 1.442695, %v4262_v57 }
 0xed8   :  { %8402 = vpow2.f32 %v4300_v23 }
 0xed9   :  { %8404 = vpow2.f32 %v4298_v35 }
 0xedf   :  { %v4191_v53 = vpop.xlane.xlu0 %4190 }
 0xee0   :  { %v4267_v33 = vsub.f32 %v10236_v59, %v4191_v53  ;;  %v4188_v43 = vpop.xlane.xlu1 %4187 }
 0xee1   :  { %v4266_v3 = vsub.f32 %v10239_v55, %v4188_v43 }
 0xee2   :  { %v10403_v12 = vpop.eup %8402  ;;  %v4308_v27 = vmul.f32 1.442695, %v4267_v33 }
 0xee3   :  { %v10405_v38 = vpop.eup %8404  ;;  %v4306_v60 = vmul.f32 1.442695, %v4266_v3  ;;  %v4185_v39 = vpop.xlane.xlu0 %4184  ;;  %v4369_v5 = vsel %vm83_vm0, %v10403_v12, 0.0 }
 0xee4   :  { %8406 = vpow2.f32 %v4308_v27  ;;  %v4265_v1 = vsub.f32 %v10242_v18, %v4185_v39  ;;  %v4182_v54 = vpop.xlane.xlu1 %4181  ;;  %4370 = vadd.xlane.f32.xlu0 %v4369_v5  ;;  %v4366_v59 = vsel %vm83_vm0, %v10405_v38, 0.0 }
 0xee5   :  { %8408 = vpow2.f32 %v4306_v60  ;;  %v4264_v55 = vsub.f32 %v10247_v10, %v4182_v54  ;;  %4367 = vadd.xlane.f32.xlu1 %v4366_v59 }
 0xee6   :  { %v4304_v44 = vmul.f32 1.442695, %v4265_v1 }
 0xee7   :  { %v4302_v51 = vmul.f32 1.442695, %v4264_v55  ;;  %v4197_v0 = vpop.xlane.xlu0 %4196 }
 0xee8   :  { %8410 = vpow2.f32 %v4304_v44  ;;  %v4269_v17 = vsub.f32 %v10252_v36, %v4197_v0  ;;  %v4194_v30 = vpop.xlane.xlu1 %4193 }
 0xee9   :  { %8412 = vpow2.f32 %v4302_v51  ;;  %v4268_v8 = vsub.f32 %v10257_v52, %v4194_v30 }
 0xeea   :  { %v4312_v18 = vmul.f32 1.442695, %v4269_v17 }
 0xeeb   :  { %v4310_v57 = vmul.f32 1.442695, %v4268_v8  ;;  %v4203_v23 = vpop.xlane.xlu0 %4202 }
 0xeec   :  { %8414 = vpow2.f32 %v4312_v18  ;;  %v4271_v35 = vsub.f32 %v10262_v15, %v4203_v23  ;;  %v4200_v53 = vpop.xlane.xlu1 %4199 }
 0xeed   :  { %v4270_v10 = vsub.f32 %v10267_v19, %v4200_v53  ;;  %8416 = vpow2.f32 %v4310_v57 }
 0xeee   :  { %v10417_v33 = vpop.eup %8406  ;;  %v4316_v43 = vmul.f32 1.442695, %v4271_v35 }
 0xeef   :  { %v10419_v3 = vpop.eup %8408  ;;  %v4215_v36 = vpop.xlane.xlu0 %4214  ;;  %v4381_v27 = vsel %vm83_vm0, %v10417_v33, 0.0  ;;  %v4314_v39 = vmul.f32 1.442695, %v4270_v10 }
 0xef0   :  { %v4275_v52 = vsub.f32 %v10276_v45, %v4215_v36  ;;  %v4212_v60 = vpop.xlane.xlu1 %4211  ;;  %4382 = vadd.xlane.f32.xlu0 %v4381_v27  ;;  %v4378_v15 = vsel %vm83_vm0, %v10419_v3, 0.0  ;;  %8418 = vpow2.f32 %v4316_v43 }
 0xef1   :  { %v4274_v19 = vsub.f32 %v10279_v4, %v4212_v60  ;;  %4379 = vadd.xlane.f32.xlu1 %v4378_v15 }
 0xef2   :  { %v10427_v5 = vpop.eup %8410  ;;  %v4324_v1 = vmul.f32 1.442695, %v4275_v52 }
 0xef3   :  { %v10429_v54 = vpop.eup %8412  ;;  %v4322_v59 = vmul.f32 1.442695, %v4274_v19  ;;  %v4209_v55 = vpop.xlane.xlu0 %4208  ;;  %v4375_v45 = vsel %vm83_vm0, %v10427_v5, 0.0 }
 0xef4   :  { %8420 = vpow2.f32 %v4324_v1  ;;  %v4273_v44 = vsub.f32 %v10282_v32, %v4209_v55  ;;  %v4206_v51 = vpop.xlane.xlu1 %4205  ;;  %4376 = vadd.xlane.f32.xlu0 %v4375_v45  ;;  %v4372_v4 = vsel %vm83_vm0, %v10429_v54, 0.0 }
 0xef5   :  { %8422 = vpow2.f32 %v4314_v39  ;;  %4373 = vadd.xlane.f32.xlu1 %v4372_v4  ;;  %v4272_v30 = vsub.f32 %v10287_v25, %v4206_v51 }
 0xef6   :  { %v10436_v0 = vpop.eup %8414  ;;  %8424 = vpow2.f32 %v4322_v59  ;;  %v4320_v17 = vmul.f32 1.442695, %v4273_v44 }
 0xef7   :  { %v4221_v8 = vpop.xlane.xlu0 %4220  ;;  %v4387_v18 = vsel %vm83_vm0, %v10436_v0, 0.0  ;;  %v10441_v57 = vpop.eup %8416  ;;  %v4318_v35 = vmul.f32 1.442695, %v4272_v30 }
 0xef8   :  { %v4277_v32 = vsub.f32 %v10292_v7, %v4221_v8  ;;  %v4218_v23 = vpop.xlane.xlu1 %4217  ;;  %4388 = vadd.xlane.f32.xlu0 %v4387_v18  ;;  %8426 = vpow2.f32 %v4320_v17  ;;  %v4384_v36 = vsel %vm83_vm0, %v10441_v57, 0.0 }
 0xef9   :  { %v4276_v10 = vsub.f32 %v10297_v58, %v4218_v23 }
 0xefa   :  { %v4328_v53 = vmul.f32 1.442695, %v4277_v32  ;;  %v10447_v25 = vpop.eup %8418 }
 0xefb   :  { %v4227_v43 = vpop.xlane.xlu0 %4226  ;;  %v4326_v7 = vmul.f32 1.442695, %v4276_v10  ;;  %v4393_v58 = vsel %vm83_vm0, %v10447_v25, 0.0 }
 0xefc   :  { %8428 = vpow2.f32 %v4328_v53  ;;  %v4224_v27 = vpop.xlane.xlu1 %4223  ;;  %4385 = vadd.xlane.f32.xlu0 %v4384_v36  ;;  %v4279_v60 = vsub.f32 %v10302_v11, %v4227_v43 }
 0xefd   :  { %8430 = vpow2.f32 %v4318_v35  ;;  %v4278_v11 = vsub.f32 %v10307_v9, %v4224_v27 }
 0xefe   :  { %v10449_v52 = vpop.eup %8420  ;;  %8432 = vpow2.f32 %v4326_v7  ;;  %v4332_v45 = vmul.f32 1.442695, %v4279_v60 }
 0xeff   :  { %v10452_v15 = vpop.eup %8422  ;;  %v4239_v39 = vpop.xlane.xlu0 %4238  ;;  %v4405_v19 = vsel %vm83_vm0, %v10449_v52, 0.0  ;;  %v4330_v9 = vmul.f32 1.442695, %v4278_v11 }
 0xf00   :  { %v10458_v1 = vpop.eup %8424  ;;  %v4283_v59 = vsub.f32 %v10316_v28, %v4239_v39  ;;  %v4236_v55 = vpop.xlane.xlu1 %4235  ;;  %4394 = vadd.xlane.f32.xlu0 %v4393_v58  ;;  %4406 = vadd.xlane.f32.xlu1 %v4405_v19  ;;  %v4390_v17 = vsel %vm83_vm0, %v10452_v15, 0.0 }
 0xf01   :  { %v4402_v4 = vsel %vm83_vm0, %v10458_v1, 0.0  ;;  %v4282_v18 = vsub.f32 %v10319_v62, %v4236_v55 }
 0xf02   :  { %v4340_v44 = vmul.f32 1.442695, %v4283_v59  ;;  %v10466_v30 = vpop.eup %8426 }
 0xf03   :  { %v4233_v51 = vpop.xlane.xlu0 %4232  ;;  %v4399_v10 = vsel %vm83_vm0, %v10466_v30, 0.0  ;;  %v4338_v27 = vmul.f32 1.442695, %v4282_v18 }
 0xf04   :  { %8434 = vpow2.f32 %v4340_v44  ;;  %v4281_v28 = vsub.f32 %v10322_v31, %v4233_v51  ;;  %v4230_v8 = vpop.xlane.xlu1 %4229  ;;  %4403 = vadd.xlane.f32.xlu0 %v4402_v4  ;;  %4391 = vadd.xlane.f32.xlu1 %v4390_v17 }
 0xf05   :  { %8436 = vpow2.f32 %v4332_v45  ;;  %v4280_v35 = vsub.f32 %v10327_v22, %v4230_v8 }
 0xf06   :  { %v10470_v32 = vpop.eup %8428  ;;  %v4336_v23 = vmul.f32 1.442695, %v4281_v28 }
 0xf07   :  { %v4245_v53 = vpop.xlane.xlu0 %4244  ;;  %v4411_v43 = vsel %vm83_vm0, %v10470_v32, 0.0  ;;  %v10477_v31 = vpop.eup %8430  ;;  %v4334_v7 = vmul.f32 1.442695, %v4280_v35 }
 0xf08   :  { %8438 = vpow2.f32 %v4336_v23  ;;  %v4285_v36 = vsub.f32 %v10332_v21, %v4245_v53  ;;  %v4242_v62 = vpop.xlane.xlu1 %4241  ;;  %4400 = vadd.xlane.f32.xlu0 %v4399_v10  ;;  %4412 = vadd.xlane.f32.xlu1 %v4411_v43  ;;  %v4396_v39 = vsel %vm83_vm0, %v10477_v31, 0.0  ;;  %v10483_v58 = vpop.eup %8432 }
 0xf09   :  { %8440 = vpow2.f32 %v4330_v9  ;;  %v4284_v22 = vsub.f32 %v10337_v40, %v4242_v62  ;;  %v4408_v59 = vsel %vm83_vm0, %v10483_v58, 0.0 }
 0xf0a   :  { %v4344_v60 = vmul.f32 1.442695, %v4285_v36 }
 0xf0b   :  { %v4342_v21 = vmul.f32 1.442695, %v4284_v22 }
 0xf0c   :  { %8442 = vpow2.f32 %v4344_v60  ;;  %4397 = vadd.xlane.f32.xlu0 %v4396_v39  ;;  %v8209_v39 = vunpack.i.h.bf16 %v10347_v41 }
 0xf0d   :  { %8444 = vpow2.f32 %v4338_v27 }
 0xf0e   :  { %v10485_v19 = vpop.eup %8434  ;;  %8446 = vpow2.f32 %v4334_v7 }
 0xf0f   :  { %v4429_v55 = vsel %vm83_vm0, %v10485_v19, 0.0  ;;  %v10491_v45 = vpop.eup %8436  ;;  %8448 = vpow2.f32 %v4342_v21  ;;  %v8208_v21 = vunpack.i.l.bf16 %v10347_v41 }
 0xf10   :  { %4409 = vadd.xlane.f32.xlu0 %v4408_v59  ;;  %4430 = vadd.xlane.f32.xlu1 %v4429_v55  ;;  %v4417_v11 = vsel %vm83_vm0, %v10491_v45, 0.0 }
 0xf12   :  { %v10493_v40 = vpop.eup %8438 }
 0xf13   :  { %v4423_v44 = vsel %vm83_vm0, %v10493_v40, 0.0  ;;  %v10499_v51 = vpop.eup %8440 }
 0xf14   :  { %4418 = vadd.xlane.f32.xlu0 %v4417_v11  ;;  %4424 = vadd.xlane.f32.xlu1 %v4423_v44  ;;  %v4414_v28 = vsel %vm83_vm0, %v10499_v51, 0.0 }
 0xf16   :  { %v10501_v4 = vpop.eup %8442 }
 0xf17   :  { %v10503_v17 = vpop.eup %8444  ;;  %v4435_v8 = vsel %vm83_vm0, %v10501_v4, 0.0 }
 0xf18   :  { %v10509_v18 = vpop.eup %8446  ;;  %4415 = vadd.xlane.f32.xlu0 %v4414_v28  ;;  %4436 = vadd.xlane.f32.xlu1 %v4435_v8  ;;  %v4426_v9 = vsel %vm83_vm0, %v10503_v17, 0.0 }
 0xf19   :  { %v4420_v23 = vsel %vm83_vm0, %v10509_v18, 0.0  ;;  %v10515_v35 = vpop.eup %8448 }
 0xf1a   :  { %v4432_v53 = vsel %vm83_vm0, %v10515_v35, 0.0 }
 0xf1c   :  { %4427 = vadd.xlane.f32.xlu0 %v4426_v9  ;;  %4421 = vadd.xlane.f32.xlu1 %v4420_v23  ;;  %v8193_v9 = vunpack.i.l.bf16 %v10165_v16 }
 0xf20   :  { %4433 = vadd.xlane.f32.xlu0 %v4432_v53  ;;  %v7805_v53 = vpack.c.bf16 %v8209_v39, %v8208_v21 }
 0xf2c   :  { %v4359_v10 = vpop.xlane.xlu0 %4358 }
 0xf2d   :  { %8450 = vrcp.f32 %v4359_v10  ;;  %v4356_v43 = vpop.xlane.xlu1 %4355  ;;  %8241 = vrot.lane.b32.xlu1 %v10025_v42, %s11062_s0 }
 0xf2e   :  { %8452 = vrcp.f32 %v4356_v43 }
 0xf31   :  { %v4365_v36 = vpop.xlane.xlu0 %4364 }
 0xf32   :  { %8454 = vrcp.f32 %v4365_v36 }
 0xf35   :  { %v4362_v62 = vpop.xlane.xlu1 %4361  ;;  %v4251_v27 = vpop.xlane.xlu0 %4250 }
 0xf36   :  { %8456 = vrcp.f32 %v4362_v62  ;;  %v4287_v7 = vsub.f32 %v10370_v13, %v4251_v27  ;;  %v8194_v13 = vunpack.i.h.bf16 %v10165_v16 }
 0xf37   :  { %v8451_v60 = vpop.eup %8450 }
 0xf38   :  { %v8453_v22 = vpop.eup %8452  ;;  %v4348_v59 = vmul.f32 1.442695, %v4287_v7  ;;  %v4483_v42 = vmul.f32 %v8451_v60, %v10359_v14  ;;  %v7817_v43 = vpack.c.bf16 %v8194_v13, %v8193_v9  ;;  %v8204_v9 = vunpack.i.h.bf16 %v10345_v29 }
 0xf39   :  { %v4248_v55 = vpop.xlane.xlu1 %4247  ;;  %v4257_v11 = vpop.xlane.xlu0 %4256  ;;  %v4482_v44 = vmul.f32 %v8453_v22, %v10361_v50 }
 0xf3a   :  { %8458 = vpow2.f32 %v4348_v59  ;;  %v4286_v28 = vsub.f32 %v10377_v49, %v4248_v55  ;;  %v4289_v8 = vsub.f32 %v10380_v46, %v4257_v11 }
 0xf3b   :  { %7333 = vmatprep.mubr.msk.f32.mxu1 %vm83_vm0, %v4482_v44  ;;  %v8219_v44 = vunpack.i.h.bf16 %v10351_v37 }
 0xf3c   :  { %v4346_v23 = vmul.f32 1.442695, %v4286_v28  ;;  %v4352_v41 = vmul.f32 1.442695, %v4289_v8  ;;  %7334 = vmatmul.mubr.msk.f32.vlgmr.msra.gmra.mrb[68].mxu1 %vm83_vm0, %v4483_v42  ;;  %v8455_v49 = vpop.eup %8454  ;;  %v8218_v42 = vunpack.i.l.bf16 %v10351_v37 }
 0xf3d   :  { %7804 = vmatpush3.bf16.msra.mxu1 %v10175_v48  ;;  %v4254_v50 = vpop.xlane.xlu1 %4253  ;;  %v4485_v36 = vmul.f32 %v8455_v49, %v10367_v20  ;;  %v10556_v22 = vpop.permute.xlu0 %8236  ;;  %v8224_v49 = vunpack.i.h.bf16 %v10349_v24 }
 0xf3e   :  { %8460 = vpow2.f32 %v4346_v23  ;;  %v4288_v14 = vsub.f32 %v10387_v47, %v4254_v50  ;;  %7806 = vmatprep.subr.bf16.mxu1 %v7805_v53  ;;  %v8203_v23 = vunpack.i.l.bf16 %v10345_v29  ;;  %v8223_v29 = vunpack.i.l.bf16 %v10349_v24 }
 0xf3f   :  { %8462 = vpow2.f32 %v4352_v41 }
 0xf40   :  { %v8457_v46 = vpop.eup %8456  ;;  %v4350_v10 = vmul.f32 1.442695, %v4288_v14 }
 0xf41   :  { %7808 = vmatpush3.bf16.msra.mxu1 %v7805_v53  ;;  %v4484_v16 = vmul.f32 %v8457_v46, %v10374_v56  ;;  %v8232_v39 = vpop.permute.xlu1 %8231  ;;  %v7821_v53 = vpack.c.bf16 %v8219_v44, %v8218_v42 }
 0xf42   :  { %7818 = vmatprep.subr.bf16.mxu1 %v7817_v43  ;;  %8464 = vpow2.f32 %v4350_v10 }
 0xf43   :  { %7336 = vmatprep.mubr.msk.f32.mxu1 %vm83_vm0, %v4484_v16 }
 0xf44   :  { %v10537_v62 = vpop.eup %8458  ;;  %7337 = vmatmul.mubr.msk.f32.gmra.mrb[70].mxu1 %vm83_vm0, %v4485_v36 }
 0xf45   :  { %v4441_v48 = vsel %vm83_vm0, %v10537_v62, 0.0 }
 0xf46   :  { %4442 = vadd.xlane.f32.xlu0 %v4441_v48  ;;  %v8234_v48 = vunpack.i.h.bf16 %v8232_v39 }
 0xf48   :  { %v10542_v47 = vpop.eup %8460 }
 0xf49   :  { %v4438_v27 = vsel %vm83_vm0, %v10542_v47, 0.0  ;;  %v10546_v56 = vpop.eup %8462 }
 0xf4a   :  { %4439 = vadd.xlane.f32.xlu0 %v4438_v27  ;;  %v4447_v20 = vsel %vm83_vm0, %v10546_v56, 0.0  ;;  %v8233_v27 = vunpack.i.l.bf16 %v8232_v39 }
 0xf4c   :  { %v10550_v7 = vpop.eup %8464 }
 0xf4d   :  { %v4444_v60 = vsel %vm83_vm0, %v10550_v7, 0.0 }
 0xf4e   :  { %4448 = vadd.xlane.f32.xlu0 %v4447_v20 }
 0xf52   :  { %4445 = vadd.xlane.f32.xlu0 %v4444_v60 }
 0xf68   :  { %8246 = vrot.lane.b32.xlu0 %v10037_v34, %s11062_s0 }
 0xf71   :  { %v4371_v21 = vpop.xlane.xlu0 %4370 }
 0xf72   :  { %8466 = vrcp.f32 %v4371_v21  ;;  %v4368_v59 = vpop.xlane.xlu1 %4367  ;;  %v7829_v21 = vpack.c.bf16 %v8224_v49, %v8223_v29 }
 0xf73   :  { %8468 = vrcp.f32 %v4368_v59 }
 0xf7c   :  { %v8467_v55 = vpop.eup %8466 }
 0xf7d   :  { %v8469_v11 = vpop.eup %8468  ;;  %v4383_v28 = vpop.xlane.xlu0 %4382  ;;  %v4487_v34 = vmul.f32 %v8467_v55, %v10403_v12 }
 0xf7e   :  { %8470 = vrcp.f32 %v4383_v28  ;;  %v4380_v8 = vpop.xlane.xlu1 %4379  ;;  %v4486_v13 = vmul.f32 %v8469_v11, %v10405_v38  ;;  %v10566_v38 = vpack.c.bf16 %v8204_v9, %v8203_v23  ;;  %v8228_v9 = vunpack.i.l.bf16 %v10353_v26 }
 0xf7f   :  { %8472 = vrcp.f32 %v4380_v8 }
 0xf80   :  { %7347 = vmatprep.mubr.msk.f32.mxu1 %vm83_vm0, %v4486_v13 }
 0xf81   :  { %7348 = vmatmul.mubr.msk.f32.vlgmr.msra.gmra.mrb[72].mxu1 %vm83_vm0, %v4487_v34  ;;  %v4377_v41 = vpop.xlane.xlu0 %4376  ;;  %v8229_v34 = vunpack.i.h.bf16 %v10353_v26 }
 0xf82   :  { %7820 = vmatpush3.bf16.msra.mxu1 %v7817_v43  ;;  %8474 = vrcp.f32 %v4377_v41  ;;  %v4374_v37 = vpop.xlane.xlu1 %4373 }
 0xf83   :  { %8476 = vrcp.f32 %v4374_v37  ;;  %7822 = vmatprep.subr.bf16.mxu1 %v7821_v53  ;;  %v7837_v26 = vpack.c.bf16 %v8229_v34, %v8228_v9 }
 0xf85   :  { %v4389_v50 = vpop.xlane.xlu0 %4388 }
 0xf86   :  { %7824 = vmatpush3.bf16.msra.mxu1 %v7821_v53  ;;  %8478 = vrcp.f32 %v4389_v50 }
 0xf87   :  { %7834 = vmatprep.subr.bf16.mxu1 %v10566_v38 }
 0xf88   :  { %v8471_v12 = vpop.eup %8470 }
 0xf89   :  { %v8473_v14 = vpop.eup %8472  ;;  %v4386_v46 = vpop.xlane.xlu0 %4385  ;;  %v4491_v43 = vmul.f32 %v8471_v12, %v10417_v33  ;;  %v7841_v33 = vpack.c.bf16 %v8234_v48, %v8233_v27  ;;  %v8239_v12 = vunpack.i.h.bf16 %v10556_v22 }
 0xf8a   :  { %8480 = vrcp.f32 %v4386_v46  ;;  %v4490_v10 = vmul.f32 %v8473_v14, %v10419_v3  ;;  %v8238_v14 = vunpack.i.l.bf16 %v10556_v22 }
 0xf8c   :  { %v8475_v16 = vpop.eup %8474  ;;  %7361 = vmatprep.mubr.msk.f32.mxu0 %vm83_vm0, %v4490_v10  ;;  %v7849_v49 = vpack.c.bf16 %v8239_v12, %v8238_v14 }
 0xf8d   :  { %v8477_v36 = vpop.eup %8476  ;;  %v4407_v20 = vpop.xlane.xlu1 %4406  ;;  %7362 = vmatmul.mubr.msk.f32.vlgmr.msra.gmra.mrb[60].mxu0 %vm83_vm0, %v4491_v43  ;;  %v4489_v3 = vmul.f32 %v8475_v16, %v10427_v5 }
 0xf8e   :  { %v4395_v60 = vpop.xlane.xlu0 %4394  ;;  %7828 = vmatpush3.bf16.msra.mxu0 %v10182_v61  ;;  %v4488_v24 = vmul.f32 %v8477_v36, %v10429_v54  ;;  %8482 = vrcp.f32 %v4407_v20 }
 0xf8f   :  { %7830 = vmatprep.subr.bf16.mxu0 %v7829_v21  ;;  %8484 = vrcp.f32 %v4395_v60 }
 0xf90   :  { %7350 = vmatprep.mubr.msk.f32.mxu1 %vm83_vm0, %v4488_v24  ;;  %v8479_v55 = vpop.eup %8478 }
 0xf91   :  { %v4392_v59 = vpop.xlane.xlu1 %4391  ;;  %7351 = vmatmul.mubr.msk.f32.gmra.mrb[74].mxu1 %vm83_vm0, %v4489_v3  ;;  %v4493_v5 = vmul.f32 %v8479_v55, %v10436_v0 }
 0xf92   :  { %v4404_v39 = vpop.xlane.xlu0 %4403  ;;  %8486 = vrcp.f32 %v4392_v59  ;;  %7832 = vmatpush3.bf16.msra.mxu0 %v7829_v21 }
 0xf93   :  { %8488 = vrcp.f32 %v4404_v39  ;;  %7842 = vmatprep.subr.bf16.mxu0 %v7841_v33 }
 0xf94   :  { %v8481_v61 = vpop.eup %8480 }
 0xf95   :  { %v4492_v54 = vmul.f32 %v8481_v61, %v10441_v57  ;;  %v4413_v44 = vpop.xlane.xlu1 %4412 }
 0xf96   :  { %v4401_v11 = vpop.xlane.xlu0 %4400 }
 0xf97   :  { %7364 = vmatprep.mubr.msk.f32.mxu0 %vm83_vm0, %v4492_v54  ;;  %8490 = vrcp.f32 %v4401_v11 }
 0xf98   :  { %7365 = vmatmul.mubr.msk.f32.gmra.mrb[62].mxu0 %vm83_vm0, %v4493_v5  ;;  %v8483_v28 = vpop.eup %8482 }
 0xf99   :  { %v8485_v8 = vpop.eup %8484  ;;  %v4499_v50 = vmul.f32 %v8483_v28, %v10449_v52 }
 0xf9a   :  { %v4398_v42 = vpop.xlane.xlu0 %4397  ;;  %v4495_v53 = vmul.f32 %v8485_v8, %v10447_v25 }
 0xf9b   :  { %8492 = vrcp.f32 %v4398_v42 }
 0xf9c   :  { %v8487_v13 = vpop.eup %8486  ;;  %8494 = vrcp.f32 %v4413_v44 }
 0xf9d   :  { %v8489_v23 = vpop.eup %8488  ;;  %v4431_v41 = vpop.xlane.xlu1 %4430  ;;  %v4494_v0 = vmul.f32 %v8487_v13, %v10452_v15 }
 0xf9e   :  { %v4410_v57 = vpop.xlane.xlu0 %4409  ;;  %v4498_v37 = vmul.f32 %v8489_v23, %v10458_v1 }
 0xf9f   :  { %8496 = vrcp.f32 %v4410_v57  ;;  %7375 = vmatprep.mubr.msk.f32.mxu1 %vm83_vm0, %v4494_v0 }
 0xfa0   :  { %7389 = vmatprep.mubr.msk.f32.mxu0 %vm83_vm0, %v4498_v37  ;;  %7376 = vmatmul.mubr.msk.f32.vlgmr.msra.gmra.mrb[76].mxu1 %vm83_vm0, %v4495_v53  ;;  %v11063_v53 = vmov 0.0  }
 0xfa1   :  { %7390 = vmatmul.mubr.msk.f32.vlgmr.msra.gmra.mrb[64].mxu0 %vm83_vm0, %v4499_v50  ;;  %7836 = vmatpush3.bf16.msra.mxu1 %v10566_v38  ;;  %v4425_v25 = vpop.xlane.xlu1 %4424  ;;  %v8491_v52 = vpop.eup %8490 }
 0xfa2   :  { %v4419_v15 = vpop.xlane.xlu0 %4418  ;;  %7844 = vmatpush3.bf16.msra.mxu0 %v7841_v33  ;;  %7838 = vmatprep.subr.bf16.mxu1 %v7837_v26  ;;  %v4497_v10 = vmul.f32 %v8491_v52, %v10466_v30 }
 0xfa3   :  { %8498 = vrcp.f32 %v4419_v15 }
 0xfa5   :  { %v8493_v1 = vpop.eup %8492  ;;  %7840 = vmatpush3.bf16.msra.mxu1 %v7837_v26  ;;  %v4437_v29 = vpop.xlane.xlu1 %4436 }
 0xfa6   :  { %v4416_v46 = vpop.xlane.xlu0 %4415  ;;  %v4496_v22 = vmul.f32 %v8493_v1, %v10477_v31  ;;  %7850 = vmatprep.subr.bf16.mxu1 %v7849_v49  ;;  %v8495_v38 = vpop.eup %8494 }
 0xfa7   :  { %8500 = vrcp.f32 %v4416_v46  ;;  %v4501_v31 = vmul.f32 %v8495_v38, %v10470_v32 }
 0xfa8   :  { %7378 = vmatprep.mubr.msk.f32.mxu1 %vm83_vm0, %v4496_v22  ;;  %8502 = vrcp.f32 %v4431_v41 }
 0xfa9   :  { %7379 = vmatmul.mubr.msk.f32.gmra.mrb[78].mxu1 %vm83_vm0, %v4497_v10  ;;  %v8497_v43 = vpop.eup %8496  ;;  %8504 = vrcp.f32 %v4425_v25  ;;  %v4422_v16 = vpop.xlane.xlu1 %4421 }
 0xfaa   :  { %v4428_v36 = vpop.xlane.xlu0 %4427  ;;  %8506 = vrcp.f32 %v4422_v16  ;;  %v4500_v48 = vmul.f32 %v8497_v43, %v10483_v58 }
 0xfab   :  { %8508 = vrcp.f32 %v4428_v36  ;;  %v6469_v36 = vld [vmem:[%s10978_s7 + $0x20] sm:$0xff] }
 0xfac   :  { %7392 = vmatprep.mubr.msk.f32.mxu0 %vm83_vm0, %v4500_v48  ;;  %8510 = vrcp.f32 %v4437_v29  ;;  %v6470_v48 = vld [vmem:[%s10978_s7 + $0x28] sm:$0xff] }
 0xfad   :  { %7393 = vmatmul.mubr.msk.f32.gmra.mrb[66].mxu0 %vm83_vm0, %v4501_v31  ;;  %v8242_v30 = vpop.permute.xlu1 %8241  ;;  %v8499_v21 = vpop.eup %8498  ;;  %v6471_v31 = vld [vmem:[%s10978_s7 + $0x30] sm:$0xff] }
 0xfae   :  { %v4434_v27 = vpop.xlane.xlu0 %4433  ;;  %v8244_v20 = vunpack.i.h.bf16 %v8242_v30  ;;  %v8243_v60 = vunpack.i.l.bf16 %v8242_v30  ;;  %v4503_v32 = vmul.f32 %v8499_v21, %v10491_v45  ;;  %v7857_v30 = vpack.c.bf16 %v6470_v48, %v6469_v36 }
 0xfaf   :  { %8512 = vrcp.f32 %v4434_v27  ;;  %v6472_v27 = vld [vmem:[%s10978_s7 + $0x38] sm:$0xff]  ;;  %s11070_s7 = smov 28  }
 0xfb0   :  { %v7845_v24 = vpack.c.bf16 %v8244_v20, %v8243_v60  ;;  %v7861_v20 = vpack.c.bf16 %v6472_v27, %v6471_v31 }
 0xfb1   :  { %v8501_v3 = vpop.eup %8500 }
 0xfb2   :  { %v8503_v33 = vpop.eup %8502  ;;  %7846 = vmatprep.subr.bf16.mxu0 %v7845_v24  ;;  %v4502_v58 = vmul.f32 %v8501_v3, %v10499_v51 }
 0xfb3   :  { %v8505_v59 = vpop.eup %8504  ;;  %7848 = vmatpush3.bf16.msra.mxu0 %v7845_v24  ;;  %v4507_v5 = vmul.f32 %v8503_v33, %v10485_v19 }
 0xfb4   :  { %v8507_v39 = vpop.eup %8506  ;;  %7403 = vmatprep.mubr.msk.f32.mxu1 %vm83_vm0, %v4502_v58  ;;  %v4505_v51 = vmul.f32 %v8505_v59, %v10493_v40  ;;  %7858 = vmatprep.subr.bf16.mxu0 %v7857_v30 }
 0xfb5   :  { %v8509_v55 = vpop.eup %8508  ;;  %7404 = vmatmul.mubr.msk.f32.vlgmr.msra.gmra.mrb[80].mxu1 %vm83_vm0, %v4503_v32  ;;  %v4504_v61 = vmul.f32 %v8507_v39, %v10509_v18 }
 0xfb6   :  { %7852 = vmatpush3.bf16.msra.mxu1 %v7849_v49  ;;  %v4506_v11 = vmul.f32 %v8509_v55, %v10503_v17  ;;  %v8511_v54 = vpop.eup %8510 }
 0xfb7   :  { %7406 = vmatprep.mubr.msk.f32.mxu1 %vm83_vm0, %v4504_v61  ;;  %v4509_v17 = vmul.f32 %v8511_v54, %v10501_v4 }
 0xfb8   :  { %7417 = vmatprep.mubr.msk.f32.mxu0 %vm83_vm0, %v4506_v11 }
 0xfb9   :  { %v8513_v45 = vpop.eup %8512  ;;  %7407 = vmatmul.mubr.msk.f32.gmra.mrb[82].mxu1 %vm83_vm0, %v4505_v51  ;;  %7418 = vmatmul.mubr.msk.f32.vlgmr.msra.gmra.mrb[68].mxu0 %vm83_vm0, %v4507_v5 }
 0xfba   :  { %v4508_v44 = vmul.f32 %v8513_v45, %v10515_v35  ;;  %7860 = vmatpush3.bf16.msra.mxu0 %v7857_v30 }
 0xfbb   :  { %7862 = vmatprep.subr.bf16.mxu0 %v7861_v20 }
 0xfbc   :  { %7420 = vmatprep.mubr.msk.f32.mxu0 %vm83_vm0, %v4508_v44 }
 0xfbd   :  { %7421 = vmatmul.mubr.msk.f32.gmra.mrb[70].mxu0 %vm83_vm0, %v4509_v17 }
 0xfbe   :  { %7864 = vmatpush3.bf16.msra.mxu0 %v7861_v20 }
 0xfd3   :  { %v4443_v19 = vpop.xlane.xlu0 %4442 }
 0xfd7   :  { %v4440_v18 = vpop.xlane.xlu0 %4439 }
 0xfd8   :  { %8514 = vrcp.f32 %v4440_v18 }
 0xfd9   :  { %8516 = vrcp.f32 %v4443_v19 }
 0xfdb   :  { %v4449_v42 = vpop.xlane.xlu0 %4448 }
 0xfdf   :  { %v4446_v40 = vpop.xlane.xlu0 %4445 }
 0xfe0   :  { %8518 = vrcp.f32 %v4446_v40 }
 0xfe1   :  { %8520 = vrcp.f32 %v4449_v42 }
 0xfe2   :  { %v8515_v28 = vpop.eup %8514 }
 0xfe3   :  { %v8247_v8 = vpop.permute.xlu0 %8246  ;;  %v4510_v13 = vmul.f32 %v8515_v28, %v10542_v47  ;;  %v8517_v4 = vpop.eup %8516 }
 0xfe4   :  { %v8249_v34 = vunpack.i.h.bf16 %v8247_v8  ;;  %v8248_v35 = vunpack.i.l.bf16 %v8247_v8  ;;  %v4511_v41 = vmul.f32 %v8517_v4, %v10537_v62 }
 0xfe5   :  { %7431 = vmatprep.mubr.msk.f32.mxu1 %vm83_vm0, %v4510_v13 }
 0xfe6   :  { %v7853_v9 = vpack.c.bf16 %v8249_v34, %v8248_v35 }
 0xfe8   :  { %7854 = vmatprep.subr.bf16.mxu1 %v7853_v9 }
 0xfe9   :  { %7856 = vmatpush3.bf16.msra.mxu1 %v7853_v9 }
 0xfea   :  { %v8519_v23 = vpop.eup %8518 }
 0xfeb   :  { %v8521_v57 = vpop.eup %8520  ;;  %v4512_v0 = vmul.f32 %v8519_v23, %v10550_v7 }
 0xfec   :  { %7432 = vmatmul.mubr.msk.f32.vlgmr.msra.gmra.mrb[84].mxu1 %vm83_vm0, %v4511_v41  ;;  %v4513_v47 = vmul.f32 %v8521_v57, %v10546_v56 }
 0xfed   :  { %7434 = vmatprep.mubr.msk.f32.mxu1 %vm83_vm0, %v4512_v0 }
 0xff0   :  { %7435 = vmatmul.mubr.msk.f32.gmra.mrb[86].mxu1 %vm83_vm0, %v4513_v47 }
 0xff1   :  { %5814 = vmatprep.mubr.f32.mxu1 %v11063_v53 }
0x100f   :  { %v10630_v37 = vpop.f32.mrb[68].mxu1 }
0x1010   :  { %v10632_v50 = vpop.f32.mrb[69].mxu1 }
0x1017   :  { %v10634_v12 = vpop.f32.mrb[70].mxu1 }
0x1018   :  { %v10636_v62 = vpop.f32.mrb[71].mxu1 }
0x1054   :  { %v7349_v14 = vpop.f32.mrb[72].mxu1 }
0x1055   :  { %5392 = vrot.lane.b32.xlu0 %v7349_v14, %s11064_s1  ;;  %v4713_v7 = vpop.f32.mrb[73].mxu1 }
0x1056   :  { %5390 = vrot.lane.b32.xlu1 %v4713_v7, %s11064_s1 }
0x1060   :  { %v7363_v26 = vpop.f32.mrb[60].mxu0 }
0x1061   :  { %5408 = vrot.lane.b32.xlu0 %v7363_v26, %s11065_s25  ;;  %v4822_v56 = vpop.f32.mrb[61].mxu0 }
0x1062   :  { %5406 = vrot.lane.b32.xlu1 %v4822_v56, %s11065_s25 }
0x1064   :  { %v7352_v25 = vpop.f32.mrb[74].mxu1 }
0x1065   :  { %5396 = vrot.lane.b32.xlu0 %v7352_v25, %s11064_s1  ;;  %v4723_v15 = vpop.f32.mrb[75].mxu1 }
0x1066   :  { %5394 = vrot.lane.b32.xlu1 %v4723_v15, %s11064_s1 }
0x106b   :  { %v7366_v52 = vpop.f32.mrb[62].mxu0 }
0x106c   :  { %5412 = vrot.lane.b32.xlu0 %v7366_v52, %s11065_s25  ;;  %v4832_v1 = vpop.f32.mrb[63].mxu0 }
0x106d   :  { %5410 = vrot.lane.b32.xlu1 %v4832_v1, %s11065_s25 }
0x1073   :  { %v7377_v49 = vpop.f32.mrb[76].mxu1 }
0x1074   :  { %v7391_v29 = vpop.f32.mrb[64].mxu0  ;;  %5424 = vrot.lane.b32.xlu0 %v7377_v49, %s11066_s4  ;;  %v4931_v46 = vpop.f32.mrb[77].mxu1 }
0x1075   :  { %v5040_v22 = vpop.f32.mrb[65].mxu0  ;;  %5422 = vrot.lane.b32.xlu1 %v4931_v46, %s11066_s4 }
0x1078   :  { %5440 = vrot.lane.b32.xlu0 %v7391_v29, %s11067_s23 }
0x1079   :  { %5438 = vrot.lane.b32.xlu1 %v5040_v22, %s11067_s23 }
0x107c   :  { %v7380_v10 = vpop.f32.mrb[78].mxu1 }
0x107d   :  { %5428 = vrot.lane.b32.xlu0 %v7380_v10, %s11066_s4  ;;  %v4941_v38 = vpop.f32.mrb[79].mxu1 }
0x107e   :  { %5426 = vrot.lane.b32.xlu1 %v4941_v38, %s11066_s4 }
0x1080   :  { %v7394_v43 = vpop.f32.mrb[66].mxu0 }
0x1081   :  { %5444 = vrot.lane.b32.xlu0 %v7394_v43, %s11067_s23  ;;  %v5050_v16 = vpop.f32.mrb[67].mxu0 }
0x1082   :  { %5442 = vrot.lane.b32.xlu1 %v5050_v16, %s11067_s23 }
0x1088   :  { %v7405_v60 = vpop.f32.mrb[80].mxu1 }
0x1089   :  { %5456 = vrot.lane.b32.xlu0 %v7405_v60, %s11068_s22  ;;  %v5149_v21 = vpop.f32.mrb[81].mxu1 }
0x108a   :  { %5454 = vrot.lane.b32.xlu1 %v5149_v21, %s11068_s22 }
0x108c   :  { %v7408_v24 = vpop.f32.mrb[82].mxu1  ;;  %v7419_v3 = vpop.f32.mrb[68].mxu0 }
0x108d   :  { %v5159_v33 = vpop.f32.mrb[83].mxu1  ;;  %5472 = vrot.lane.b32.xlu0 %v7419_v3, %s11069_s29  ;;  %v5258_v58 = vpop.f32.mrb[69].mxu0 }
0x108e   :  { %5470 = vrot.lane.b32.xlu1 %v5258_v58, %s11069_s29 }
0x1090   :  { %v7422_v59 = vpop.f32.mrb[70].mxu0 }
0x1091   :  { %5460 = vrot.lane.b32.xlu0 %v7408_v24, %s11068_s22  ;;  %v5268_v32 = vpop.f32.mrb[71].mxu0 }
0x1092   :  { %5458 = vrot.lane.b32.xlu1 %v5159_v33, %s11068_s22 }
0x10bf   :  { %v7433_v39 = vpop.f32.mrb[84].mxu1 }
0x10c0   :  { %5488 = vrot.lane.b32.xlu0 %v7433_v39, %s11070_s7  ;;  %v5367_v55 = vpop.f32.mrb[85].mxu1  ;;  %v6474_v39 = vld [vmem:[%s10979_s8 + $0x1] ss:$0 sm:$0xff] }
0x10c1   :  { %5486 = vrot.lane.b32.xlu1 %v5367_v55, %s11070_s7 }
0x10c3   :  { %v7436_v61 = vpop.f32.mrb[86].mxu1 }
0x10c4   :  { %5476 = vrot.lane.b32.xlu0 %v7422_v59, %s11069_s29  ;;  %v5377_v11 = vpop.f32.mrb[87].mxu1 }
0x10c5   :  { %5474 = vrot.lane.b32.xlu1 %v5268_v32, %s11069_s29 }
0x10c7   :  { %v5393_v54 = vpop.permute.xlu0 %5392 }
0x10c8   :  { %5492 = vrot.lane.b32.xlu0 %v7436_v61, %s11070_s7  ;;  %v5391_v5 = vpop.permute.xlu1 %5390  ;;  %v5499_v14 = vsel %vm367_vm1, %v10630_v37, %v5393_v54 }
0x10c9   :  { %5490 = vrot.lane.b32.xlu1 %v5377_v11, %s11070_s7  ;;  %v5498_v0 = vsel %vm367_vm1, %v10632_v50, %v5391_v5 }
0x10d3   :  { %v5409_v51 = vpop.permute.xlu0 %5408 }
0x10d4   :  { %v5407_v45 = vpop.permute.xlu1 %5406  ;;  %v5503_v56 = vsel %vm2572_vm3, %v5499_v14, %v5409_v51 }
0x10d5   :  { %v5502_v7 = vsel %vm2572_vm3, %v5498_v0, %v5407_v45 }
0x10d7   :  { %v5397_v44 = vpop.permute.xlu0 %5396 }
0x10d8   :  { %v5395_v17 = vpop.permute.xlu1 %5394  ;;  %v5501_v36 = vsel %vm367_vm1, %v10634_v12, %v5397_v44 }
0x10d9   :  { %v5500_v43 = vsel %vm367_vm1, %v10636_v62, %v5395_v17 }
0x10de   :  { %v5413_v19 = vpop.permute.xlu0 %5412 }
0x10df   :  { %v5411_v18 = vpop.permute.xlu1 %5410  ;;  %v5505_v30 = vsel %vm2572_vm3, %v5501_v36, %v5413_v19  ;;  %v6487_v36 = vld [vmem:[%s10980_s11 + $0x60] sm:$0xff] }
0x10e0   :  { %v5504_v48 = vsel %vm2572_vm3, %v5500_v43, %v5411_v18  ;;  %v6490_v43 = vld [vmem:[%s10980_s11 + $0x78] sm:$0xff] }
0x10e6   :  { %v5425_v42 = vpop.permute.xlu0 %5424 }
0x10e7   :  { %v5423_v40 = vpop.permute.xlu1 %5422  ;;  %v5507_v15 = vsel %vm2577_vm4, %v5503_v56, %v5425_v42 }
0x10e8   :  { %v5506_v25 = vsel %vm2577_vm4, %v5502_v7, %v5423_v40 }
0x10ea   :  { %v5441_v28 = vpop.permute.xlu0 %5440 }
0x10eb   :  { %v5439_v8 = vpop.permute.xlu1 %5438  ;;  %v5511_v1 = vsel %vm2582_vm5, %v5507_v15, %v5441_v28  ;;  %v11071_v28 = vld [vmem:[#allocation4_spill] sm:$0xff] }
0x10ec   :  { %v5510_v52 = vsel %vm2582_vm5, %v5506_v25, %v5439_v8 }
0x10ef   :  { %v5429_v13 = vpop.permute.xlu0 %5428 }
0x10f0   :  { %v5427_v34 = vpop.permute.xlu1 %5426  ;;  %v5509_v20 = vsel %vm2577_vm4, %v5505_v30, %v5429_v13  ;;  %v6512_v30 = vld [vmem:[%s10981_s13 + $0x180] sm:$0xff] }
0x10f1   :  { %v5508_v27 = vsel %vm2577_vm4, %v5504_v48, %v5427_v34  ;;  %v6489_v48 = vld [vmem:[%s10980_s11 + $0x70] sm:$0xff] }
0x10f3   :  { %v5445_v35 = vpop.permute.xlu0 %5444 }
0x10f4   :  { %v5443_v9 = vpop.permute.xlu1 %5442  ;;  %v5513_v21 = vsel %vm2582_vm5, %v5509_v20, %v5445_v35  ;;  %v6496_v20 = vld [vmem:[%s10981_s13 + $0x100] sm:$0xff] }
0x10f5   :  { %v5512_v60 = vsel %vm2582_vm5, %v5508_v27, %v5443_v9  ;;  %v6513_v27 = vld [vmem:[%s10981_s13 + $0x188] sm:$0xff] }
0x10fb   :  { %v5457_v4 = vpop.permute.xlu0 %5456 }
0x10fc   :  { %v5455_v23 = vpop.permute.xlu1 %5454  ;;  %v5515_v29 = vsel %vm2587_vm6, %v5511_v1, %v5457_v4 }
0x10fd   :  { %v5514_v49 = vsel %vm2587_vm6, %v5510_v52, %v5455_v23 }
0x10ff   :  { %v5473_v41 = vpop.permute.xlu0 %5472 }
0x1100   :  { %v5471_v57 = vpop.permute.xlu1 %5470  ;;  %v5519_v22 = vsel %vm2592_vm7, %v5515_v29, %v5473_v41  ;;  %v6486_v29 = vld [vmem:[%s10980_s11 + $0x58] sm:$0xff] }
0x1101   :  { %v5518_v37 = vsel %vm2592_vm7, %v5514_v49, %v5471_v57 }
0x1103   :  { %v5461_v47 = vpop.permute.xlu0 %5460 }
0x1104   :  { %v5459_v26 = vpop.permute.xlu1 %5458  ;;  %v5517_v3 = vsel %vm2587_vm6, %v5513_v21, %v5461_v47  ;;  %v6497_v21 = vld [vmem:[%s10981_s13 + $0x108] sm:$0xff] }
0x1105   :  { %v5516_v62 = vsel %vm2587_vm6, %v5512_v60, %v5459_v26  ;;  %v7873_v60 = vpack.c.bf16 %v6513_v27, %v6512_v30 }
0x1107   :  { %7874 = vmatprep.subr.bf16.mxu0 %v7873_v60 }
0x1132   :  { %v5489_v50 = vpop.permute.xlu0 %5488 }
0x1133   :  { %v5487_v46 = vpop.permute.xlu1 %5486  ;;  %v5523_v38 = vsel %vm2597_vm8, %v5519_v22, %v5489_v50  ;;  %v6484_v50 = vld [vmem:[%s10980_s11 + $0x48] sm:$0xff]  ;;  %v6485_v22 = vld [vmem:[%s10980_s11 + $0x50] sm:$0xff] }
0x1134   :  { %v5522_v10 = vsel %vm2597_vm8, %v5518_v37, %v5487_v46  ;;  %v7865_v37 = vpack.c.bf16 %v6486_v29, %v6484_v50  ;;  %v6483_v46 = vld [vmem:[%s10980_s11 + $0x40] sm:$0xff] }
0x1135   :  { %7445 = vmatprep.mubr.msk.f32.mxu0 %vm83_vm0, %v5522_v10  ;;  %v7867_v10 = vpack.c.bf16 %v6485_v22, %v6483_v46 }
0x1136   :  { %v5477_v16 = vpop.permute.xlu0 %5476  ;;  %7446 = vmatmul.mubr.msk.f32.vlgmr.msra.gmra.mrb[72].mxu0 %vm83_vm0, %v5523_v38  ;;  %7866 = vmatprep.subr.bf16.mxu1 %v7865_v37  ;;  %v6488_v38 = vld [vmem:[%s10980_s11 + $0x68] sm:$0xff] }
0x1137   :  { %v5475_v31 = vpop.permute.xlu1 %5474  ;;  %v5521_v58 = vsel %vm2592_vm7, %v5517_v3, %v5477_v16  ;;  %7868 = vmatpush1.bf16.msra.mxu1 %v7867_v10  ;;  %v7869_v16 = vpack.c.bf16 %v6490_v43, %v6488_v38  ;;  %v7875_v3 = vpack.c.bf16 %v6497_v21, %v6496_v20  ;;  %v6481_v38 = vld [vmem:[%s10982_s9 + $0x1] ss:$0 sm:$0xff] }
0x1138   :  { %v5520_v12 = vsel %vm2592_vm7, %v5516_v62, %v5475_v31  ;;  %v7871_v31 = vpack.c.bf16 %v6489_v48, %v6487_v36  ;;  %v6514_v62 = vld [vmem:[%s10981_s13 + $0x190] sm:$0xff]  ;;  %v6482_v36 = vld [vmem:[%s10983_s10 + $0x1] ss:$0 sm:$0xff] }
0x1139   :  { %7870 = vmatprep.subr.bf16.mxu1 %v7869_v16  ;;  %7876 = vmatpush3.bf16.msra.mxu0 %v7875_v3 }
0x113a   :  { %v5493_v24 = vpop.permute.xlu0 %5492 }
0x113b   :  { %v5491_v33 = vpop.permute.xlu1 %5490  ;;  %v5525_v32 = vsel %vm2597_vm8, %v5521_v58, %v5493_v24  ;;  %7872 = vmatpush1.bf16.msra.mxu1 %v7871_v31  ;;  %v6515_v24 = vld [vmem:[%s10981_s13 + $0x198] sm:$0xff] }
0x113c   :  { %v5524_v59 = vsel %vm2597_vm8, %v5520_v12, %v5491_v33  ;;  %v7877_v12 = vpack.c.bf16 %v6515_v24, %v6514_v62  ;;  %v6498_v33 = vld [vmem:[%s10981_s13 + $0x110] sm:$0xff]  ;;  %v6499_v58 = vld [vmem:[%s10981_s13 + $0x118] sm:$0xff] }
0x113d   :  { %7448 = vmatprep.mubr.msk.f32.mxu0 %vm83_vm0, %v5524_v59  ;;  %v6516_v59 = vld [vmem:[%s10981_s13 + $0x1a0] sm:$0xff] }
0x113e   :  { %7449 = vmatmul.mubr.msk.f32.gmra.mrb[74].mxu0 %vm83_vm0, %v5525_v32  ;;  %v6517_v32 = vld [vmem:[%s10981_s13 + $0x1a8] sm:$0xff]  ;;  %7878 = vmatprep.subr.bf16.mxu0 %v7877_v12 }
0x1209   :  { %v7447_v55 = vpop.f32.mrb[72].mxu0 }
0x120a   :  { %v5623_v61 = vadd.f32 %v7447_v55, %v6474_v39  ;;  %v5617_v11 = vpop.f32.mrb[73].mxu0  ;;  %v7881_v55 = vpack.c.bf16 %v6517_v32, %v6516_v59  ;;  %v6510_v59 = vld [vmem:[%s10981_s13 + $0x170] sm:$0xff]  ;;  %v6511_v32 = vld [vmem:[%s10981_s13 + $0x178] sm:$0xff] }
0x120b   :  { %v5618_v54 = vadd.f32 %v6474_v39, %v5617_v11  ;;  %v6501_v11 = vld [vmem:[%s10981_s13 + $0x128] sm:$0xff] }
0x120c   :  { %v5637_v5 = vadd.f32 %v5623_v61, %v9841_v2  ;;  %v6500_v61 = vld [vmem:[%s10981_s13 + $0x120] sm:$0xff] }
0x120d   :  { %v5636_v51 = vadd.f32 %v5618_v54, %v9837_v6  ;;  %v6518_v54 = vld [vmem:[%s10981_s13 + $0x1b0] sm:$0xff] }
0x120e   :  { %v5647_v45 = vsel %vm83_vm0, %v5637_v5, 0.0 }
0x120f   :  { %5648 = vadd.xlane.f32.xlu0 %v5647_v45  ;;  %v5644_v44 = vsel %vm83_vm0, %v5636_v51, 0.0 }
0x1210   :  { %5645 = vadd.xlane.f32.xlu1 %v5644_v44  ;;  %v6502_v44 = vld [vmem:[%s10981_s13 + $0x130] sm:$0xff] }
0x1211   :  { %v7450_v17 = vpop.f32.mrb[74].mxu0 }
0x1212   :  { %v5633_v19 = vadd.f32 %v7450_v17, %v6474_v39  ;;  %v5627_v18 = vpop.f32.mrb[75].mxu0  ;;  %v6503_v17 = vld [vmem:[%s10981_s13 + $0x138] sm:$0xff] }
0x1213   :  { %v5628_v42 = vadd.f32 %v6474_v39, %v5627_v18  ;;  %v7879_v39 = vpack.c.bf16 %v6499_v58, %v6498_v33  ;;  %v6521_v18 = vld [vmem:[%s10981_s13 + $0x1c8] sm:$0xff]  ;;  %v6526_v33 = vld [vmem:[%s10981_s13 + $0x1f0] sm:$0xff] }
0x1214   :  { %v5639_v40 = vadd.f32 %v5633_v19, %v9849_v63  ;;  %v6520_v19 = vld [vmem:[%s10981_s13 + $0x1c0] sm:$0xff] }
0x1215   :  { %v5638_v8 = vadd.f32 %v5628_v42, %v11071_v28  ;;  %7880 = vmatpush3.bf16.msra.mxu0 %v7879_v39  ;;  %v7887_v42 = vpack.c.bf16 %v6503_v17, %v6502_v44  ;;  %v6504_v28 = vld [vmem:[%s10981_s13 + $0x140] sm:$0xff]  ;;  %v7903_v39 = vpack.c.bf16 %v6511_v32, %v6510_v59 }
0x1216   :  { %v5653_v13 = vsel %vm83_vm0, %v5639_v40, 0.0  ;;  %7882 = vmatprep.subr.bf16.mxu0 %v7881_v55  ;;  %v6491_v55 = vld [vmem:[%s10984_s12 + $0x2] sm:$0x3] }
0x1217   :  { %5654 = vadd.xlane.f32.xlu1 %v5653_v13  ;;  %v5650_v2 = vsel %vm83_vm0, %v5638_v8, 0.0  ;;  %v6522_v13 = vld [vmem:[%s10981_s13 + $0x1d0] sm:$0xff] }
0x1218   :  { %5651 = vadd.xlane.f32.xlu0 %v5650_v2  ;;  %v6523_v2 = vld [vmem:[%s10981_s13 + $0x1d8] sm:$0xff] }
0x129c   :  { %v5649_v6 = vpop.xlane.xlu0 %5648 }
0x129d   :  { %v5657_v34 = vmul.f32 0.03125, %v5649_v6  ;;  %v5646_v35 = vpop.xlane.xlu1 %5645 }
0x129e   :  { %v5656_v9 = vmul.f32 0.03125, %v5646_v35  ;;  %v6506_v35 = vld [vmem:[%s10981_s13 + $0x150] sm:$0xff] }
0x129f   :  { %v10725_v4 = vsub.f32 %v5637_v5, %v5657_v34  ;;  %v6519_v5 = vld [vmem:[%s10981_s13 + $0x1b8] sm:$0xff]  ;;  %v7893_v34 = vpack.c.bf16 %v6523_v2, %v6522_v13 }
0x12a0   :  { %v10727_v23 = vsub.f32 %v5636_v51, %v5656_v9  ;;  %v7883_v51 = vpack.c.bf16 %v6501_v11, %v6500_v61  ;;  %v7885_v45 = vpack.c.bf16 %v6519_v5, %v6518_v54  ;;  %v6507_v9 = vld [vmem:[%s10981_s13 + $0x158] sm:$0xff]  ;;  %v11072_v61 = vld [vmem:[#allocation2_spill] sm:$0xff] }
0x12a1   :  { %v5665_v41 = vmul.f32 %v10725_v4, %v10725_v4  ;;  %v11073_v11 = vsub.s32 0, %v11072_v61  ;;  %v11074_v5 = vsub.s32 1, %v11072_v61 }
0x12a2   :  { %v5664_v63 = vmul.f32 %v10727_v23, %v10727_v23  ;;  %7884 = vmatpush3.bf16.msra.mxu0 %v7883_v51 }
0x12a3   :  { %v5671_v57 = vsel %vm83_vm0, %v5665_v41, 0.0  ;;  %7886 = vmatprep.subr.bf16.mxu0 %v7885_v45  ;;  %v6524_v41 = vld [vmem:[%s10981_s13 + $0x1e0] sm:$0xff]  ;;  %v5731_v54 = vrot.slane %v6491_v55, %v11073_v11  ;;  %v5735_v51 = vrot.slane %v6491_v55, %v11074_v5 }
0x12a4   :  { %5672 = vadd.xlane.f32.xlu1 %v5671_v57  ;;  %v5655_v0 = vpop.xlane.xlu1 %5654  ;;  %v5668_v47 = vsel %vm83_vm0, %v5664_v63, 0.0  ;;  %v6525_v63 = vld [vmem:[%s10981_s13 + $0x1e8] sm:$0xff]  ;;  %v7895_v57 = vpack.c.bf16 %v6507_v9, %v6506_v35 }
0x12a5   :  { %v5659_v14 = vmul.f32 0.03125, %v5655_v0  ;;  %v5652_v7 = vpop.xlane.xlu0 %5651  ;;  %5669 = vadd.xlane.f32.xlu0 %v5668_v47  ;;  %v7897_v0 = vpack.c.bf16 %v6525_v63, %v6524_v41 }
0x12a6   :  { %v5658_v26 = vmul.f32 0.03125, %v5652_v7  ;;  %7888 = vmatpush3.bf16.msra.mxu0 %v7887_v42 }
0x12a7   :  { %v10735_v56 = vsub.f32 %v5639_v40, %v5659_v14  ;;  %v7889_v40 = vpack.c.bf16 %v6521_v18, %v6520_v19 }
0x12a8   :  { %v10737_v25 = vsub.f32 %v5638_v8, %v5658_v26  ;;  %v6505_v8 = vld [vmem:[%s10981_s13 + $0x148] sm:$0xff] }
0x12a9   :  { %v5667_v15 = vmul.f32 %v10735_v56, %v10735_v56  ;;  %v7891_v6 = vpack.c.bf16 %v6505_v8, %v6504_v28  ;;  %7890 = vmatprep.subr.bf16.mxu0 %v7889_v40 }
0x12aa   :  { %v5666_v52 = vmul.f32 %v10737_v25, %v10737_v25 }
0x12ab   :  { %v5677_v1 = vsel %vm83_vm0, %v5667_v15, 0.0  ;;  %7892 = vmatpush3.bf16.msra.mxu0 %v7891_v6 }
0x12ac   :  { %5678 = vadd.xlane.f32.xlu1 %v5677_v1  ;;  %v5674_v49 = vsel %vm83_vm0, %v5666_v52, 0.0  ;;  %7894 = vmatprep.subr.bf16.mxu0 %v7893_v34 }
0x12ad   :  { %5675 = vadd.xlane.f32.xlu0 %v5674_v49 }
0x12af   :  { %7896 = vmatpush3.bf16.msra.mxu0 %v7895_v57 }
0x12b0   :  { %7898 = vmatprep.subr.bf16.mxu0 %v7897_v0 }
0x1331   :  { %v5673_v47 = vpop.xlane.xlu1 %5672 }
0x1332   :  { %v5681_v14 = vmul.f32 0.03125, %v5673_v47  ;;  %v5670_v7 = vpop.xlane.xlu0 %5669 }
0x1333   :  { %v5680_v26 = vmul.f32 0.03125, %v5670_v7 }
0x1334   :  { %v5685_v15 = vadd.f32 1e-05, %v5681_v14 }
0x1335   :  { %v5684_v52 = vadd.f32 1e-05, %v5680_v26 }
0x1336   :  { %8522 = vrsqrt.f32 %v5685_v15 }
0x1337   :  { %8524 = vrsqrt.f32 %v5684_v52 }
0x1339   :  { %v5679_v1 = vpop.xlane.xlu1 %5678 }
0x133a   :  { %v5683_v49 = vmul.f32 0.03125, %v5679_v1  ;;  %v5676_v50 = vpop.xlane.xlu0 %5675  ;;  %v6529_v1 = vld [vmem:[%s10985_s14 + $0x1] ss:$0 sm:$0xff] }
0x133b   :  { %v5682_v29 = vmul.f32 0.03125, %v5676_v50 }
0x133c   :  { %v5687_v37 = vadd.f32 1e-05, %v5683_v49 }
0x133d   :  { %v5686_v46 = vadd.f32 1e-05, %v5682_v29 }
0x133e   :  { %8526 = vrsqrt.f32 %v5687_v37 }
0x133f   :  { %8528 = vrsqrt.f32 %v5686_v46 }
0x1340   :  { %v8523_v22 = vpop.eup %8522 }
0x1341   :  { %v8525_v10 = vpop.eup %8524  ;;  %v5693_v16 = vmul.f32 %v8523_v22, %v10725_v4 }
0x1342   :  { %v5692_v43 = vmul.f32 %v8525_v10, %v10727_v23 }
0x1343   :  { %v5703_v30 = vmul.f32 %v6481_v38, %v5693_v16 }
0x1344   :  { %v5702_v48 = vmul.f32 %v6481_v38, %v5692_v43 }
0x1345   :  { %v10860_v60 = vadd.f32 %v6482_v36, %v5703_v30 }
0x1346   :  { %v10855_v31 = vadd.f32 %v6482_v36, %v5702_v48 }
0x1348   :  { %v8527_v27 = vpop.eup %8526  ;;  %6492 = vmatmul.mubr.msk.f32.vlgmr.msra.gmra.mrb[88].mxu1 %vm83_vm0, %v10855_v31 }
0x1349   :  { %v8529_v20 = vpop.eup %8528  ;;  %5820 = vmatprep.mubr.f32.mxu1 %v11063_v53  ;;  %v5695_v4 = vmul.f32 %v8527_v27, %v10735_v56  ;;  %v6508_v56 = vld [vmem:[%s10981_s13 + $0x160] sm:$0xff] }
0x134a   :  { %v5694_v23 = vmul.f32 %v8529_v20, %v10737_v25  ;;  %v6509_v25 = vld [vmem:[%s10981_s13 + $0x168] sm:$0xff] }
0x134b   :  { %v5705_v24 = vmul.f32 %v6481_v38, %v5695_v4  ;;  %v7899_v12 = vpack.c.bf16 %v6509_v25, %v6508_v56 }
0x134c   :  { %6493 = vmatmul.mubr.msk.f32.gmra.mrb[90].mxu1 %vm83_vm0, %v10860_v60  ;;  %v5704_v21 = vmul.f32 %v6481_v38, %v5694_v23 }
0x134d   :  { %5826 = vmatprep.mubr.f32.mxu1 %v11063_v53  ;;  %v10872_v3 = vadd.f32 %v6482_v36, %v5705_v24  ;;  %7900 = vmatpush3.bf16.msra.mxu0 %v7899_v12 }
0x134e   :  { %v10867_v62 = vadd.f32 %v6482_v36, %v5704_v21 }
0x1350   :  { %6494 = vmatmul.mubr.msk.f32.gmra.mrb[92].mxu1 %vm83_vm0, %v10867_v62 }
0x1351   :  { %5832 = vmatprep.mubr.f32.mxu1 %v11063_v53  ;;  %v6527_v53 = vld [vmem:[%s10981_s13 + $0x1f8] sm:$0xff] }
0x1352   :  { %v7901_v58 = vpack.c.bf16 %v6527_v53, %v6526_v33 }
0x1354   :  { %6495 = vmatmul.mubr.msk.f32.gmra.mrb[94].mxu1 %vm83_vm0, %v10872_v3  ;;  %7902 = vmatprep.subr.bf16.mxu0 %v7901_v58 }
0x1355   :  { %7904 = vmatpush3.bf16.msra.mxu0 %v7903_v39 }
0x141b   :  { %v5816_v45 = vpop.f32.mrb[88].mxu1 }
0x141c   :  { %v5817_v44 = vadd.f32 %v5816_v45, %v5731_v54  ;;  %v5818_v17 = vpop.f32.mrb[89].mxu1 }
0x141d   :  { %v5819_v19 = vadd.f32 %v5818_v17, %v5735_v51 }
0x141e   :  { %v5839_v40 = vmax.f32 %v5817_v44, 0.0 }
0x141f   :  { %v5840_v18 = vmax.f32 %v5819_v19, 0.0  ;;  %v5822_v42 = vpop.f32.mrb[90].mxu1 }
0x1420   :  { %v5823_v28 = vadd.f32 %v5822_v42, %v5731_v54  ;;  %v5824_v8 = vpop.f32.mrb[91].mxu1 }
0x1421   :  { %v5825_v13 = vadd.f32 %v5824_v8, %v5735_v51  ;;  %5952 = vmatprep.mubr.f32.mxu0 %v5840_v18 }
0x1422   :  { %5953 = vmatmul.mubr.f32.vlgmr.msra.gmra.mrb[76].mxu0 %v5839_v40  ;;  %v5841_v34 = vmax.f32 %v5823_v28, 0.0 }
0x1423   :  { %v5842_v2 = vmax.f32 %v5825_v13, 0.0  ;;  %v5828_v6 = vpop.f32.mrb[92].mxu1 }
0x1424   :  { %v5829_v35 = vadd.f32 %v5828_v6, %v5731_v54  ;;  %v5830_v9 = vpop.f32.mrb[93].mxu1 }
0x1425   :  { %v5831_v41 = vadd.f32 %v5830_v9, %v5735_v51  ;;  %5957 = vmatprep.mubr.f32.mxu0 %v5842_v2 }
0x1426   :  { %5958 = vmatmul.mubr.f32.gmra.mrb[78].mxu0 %v5841_v34  ;;  %v5843_v0 = vmax.f32 %v5829_v35, 0.0 }
0x1427   :  { %v5844_v63 = vmax.f32 %v5831_v41, 0.0  ;;  %v5834_v57 = vpop.f32.mrb[94].mxu1 }
0x1428   :  { %v5835_v47 = vadd.f32 %v5834_v57, %v5731_v54  ;;  %v5836_v14 = vpop.f32.mrb[95].mxu1 }
0x1429   :  { %v5837_v7 = vadd.f32 %v5836_v14, %v5735_v51  ;;  %5962 = vmatprep.mubr.f32.mxu0 %v5844_v63  ;;  %v6533_v14 = vld [vmem:[%s10987_s16 + $0x1] ss:$0 sm:$0xff] }
0x142a   :  { %5963 = vmatmul.mubr.f32.gmra.mrb[80].mxu0 %v5843_v0  ;;  %v5845_v15 = vmax.f32 %v5835_v47, 0.0  ;;  %v6532_v0 = vld [vmem:[%s10986_s15 + $0x1] ss:$0 sm:$0xff] }
0x142b   :  { %v5846_v26 = vmax.f32 %v5837_v7, 0.0 }
0x142d   :  { %5967 = vmatprep.mubr.f32.mxu0 %v5846_v26 }
0x142e   :  { %5968 = vmatmul.mubr.f32.gmra.mrb[82].mxu0 %v5845_v15 }
0x14f5   :  { %v6913_v52 = vpop.f32.mrb[76].mxu0 }
0x14f6   :  { %v6914_v49 = vpop.f32.mrb[77].mxu0 }
0x14f7   :  { %v6915_v50 = vadd.f32 %v6914_v49, %v6913_v52 }
0x14f9   :  { %v5955_v29 = vadd.f32 %v6915_v50, %v6529_v1  ;;  %v6916_v37 = vpop.f32.mrb[78].mxu0 }
0x14fa   :  { %v6917_v46 = vpop.f32.mrb[79].mxu0 }
0x14fb   :  { %v6918_v22 = vadd.f32 %v6917_v46, %v6916_v37  ;;  %v5973_v10 = vadd.f32 %v5955_v29, %v10855_v31 }
0x14fd   :  { %v5960_v38 = vadd.f32 %v6918_v22, %v6529_v1  ;;  %v6919_v43 = vpop.f32.mrb[80].mxu0  ;;  %v5981_v16 = vsel %vm83_vm0, %v5973_v10, 0.0 }
0x14fe   :  { %5982 = vadd.xlane.f32.xlu0 %v5981_v16  ;;  %v6920_v36 = vpop.f32.mrb[81].mxu0 }
0x14ff   :  { %v6921_v48 = vadd.f32 %v6920_v36, %v6919_v43  ;;  %v5974_v30 = vadd.f32 %v5960_v38, %v10860_v60 }
0x1501   :  { %v5965_v27 = vadd.f32 %v6921_v48, %v6529_v1  ;;  %v6922_v20 = vpop.f32.mrb[82].mxu0  ;;  %v5984_v23 = vsel %vm83_vm0, %v5974_v30, 0.0 }
0x1502   :  { %5985 = vadd.xlane.f32.xlu1 %v5984_v23  ;;  %v6923_v4 = vpop.f32.mrb[83].mxu0 }
0x1503   :  { %v6924_v21 = vadd.f32 %v6923_v4, %v6922_v20  ;;  %v5975_v24 = vadd.f32 %v5965_v27, %v10867_v62 }
0x1505   :  { %v5970_v56 = vadd.f32 %v6924_v21, %v6529_v1  ;;  %v5987_v31 = vsel %vm83_vm0, %v5975_v24, 0.0 }
0x1506   :  { %5988 = vadd.xlane.f32.xlu0 %v5987_v31 }
0x1507   :  { %v5976_v25 = vadd.f32 %v5970_v56, %v10872_v3 }
0x1509   :  { %v5990_v12 = vsel %vm83_vm0, %v5976_v25, 0.0 }
0x150a   :  { %5991 = vadd.xlane.f32.xlu1 %v5990_v12 }
0x158b   :  { %v5983_v33 = vpop.xlane.xlu0 %5982 }
0x158c   :  { %v5993_v60 = vmul.f32 0.03125, %v5983_v33 }
0x158e   :  { %v5997_v53 = vsub.f32 %v5973_v10, %v5993_v60 }
0x158f   :  { %v5986_v58 = vpop.xlane.xlu1 %5985 }
0x1590   :  { %v5994_v59 = vmul.f32 0.03125, %v5986_v58  ;;  %v6001_v32 = vmul.f32 %v5997_v53, %v5997_v53 }
0x1592   :  { %v5998_v39 = vsub.f32 %v5974_v30, %v5994_v59  ;;  %v6005_v55 = vsel %vm83_vm0, %v6001_v32, 0.0 }
0x1593   :  { %6006 = vadd.xlane.f32.xlu0 %v6005_v55  ;;  %v5989_v62 = vpop.xlane.xlu0 %5988 }
0x1594   :  { %v5995_v61 = vmul.f32 0.03125, %v5989_v62  ;;  %v6002_v11 = vmul.f32 %v5998_v39, %v5998_v39 }
0x1596   :  { %v5999_v54 = vsub.f32 %v5975_v24, %v5995_v61  ;;  %v6008_v5 = vsel %vm83_vm0, %v6002_v11, 0.0  ;;  %v6127_v11 = vld [vmem:[%s10988_s19] sm:$0xff] }
0x1597   :  { %6009 = vadd.xlane.f32.xlu1 %v6008_v5  ;;  %v5992_v3 = vpop.xlane.xlu1 %5991 }
0x1598   :  { %v5996_v51 = vmul.f32 0.03125, %v5992_v3  ;;  %v6003_v45 = vmul.f32 %v5999_v54, %v5999_v54  ;;  %v6129_v3 = vld [vmem:[%s10988_s19 + $0x10] sm:$0xff] }
0x159a   :  { %v6000_v44 = vsub.f32 %v5976_v25, %v5996_v51  ;;  %v6011_v17 = vsel %vm83_vm0, %v6003_v45, 0.0  ;;  %v6130_v51 = vld [vmem:[%s10988_s19 + $0x18] sm:$0xff] }
0x159b   :  { %6012 = vadd.xlane.f32.xlu0 %v6011_v17  ;;  %v7909_v45 = vpack.c.bf16 %v6130_v51, %v6129_v3 }
0x159c   :  { %v6004_v19 = vmul.f32 %v6000_v44, %v6000_v44 }
0x159e   :  { %v6014_v18 = vsel %vm83_vm0, %v6004_v19, 0.0 }
0x159f   :  { %6015 = vadd.xlane.f32.xlu1 %v6014_v18 }
0x1620   :  { %v6007_v42 = vpop.xlane.xlu0 %6006 }
0x1621   :  { %v6017_v40 = vmul.f32 0.03125, %v6007_v42 }
0x1623   :  { %v6021_v28 = vadd.f32 1e-05, %v6017_v40 }
0x1624   :  { %v6010_v8 = vpop.xlane.xlu1 %6009 }
0x1625   :  { %8530 = vrsqrt.f32 %v6021_v28  ;;  %v6018_v13 = vmul.f32 0.03125, %v6010_v8 }
0x1627   :  { %v6022_v2 = vadd.f32 1e-05, %v6018_v13 }
0x1628   :  { %v6013_v6 = vpop.xlane.xlu0 %6012 }
0x1629   :  { %8532 = vrsqrt.f32 %v6022_v2  ;;  %v6019_v34 = vmul.f32 0.03125, %v6013_v6 }
0x162b   :  { %v6023_v35 = vadd.f32 1e-05, %v6019_v34 }
0x162c   :  { %v6016_v9 = vpop.xlane.xlu1 %6015 }
0x162d   :  { %8534 = vrsqrt.f32 %v6023_v35  ;;  %v6020_v41 = vmul.f32 0.03125, %v6016_v9  ;;  %v6534_v9 = vld [vmem:[%s10989_s17] ss:$0 sm:$0xff] }
0x162f   :  { %v8531_v63 = vpop.eup %8530  ;;  %v6024_v57 = vadd.f32 1e-05, %v6020_v41 }
0x1630   :  { %v6029_v47 = vmul.f32 %v8531_v63, %v5997_v53  ;;  %v6535_v63 = vld [vmem:[%s10990_s18] ss:$0 sm:$0xff] }
0x1631   :  { %8536 = vrsqrt.f32 %v6024_v57 }
0x1632   :  { %v6039_v7 = vmul.f32 %v6532_v0, %v6029_v47 }
0x1633   :  { %v8533_v26 = vpop.eup %8532 }
0x1634   :  { %v6049_v15 = vadd.f32 %v6533_v14, %v6039_v7  ;;  %v6030_v52 = vmul.f32 %v8533_v26, %v5998_v39 }
0x1636   :  { %v6055_v1 = vsel %vm83_vm0, %v6049_v15, 0.0  ;;  %v6040_v49 = vmul.f32 %v6532_v0, %v6030_v52 }
0x1637   :  { %v8535_v50 = vpop.eup %8534  ;;  %6056 = vadd.xlane.f32.xlu0 %v6055_v1 }
0x1638   :  { %v6050_v29 = vadd.f32 %v6533_v14, %v6040_v49  ;;  %v6031_v37 = vmul.f32 %v8535_v50, %v5999_v54  ;;  %v6128_v54 = vld [vmem:[%s10988_s19 + $0x8] sm:$0xff] }
0x1639   :  { %v7905_v5 = vpack.c.bf16 %v6128_v54, %v6127_v11 }
0x163a   :  { %v6058_v46 = vsel %vm83_vm0, %v6050_v29, 0.0  ;;  %v6041_v22 = vmul.f32 %v6532_v0, %v6031_v37 }
0x163b   :  { %v8537_v10 = vpop.eup %8536  ;;  %6059 = vadd.xlane.f32.xlu1 %v6058_v46  ;;  %7906 = vmatprep.subr.bf16.mxu1 %v7905_v5 }
0x163c   :  { %v6051_v38 = vadd.f32 %v6533_v14, %v6041_v22  ;;  %v6032_v43 = vmul.f32 %v8537_v10, %v6000_v44  ;;  %7908 = vmatpush3.bf16.msra.mxu1 %v7905_v5  ;;  %v6536_v22 = vld [vmem:[%s10991_s20] ss:$0 sm:$0xff] }
0x163d   :  { %7910 = vmatprep.subr.bf16.mxu1 %v7909_v45 }
0x163e   :  { %v6061_v16 = vsel %vm83_vm0, %v6051_v38, 0.0  ;;  %v6042_v36 = vmul.f32 %v6532_v0, %v6032_v43 }
0x163f   :  { %6062 = vadd.xlane.f32.xlu0 %v6061_v16 }
0x1640   :  { %v6052_v48 = vadd.f32 %v6533_v14, %v6042_v36  ;;  %7912 = vmatpush3.bf16.msra.mxu1 %v7909_v45 }
0x1642   :  { %v6064_v30 = vsel %vm83_vm0, %v6052_v48, 0.0 }
0x1643   :  { %6065 = vadd.xlane.f32.xlu1 %v6064_v30 }
0x16c4   :  { %v6057_v27 = vpop.xlane.xlu0 %6056 }
0x16c5   :  { %v6067_v20 = vmul.f32 0.03125, %v6057_v27 }
0x16c7   :  { %v6071_v23 = vsub.f32 %v6049_v15, %v6067_v20 }
0x16c8   :  { %v6060_v4 = vpop.xlane.xlu1 %6059 }
0x16c9   :  { %v6068_v21 = vmul.f32 0.03125, %v6060_v4  ;;  %v6075_v24 = vmul.f32 %v6071_v23, %v6071_v23 }
0x16cb   :  { %v6072_v56 = vsub.f32 %v6050_v29, %v6068_v21  ;;  %v6079_v31 = vsel %vm83_vm0, %v6075_v24, 0.0 }
0x16cc   :  { %6080 = vadd.xlane.f32.xlu0 %v6079_v31  ;;  %v6063_v25 = vpop.xlane.xlu0 %6062 }
0x16cd   :  { %v6069_v12 = vmul.f32 0.03125, %v6063_v25  ;;  %v6076_v33 = vmul.f32 %v6072_v56, %v6072_v56 }
0x16cf   :  { %v6073_v60 = vsub.f32 %v6051_v38, %v6069_v12  ;;  %v6082_v53 = vsel %vm83_vm0, %v6076_v33, 0.0 }
0x16d0   :  { %6083 = vadd.xlane.f32.xlu1 %v6082_v53  ;;  %v6066_v58 = vpop.xlane.xlu1 %6065 }
0x16d1   :  { %v6070_v59 = vmul.f32 0.03125, %v6066_v58  ;;  %v6077_v32 = vmul.f32 %v6073_v60, %v6073_v60 }
0x16d3   :  { %v6074_v39 = vsub.f32 %v6052_v48, %v6070_v59  ;;  %v6085_v55 = vsel %vm83_vm0, %v6077_v32, 0.0 }
0x16d4   :  { %6086 = vadd.xlane.f32.xlu0 %v6085_v55 }
0x16d5   :  { %v6078_v62 = vmul.f32 %v6074_v39, %v6074_v39 }
0x16d7   :  { %v6088_v61 = vsel %vm83_vm0, %v6078_v62, 0.0 }
0x16d8   :  { %6089 = vadd.xlane.f32.xlu1 %v6088_v61 }
0x1759   :  { %v6081_v44 = vpop.xlane.xlu0 %6080 }
0x175a   :  { %v6091_v17 = vmul.f32 0.03125, %v6081_v44 }
0x175c   :  { %v6095_v19 = vadd.f32 1e-05, %v6091_v17 }
0x175d   :  { %v6084_v18 = vpop.xlane.xlu1 %6083 }
0x175e   :  { %8538 = vrsqrt.f32 %v6095_v19  ;;  %v6092_v42 = vmul.f32 0.03125, %v6084_v18 }
0x1760   :  { %v6096_v40 = vadd.f32 1e-05, %v6092_v42 }
0x1761   :  { %v6087_v28 = vpop.xlane.xlu0 %6086 }
0x1762   :  { %8540 = vrsqrt.f32 %v6096_v40  ;;  %v6093_v8 = vmul.f32 0.03125, %v6087_v28 }
0x1764   :  { %v6097_v13 = vadd.f32 1e-05, %v6093_v8 }
0x1765   :  { %v6090_v2 = vpop.xlane.xlu1 %6089 }
0x1766   :  { %8542 = vrsqrt.f32 %v6097_v13  ;;  %v6094_v6 = vmul.f32 0.03125, %v6090_v2 }
0x1768   :  { %v8539_v34 = vpop.eup %8538  ;;  %v6098_v35 = vadd.f32 1e-05, %v6094_v6 }
0x1769   :  { %v6103_v41 = vmul.f32 %v8539_v34, %v6071_v23 }
0x176a   :  { %8544 = vrsqrt.f32 %v6098_v35 }
0x176b   :  { %v6113_v57 = vmul.f32 %v6534_v9, %v6103_v41 }
0x176c   :  { %v8541_v0 = vpop.eup %8540 }
0x176d   :  { %v6104_v47 = vmul.f32 %v8541_v0, %v6072_v56  ;;  %v6123_v14 = vadd.f32 %v6535_v63, %v6113_v57 }
0x176f   :  { %v6114_v7 = vmul.f32 %v6534_v9, %v6104_v47  ;;  %7459 = vmatprep.mubr.msk.f32.mxu1 %vm83_vm0, %v6123_v14 }
0x1770   :  { %v8543_v26 = vpop.eup %8542 }
0x1771   :  { %v6124_v15 = vadd.f32 %v6535_v63, %v6114_v7  ;;  %v6105_v52 = vmul.f32 %v8543_v26, %v6073_v60 }
0x1773   :  { %7460 = vmatmul.mubr.msk.f32.vlgmr.msra.gmra.mrb[96].mxu1 %vm83_vm0, %v6124_v15  ;;  %v6115_v1 = vmul.f32 %v6534_v9, %v6105_v52 }
0x1774   :  { %v8545_v49 = vpop.eup %8544 }
0x1775   :  { %v6125_v50 = vadd.f32 %v6535_v63, %v6115_v1  ;;  %v6106_v29 = vmul.f32 %v8545_v49, %v6074_v39 }
0x1777   :  { %7462 = vmatprep.mubr.msk.f32.mxu1 %vm83_vm0, %v6125_v50  ;;  %v6116_v37 = vmul.f32 %v6534_v9, %v6106_v29 }
0x1779   :  { %v6126_v46 = vadd.f32 %v6535_v63, %v6116_v37 }
0x177b   :  { %7463 = vmatmul.mubr.msk.f32.gmra.mrb[98].mxu1 %vm83_vm0, %v6126_v46 }
0x1846   :  { %v7461_v10 = vpop.f32.mrb[96].mxu1 }
0x1847   :  { %v6222_v38 = vadd.f32 %v7461_v10, %v6536_v22  ;;  %v6216_v43 = vpop.f32.mrb[97].mxu1 }
0x1848   :  { %v6217_v16 = vadd.f32 %v6536_v22, %v6216_v43 }
0x1849   :  { %6236 = vst.msk [vmem:[%s10992_s21 + $0x8] sm:$0xff] %vm83_vm0, %v6222_v38 }
0x184a   :  { %6235 = vst.msk [vmem:[%s10992_s21] sm:$0xff] %vm83_vm0, %v6217_v16 }
0x184e   :  { %v7464_v36 = vpop.f32.mrb[98].mxu1 }
0x184f   :  { %v6232_v48 = vadd.f32 %v7464_v36, %v6536_v22  ;;  %v6226_v30 = vpop.f32.mrb[99].mxu1 }
0x1850   :  { %v6227_v27 = vadd.f32 %v6536_v22, %v6226_v30 }
0x1851   :  { %6238 = vst.msk [vmem:[%s10992_s21 + $0x18] sm:$0xff] %vm83_vm0, %v6232_v48 }
0x1852   :  { %6237 = vst.msk [vmem:[%s10992_s21 + $0x10] sm:$0xff] %vm83_vm0, %v6227_v27 }

</bundles_post_ra>
